<compile_context>
chip_gen: v7x
topology: tpu7x:2x2x1
jax: 0.10.0
libtpu: 0.0.40
codegen_flags: <defaults>
</compile_context>

<pallas_src>
import math

import jax
import jax.numpy as jnp
import numpy as np
from jax.experimental import pallas as pl
from jax.experimental.pallas import tpu as pltpu

NUM_X = 80
NUM_Y = 80
NUM_Z = 96
C_OUT = NUM_Y + NUM_X + NUM_Z            # 256 output channels
N_COEF = (NUM_Y + NUM_X + NUM_Z) // 2    # 128 unique half-phase coefficients


def _pos_embed_kernel(coords_ref, coef_ref, out_ref):
    # coords_ref: (3, T)   rows = (x, y, z) ray coords, T spatial positions on lanes
    # coef_ref:   (128, 1) rows [0:40]=y, [40:80]=x, [80:128]=z coefficients
    #                      (scale / temperature**(2k/num), scale folded in)
    # out_ref:    (256, T) channels [y:sin|y:cos | x:sin|x:cos | z:sin|z:cos]
    def emit(coef_off, n, coord_row, out_off):
        coef = coef_ref[coef_off:coef_off + n, :]          # (n, 1) lane-broadcast
        coord = coords_ref[coord_row:coord_row + 1, :]     # (1, T) sublane-broadcast
        # NOTE: relies on Mosaic's replicated layouts for the two broadcasts;
        # a stride-0 pl.ds load is an alternative if the dump shows copies.
        ph = coef * coord                                   # (n, T) half-size phase
        out_ref[out_off:out_off + n, :] = jnp.sin(ph).astype(out_ref.dtype)
        out_ref[out_off + n:out_off + 2 * n, :] = jnp.cos(ph).astype(out_ref.dtype)

    emit(0, NUM_Y // 2, 1, 0)                                   # y -> channels [  0,  80)
    emit(NUM_Y // 2, NUM_X // 2, 0, NUM_Y)                      # x -> channels [ 80, 160)
    emit((NUM_Y + NUM_X) // 2, NUM_Z // 2, 2, NUM_Y + NUM_X)    # z -> channels [160, 256)


def _build_constants(temperature, scale):
    """(128, 1) half-phase coefficients: rows [0:40]=y, [40:80]=x, [80:128]=z."""
    def coef(num):
        k = np.arange(num // 2, dtype=np.float64)
        return scale / (float(temperature) ** (2.0 * k / num))

    c = np.concatenate([coef(NUM_Y), coef(NUM_X), coef(NUM_Z)]).astype(np.float32)
    return jnp.asarray(c.reshape(N_COEF, 1))


def position_embedding_sine_ray(x, *, temperature=10000.0, scale=None,
                                tile_hw=4096, out_dtype=jnp.float32):
    """x: (B, H, W, C>=3) float; returns (B, 256, H, W) in `out_dtype`.

    out_dtype=jnp.bfloat16 halves HBM write traffic if the consumer accepts it
    (semantic change vs the PyTorch module, so float32 is the default).
    """
    if scale is None:
        scale = 2.0 * math.pi
    assert tile_hw % 128 == 0
    B, H, W, C = x.shape
    assert C >= 3, "need at least 3 ray coordinates in the last dim"
    HW = H * W

    coef = _build_constants(temperature, scale)

    # Cheap input rearrangement (only 3 channels): (B, 3, HW) — coords on
    # sublanes, spatial on lanes — so the kernel writes the transposed
    # (B, 256, HW) output lane-dense and the final reshape is free.
    coords = jnp.transpose(x[..., :3].astype(jnp.float32).reshape(B, HW, 3),
                           (0, 2, 1))

    tile = min(tile_hw, pl.cdiv(HW, 128) * 128)
    # Keep >= 2 parallel grid steps when possible so both v7x TensorCores get work.
    if B * pl.cdiv(HW, tile) < 2 and HW > 128:
        tile = pl.cdiv(pl.cdiv(HW, 2), 128) * 128

    grid = (B, pl.cdiv(HW, tile))
    out = pl.pallas_call(
        _pos_embed_kernel,
        out_shape=jax.ShapeDtypeStruct((B, C_OUT, HW), out_dtype),
        grid_spec=pltpu.PrefetchScalarGridSpec(
            num_scalar_prefetch=0,
            grid=grid,
            in_specs=[
                pl.BlockSpec((None, 3, tile), lambda b, t: (b, 0, t)),
                pl.BlockSpec((N_COEF, 1), lambda b, t: (0, 0)),
            ],
            out_specs=pl.BlockSpec((None, C_OUT, tile), lambda b, t: (b, 0, t)),
        ),
        compiler_params=pltpu.CompilerParams(
            dimension_semantics=("parallel", "parallel"),
            vmem_limit_bytes=48 * 1024 * 1024,  # stays under v7x's 64 MiB physical VMEM
        ),
    )(coords, coef)

    return out.reshape(B, C_OUT, H, W)  # matches .permute(0, 3, 1, 2)


def _reference(x, temperature=10000.0, scale=2.0 * math.pi):
    """Pure-JAX transcription of the PyTorch forward (for verification)."""
    x = x.astype(jnp.float32)
    x_embed = x[..., 0:1] * scale
    y_embed = x[..., 1:2] * scale
    z_embed = x[..., 2:3] * scale

    def dim_t(n):
        i = jnp.arange(n, dtype=jnp.float32)
        return temperature ** (2.0 * jnp.floor(i / 2.0) / n)

    pos_x = x_embed / dim_t(80)
    pos_y = y_embed / dim_t(80)
    pos_z = z_embed / dim_t(96)

    def stack_flatten(p):
        # torch.stack((p[...,0::2].sin(), p[...,1::2].cos()), dim=3).flatten(3)
        # dim=3 stack => BLOCK layout [sin_all | cos_all] (not interleaved).
        return jnp.concatenate([jnp.sin(p[..., 0::2]), jnp.cos(p[..., 1::2])], axis=-1)

    pos = jnp.concatenate([stack_flatten(pos_y), stack_flatten(pos_x),
                           stack_flatten(pos_z)], axis=-1)
    return jnp.transpose(pos, (0, 3, 1, 2))


if __name__ == "__main__":
    key = jax.random.PRNGKey(0)
    # Shapes: aligned (HW % 128 == 0), ragged last block with a multi-step grid,
    # and a single partial block covering the whole (small, unaligned) extent.
    for (B, H, W) in [(2, 16, 16), (1, 15, 13), (2, 15, 9)]:
        key, k = jax.random.split(key)
        x = jax.random.uniform(k, (B, H, W, 3), dtype=jnp.float32)

        out = jax.block_until_ready(jax.jit(position_embedding_sine_ray)(x))
        ref = jax.block_until_ready(_reference(x))

        assert out.shape == (B, C_OUT, H, W), out.shape
        np.testing.assert_allclose(np.asarray(out), np.asarray(ref),
                                   rtol=1e-5, atol=1e-5)
    print("KERNEL_OK")
</pallas_src>

<mosaic_0001>
module attributes {stable_mosaic.version = 11 : i64} {
  func.func @_pos_embed_kernel(%arg0: i32, %arg1: i32, %arg2: memref<1x3x256xf32, #tpu.memory_space<vmem>>, %arg3: memref<128x1xf32, #tpu.memory_space<vmem>>, %arg4: memref<1x256x256xf32, #tpu.memory_space<vmem>>) attributes {dimension_semantics = [#tpu.dimension_semantics<parallel>, #tpu.dimension_semantics<parallel>], iteration_bounds = array<i64: 2, 1>, scalar_prefetch = 0 : i64, scratch_operands = 0 : i64, tpu.core_type = #tpu.core_type<tc>, window_params = [{transform_indices = @transform_0, window_bounds = array<i64: 1, 3, 256>}, {pipeline_mode = #tpu.pipeline_mode<synchronous>, transform_indices = @transform_1, window_bounds = array<i64: 128, 1>}, {transform_indices = @transform_2, window_bounds = array<i64: 1, 256, 256>}]} {
    %c0 = arith.constant 0 : index
    %c0_0 = arith.constant 0 : index
    %0 = vector.load %arg3[%c0, %c0_0] : memref<128x1xf32, #tpu.memory_space<vmem>>, vector<40x1xf32>
    %c0_1 = arith.constant 0 : index
    %c1 = arith.constant 1 : index
    %c0_2 = arith.constant 0 : index
    %1 = vector.load %arg2[%c0_1, %c1, %c0_2] : memref<1x3x256xf32, #tpu.memory_space<vmem>>, vector<1x1x256xf32>
    %2 = vector.shape_cast %1 : vector<1x1x256xf32> to vector<1x256xf32>
    %3 = vector.broadcast %0 : vector<40x1xf32> to vector<40x256xf32>
    %4 = vector.broadcast %2 : vector<1x256xf32> to vector<40x256xf32>
    %5 = arith.mulf %3, %4 : vector<40x256xf32>
    %6 = math.sin %5 : vector<40x256xf32>
    %c0_3 = arith.constant 0 : index
    %c0_4 = arith.constant 0 : index
    %c0_5 = arith.constant 0 : index
    %7 = vector.load %arg4[%c0_3, %c0_4, %c0_5] : memref<1x256x256xf32, #tpu.memory_space<vmem>>, vector<1x40x256xf32>
    %8 = vector.shape_cast %7 : vector<1x40x256xf32> to vector<40x256xf32>
    %9 = vector.shape_cast %6 : vector<40x256xf32> to vector<1x40x256xf32>
    tpu.vector_store %arg4[%c0_3, %c0_4, %c0_5], %9 {strides = array<i32>} : memref<1x256x256xf32, #tpu.memory_space<vmem>>, vector<1x40x256xf32>,
    %10 = math.cos %5 : vector<40x256xf32>
    %c0_6 = arith.constant 0 : index
    %c40 = arith.constant 40 : index
    %c0_7 = arith.constant 0 : index
    %11 = vector.load %arg4[%c0_6, %c40, %c0_7] : memref<1x256x256xf32, #tpu.memory_space<vmem>>, vector<1x40x256xf32>
    %12 = vector.shape_cast %11 : vector<1x40x256xf32> to vector<40x256xf32>
    %13 = vector.shape_cast %10 : vector<40x256xf32> to vector<1x40x256xf32>
    tpu.vector_store %arg4[%c0_6, %c40, %c0_7], %13 {strides = array<i32>} : memref<1x256x256xf32, #tpu.memory_space<vmem>>, vector<1x40x256xf32>,
    %c40_8 = arith.constant 40 : index
    %c0_9 = arith.constant 0 : index
    %14 = vector.load %arg3[%c40_8, %c0_9] : memref<128x1xf32, #tpu.memory_space<vmem>>, vector<40x1xf32>
    %c0_10 = arith.constant 0 : index
    %c0_11 = arith.constant 0 : index
    %c0_12 = arith.constant 0 : index
    %15 = vector.load %arg2[%c0_10, %c0_11, %c0_12] : memref<1x3x256xf32, #tpu.memory_space<vmem>>, vector<1x1x256xf32>
    %16 = vector.shape_cast %15 : vector<1x1x256xf32> to vector<1x256xf32>
    %17 = vector.broadcast %14 : vector<40x1xf32> to vector<40x256xf32>
    %18 = vector.broadcast %16 : vector<1x256xf32> to vector<40x256xf32>
    %19 = arith.mulf %17, %18 : vector<40x256xf32>
    %20 = math.sin %19 : vector<40x256xf32>
    %c0_13 = arith.constant 0 : index
    %c80 = arith.constant 80 : index
    %c0_14 = arith.constant 0 : index
    %21 = vector.load %arg4[%c0_13, %c80, %c0_14] : memref<1x256x256xf32, #tpu.memory_space<vmem>>, vector<1x40x256xf32>
    %22 = vector.shape_cast %21 : vector<1x40x256xf32> to vector<40x256xf32>
    %23 = vector.shape_cast %20 : vector<40x256xf32> to vector<1x40x256xf32>
    tpu.vector_store %arg4[%c0_13, %c80, %c0_14], %23 {strides = array<i32>} : memref<1x256x256xf32, #tpu.memory_space<vmem>>, vector<1x40x256xf32>,
    %24 = math.cos %19 : vector<40x256xf32>
    %c0_15 = arith.constant 0 : index
    %c120 = arith.constant 120 : index
    %c0_16 = arith.constant 0 : index
    %25 = vector.load %arg4[%c0_15, %c120, %c0_16] : memref<1x256x256xf32, #tpu.memory_space<vmem>>, vector<1x40x256xf32>
    %26 = vector.shape_cast %25 : vector<1x40x256xf32> to vector<40x256xf32>
    %27 = vector.shape_cast %24 : vector<40x256xf32> to vector<1x40x256xf32>
    tpu.vector_store %arg4[%c0_15, %c120, %c0_16], %27 {strides = array<i32>} : memref<1x256x256xf32, #tpu.memory_space<vmem>>, vector<1x40x256xf32>,
    %c80_17 = arith.constant 80 : index
    %c0_18 = arith.constant 0 : index
    %28 = vector.load %arg3[%c80_17, %c0_18] : memref<128x1xf32, #tpu.memory_space<vmem>>, vector<48x1xf32>
    %c0_19 = arith.constant 0 : index
    %c2 = arith.constant 2 : index
    %c0_20 = arith.constant 0 : index
    %29 = vector.load %arg2[%c0_19, %c2, %c0_20] : memref<1x3x256xf32, #tpu.memory_space<vmem>>, vector<1x1x256xf32>
    %30 = vector.shape_cast %29 : vector<1x1x256xf32> to vector<1x256xf32>
    %31 = vector.broadcast %28 : vector<48x1xf32> to vector<48x256xf32>
    %32 = vector.broadcast %30 : vector<1x256xf32> to vector<48x256xf32>
    %33 = arith.mulf %31, %32 : vector<48x256xf32>
    %34 = math.sin %33 : vector<48x256xf32>
    %c0_21 = arith.constant 0 : index
    %c160 = arith.constant 160 : index
    %c0_22 = arith.constant 0 : index
    %35 = vector.load %arg4[%c0_21, %c160, %c0_22] : memref<1x256x256xf32, #tpu.memory_space<vmem>>, vector<1x48x256xf32>
    %36 = vector.shape_cast %35 : vector<1x48x256xf32> to vector<48x256xf32>
    %37 = vector.shape_cast %34 : vector<48x256xf32> to vector<1x48x256xf32>
    tpu.vector_store %arg4[%c0_21, %c160, %c0_22], %37 {strides = array<i32>} : memref<1x256x256xf32, #tpu.memory_space<vmem>>, vector<1x48x256xf32>,
    %38 = math.cos %33 : vector<48x256xf32>
    %c0_23 = arith.constant 0 : index
    %c208 = arith.constant 208 : index
    %c0_24 = arith.constant 0 : index
    %39 = vector.load %arg4[%c0_23, %c208, %c0_24] : memref<1x256x256xf32, #tpu.memory_space<vmem>>, vector<1x48x256xf32>
    %40 = vector.shape_cast %39 : vector<1x48x256xf32> to vector<48x256xf32>
    %41 = vector.shape_cast %38 : vector<48x256xf32> to vector<1x48x256xf32>
    tpu.vector_store %arg4[%c0_23, %c208, %c0_24], %41 {strides = array<i32>} : memref<1x256x256xf32, #tpu.memory_space<vmem>>, vector<1x48x256xf32>,
    return
  }
  func.func @transform_0(%arg0: i32, %arg1: i32) -> (i32, i32, i32) {
    %c0_i32 = arith.constant 0 : i32
    %c0_i32_0 = arith.constant 0 : i32
    return %arg0, %c0_i32, %arg1 : i32, i32, i32
  }
  func.func @transform_1(%arg0: i32, %arg1: i32) -> (i32, i32) {
    %c0_i32 = arith.constant 0 : i32
    %c0_i32_0 = arith.constant 0 : i32
    %c0_i32_1 = arith.constant 0 : i32
    return %c0_i32, %c0_i32_0 : i32, i32
  }
  func.func @transform_2(%arg0: i32, %arg1: i32) -> (i32, i32, i32) {
    %c0_i32 = arith.constant 0 : i32
    %c0_i32_0 = arith.constant 0 : i32
    return %arg0, %c0_i32, %arg1 : i32, i32, i32
  }
}

</mosaic_0001>

<bundles_post_ra>
// kernel: position_embedding_sine_ray.1
= control target key start
LH: loop header
LB: loop body
LE: loop exit
PB: predicated region body
PF: predicated region fallthrough
CT: control target
= control target key end

     0   :  { %7 = vsyncpa [#allocation3], 0  ;;  %s7807_s9 = smov 0   ;;  %s7809_s10 = smov 0   ;;  %s11395_s0 = inlined_call_operand.vmem [shape: f32[2,3,256], index: 0, kind: input, shape index: {}]   ;;  %s11396_s1 = inlined_call_operand.hbm [shape: f32[128,1], index: 1, kind: input, shape index: {}]   ;;  %s11397_s2 = inlined_call_operand.vmem [shape: f32[2,256,256], index: 2, kind: output, shape index: {}]  }
   0x1   :  { %s7811_s11 = smov 0  }
   0x2 LB: > { %s7151_s12 = sadd.s32 4294967295, %s7780_s11   ;;  %s25_s13 = sadd.s32 1, %s7776_s10  ;;  %s7780_s11 = sphi %s7811_s11, %s13_s11   ;;  %s7776_s10 = sphi %s7809_s10, %s11695_s10   ;;  %s7772_s9 = sphi %s7807_s9, %s11694_s9  }
   0x3   : > { %p27_p0 = scmp.ge.s32.totalorder %s25_s13, 2  ;;  %p7153_p1 = scmp.ge.s32.totalorder %s7780_s11, 1 }
   0x4   : > { %p107_p2 = scmp.lt.s32.totalorder %s7780_s11, 3  ;;  %p7832_p4 = scmp.eq.s32.totalorder %s7151_s12, 0 }
   0x5   : > { %s11697_s13 = smov (%p27_p0, %s25_s13), 0  ;;  %s7782_s16 = smov [#allocation2]  }
   0x6   : > { %p7828_p3 = pnand %p7153_p1, %p107_p2  ;;  %s119_s17 = sshll.u32 %s7782_s16, 4  ;;  %s120_s17 = int_to_ptr.vmem [resolvable:$true] %s119_s17 }
   0x7   : > { %s11510_s15 = scalar_select %p7832_p4, 1, 0 }
   0x8   : > { %s11509_s14 = scalar_select %p7828_p3, 1, 0 }
   0x9   : > { %p7556_p5 = pneg %p7828_p3  ;;  %s7726_s21 = scalar_lea.hbm %s11396_s1, 2048 }
   0xa   : > { %p7727_p7 = scmp.ne.s32.totalorder %s11396_s1, %s7726_s21  ;;  %p7733_p11 = scmp.lt.u32.totalorder %s7726_s21, %s11396_s1 }
   0xb   : > { %p7840_p6 = pnand %p7832_p4, %p7556_p5 }
   0xd   : > { %p7728_p8 = pneg %p7840_p6 }
   0xf   : > { %p7729_p9 = pnand %p7728_p8, %p7727_p7 }
  0x11   : > { %p7730_p10 = pneg %p7729_p9 }
  0x13   : > { %p7735_p12 = pnand %p7733_p11, %p7730_p10 }
  0x15   : > { %7738 = shalt.err (!%p7735_p12)
}
  0x16   : > { %s7739_s26 = scalar_lea.vmem %s120_s17, 2048  ;;  %p7747_p2 = scmp.lt.s32.totalorder %s120_s17, %s120_s17 }
  0x17   : > { %p7740_p13 = scmp.ne.s32.totalorder %s120_s17, %s7739_s26  ;;  %p7748_p5 = scmp.lt.s32.totalorder %s7739_s26, %s7739_s26 }
  0x19   : > { %p7742_p0 = pnand %p7740_p13, %p7728_p8  ;;  %p7749_p4 = por %p7748_p5, %p7747_p2 }
  0x1b   : > { %p7743_p1 = pneg %p7742_p0 }
  0x1d   : > { %p7750_p3 = pnand %p7749_p4, %p7743_p1 }
  0x1f   : > { %7753 = shalt.err (!%p7750_p3)
}
  0x20   : > { %s7783_s27 = smov 128   ;;  %s7784_s28 = smov 8  }
  0x21   : > { %7559 = dma.hbm_to_vmem [thread:$0]  (!%p7840_p6), %s11396_s1, 2048, %s120_s17, [#allocation3], %s7783_s27, %s7783_s27, %s7784_s28  }
  0x22   : > { %p11512_p7 = scmp.ne.s32.totalorder %s11509_s14, 0 }
  0x24   : > { %148 = sbr.rel (%p11512_p7) target bundleno = 1070 (0x42e), region = 28 }
  0x2b   : > { %p11513_p9 = scmp.ne.s32.totalorder %s11510_s15, 0 }
  0x2d   : > { %7767 = dma.done.wait (%p11513_p9), [#allocation3], 2048  }
  0x2e   : > { %7769 = vsyncadd (%p11513_p9), [#allocation3], 4294965248  ;;  %v7785_v0 = vmov 0   ;;  %v200_v1 = vld [vmem:[#allocation2 + $0x10] sm:$0xff]  ;;  %v198_v2 = vld [vmem:[#allocation2] sm:$0xff]  ;;  %p179_p3 = scmp.lt.s32.totalorder %s7772_s9, 1  ;;  %v231_v17 = vlaneseq }
  0x2f   : > { %7597 = vset.pattern.permute.xlu1 %v7785_v0  ;;  %7596 = vset.pattern.permute.xlu0 %v7785_v0  ;;  %v201_v3 = vld [vmem:[#allocation2 + $0x18] sm:$0xff]  ;;  %v199_v4 = vld [vmem:[#allocation2 + $0x8] sm:$0xff]  ;;  %v202_v6 = vld [vmem:[#allocation2 + $0x20] sm:$0xff]  ;;  %v11423_v57 = vmov 683565275  }
  0x30   : > { %217 = vperm.xlu1 %7597, %v200_v1   ;;  %207 = vperm.xlu0 %7596, %v198_v2   ;;  %v2341_v5 = vld [vmem:[#allocation2 + $0x28] sm:$0xff]  ;;  %v2343_v7 = vld [vmem:[#allocation2 + $0x38] sm:$0xff]  ;;  %v2342_v8 = vld [vmem:[#allocation2 + $0x30] sm:$0xff]  ;;  %s11699_s9 = smov (!%p179_p3, %s7772_s9), 1  ;;  %v232_v18 = vshrl.u32 %v231_v17, 7 }
  0x31   : > { %v2345_v9 = vld [vmem:[#allocation2 + $0x48] sm:$0xff]  ;;  %v2344_v10 = vld [vmem:[#allocation2 + $0x40] sm:$0xff]  ;;  %v4484_v11 = vld [vmem:[#allocation2 + $0x58] sm:$0xff]  ;;  %s7422_s3 = sshll.u32 %s11699_s9, 3  ;;  %v11421_v61 = vmov 2475754826  }
  0x32   : > { %v4483_v12 = vld [vmem:[#allocation2 + $0x50] sm:$0xff]  ;;  %v4486_v13 = vld [vmem:[#allocation2 + $0x68] sm:$0xff]  ;;  %v4485_v14 = vld [vmem:[#allocation2 + $0x60] sm:$0xff]  ;;  %s7874_s6 = scalar_lea.vmem %s11395_s0, %s7422_s3  ;;  %v7876_v19 = vsub.s32 0, %v232_v18  ;;  %v7878_v20 = vsub.s32 1, %v232_v18  ;;  %s7423_s7 = sshll.u32 %s11699_s9, 9 }
  0x33   : > { %v4488_v15 = vld [vmem:[#allocation2 + $0x78] sm:$0xff]  ;;  %v4487_v16 = vld [vmem:[#allocation2 + $0x70] sm:$0xff]  ;;  %v7162_v21 = vld [vmem:[%s7874_s6 + $0x1] ss:$4 sm:$0x3]  ;;  %s8172_s12 = scalar_lea.vmem %s11397_s2, %s7423_s7 }
  0x34   : > { %222 = vperm.xlu1 %7597, %v201_v3   ;;  %212 = vperm.xlu0 %7596, %v199_v4   ;;  %11514 = vst [vmem:[#allocation5_spill] sm:$0xff] %v7876_v19  ;;  %11515 = vst [vmem:[#allocation6_spill] sm:$0xff] %v7878_v20  ;;  %v7882_v22 = vrot.slane %v7162_v21, %v7876_v19  ;;  %v7885_v23 = vrot.slane %v7162_v21, %v7878_v20  ;;  %v11416_v63 = vmov 2131351028   ;;  %v11412_v1 = vmov 2102212464  }
  0x35   : > { %v11414_v3 = vmov 920167782  }
  0x38   : > { %2349 = vperm.xlu1 %7597, %v2341_v5   ;;  %227 = vperm.xlu0 %7596, %v202_v6  }
  0x3c   : > { %2359 = vperm.xlu1 %7597, %v2343_v7   ;;  %2354 = vperm.xlu0 %7596, %v2342_v8  }
  0x40   : > { %2369 = vperm.xlu1 %7597, %v2345_v9   ;;  %2364 = vperm.xlu0 %7596, %v2344_v10   ;;  %v11410_v10 = vmov 1326507024  }
  0x44   : > { %4498 = vperm.xlu1 %7597, %v4484_v11   ;;  %4493 = vperm.xlu0 %7596, %v4483_v12  }
  0x48   : > { %4508 = vperm.xlu1 %7597, %v4486_v13   ;;  %4503 = vperm.xlu0 %7596, %v4485_v14  }
  0x4c   : > { %4518 = vperm.xlu1 %7597, %v4488_v15   ;;  %4513 = vperm.xlu0 %7596, %v4487_v16  }
  0xaf   : > { %v208_v24 = vpop.permute.xlu0 %207 }
  0xb0   : > { %v7888_v25 = vmul.f32 %v7882_v22, %v208_v24  ;;  %v7891_v26 = vmul.f32 %v7885_v23, %v208_v24 }
  0xb2   : > { %v251_v27 = vand.u32 2147483647, %v7888_v25  ;;  %v254_v28 = vand.u32 2139095040, %v7888_v25  ;;  %v355_v30 = vand.u32 2147483647, %v7891_v26  ;;  %v358_v31 = vand.u32 2139095040, %v7891_v26 }
  0xb3   : > { %v213_v29 = vpop.permute.xlu0 %212  ;;  %vm253_vm14 = vcmp.lt.s32.totalorder %v7888_v25, 0  ;;  %vm357_vm15 = vcmp.lt.s32.totalorder %v7891_v26, 0 }
  0xb4   : > { %v7898_v32 = vmul.f32 %v7882_v22, %v213_v29  ;;  %v255_v33 = vshrl.u32 %v254_v28, 23  ;;  %v258_v34 = vand.u32 8388607, %v251_v27  ;;  %v359_v35 = vshrl.u32 %v358_v31, 23 }
  0xb5   : > { %v362_v36 = vand.u32 8388607, %v355_v30  ;;  %v7906_v43 = vmul.f32 %v7885_v23, %v213_v29  ;;  %vm7993_vm13 = vcmp.le.f32.partialorder %v251_v27, 0.7853982 }
  0xb6   : > { %v7163_v37 = vadd.s32 4294967169, %v255_v33  ;;  %v7167_v38 = vadd.s32 4294967169, %v359_v35  ;;  %v259_v39 = vor.u32 8388608, %v258_v34  ;;  %v462_v42 = vand.u32 2139095040, %v7898_v32 }
  0xb7   : > { %v363_v44 = vor.u32 8388608, %v362_v36  ;;  %v459_v45 = vand.u32 2147483647, %v7898_v32  ;;  %v566_v55 = vand.u32 2139095040, %v7906_v43 }
  0xb8   : > { %v261_v40 = vadd.s32 1, %v7163_v37  ;;  %v365_v41 = vadd.s32 1, %v7167_v38  ;;  %v463_v46 = vshrl.u32 %v462_v42, 23  ;;  %v7909_v51 = vshll.u32 %v259_v39, 8 }
  0xb9   : > { %v7913_v53 = vshll.u32 %v363_v44, 8  ;;  %v7917_v54 = vand.u32 8388607, %v459_v45 }
  0xba   : > { %vm262_vm0 = vcmp.gt.s32.totalorder %v261_v40, 0  ;;  %vm366_vm1 = vcmp.gt.s32.totalorder %v365_v41, 0  ;;  %v7921_v60 = vadd.s32 4294967169, %v463_v46 }
  0xbb   : > { %v263_v47 = vsel %vm262_vm0, %v261_v40, 0  ;;  %v367_v48 = vsel %vm366_vm1, %v365_v41, 0  ;;  %vm8033_vm0 = vcmp.le.f32.partialorder %v355_v30, 0.7853982 }
  0xbc   : > { %v264_v49 = vshrl.u32 %v263_v47, 5  ;;  %v265_v50 = vand.u32 31, %v263_v47  ;;  %v7911_v52 = vshrl.u32 %v367_v48, 5  ;;  %v369_v59 = vand.u32 31, %v367_v48 }
  0xbe   : > { %v266_v56 = vsub.s32 32, %v265_v50  ;;  %v268_v58 = vshll.u32 %v11423_v57, %v265_v50  ;;  %v271_v62 = vshll.u32 %v11421_v61, %v265_v50  ;;  %v274_v0 = vshll.u32 %v11416_v63, %v265_v50 }
  0xbf   : > { %v277_v2 = vshll.u32 %v11412_v1, %v265_v50  ;;  %v280_v4 = vshll.u32 %v11414_v3, %v265_v50  ;;  %vm283_vm2 = vcmp.lt.s32.totalorder %v264_v49, 1  ;;  %vm284_vm3 = vcmp.lt.s32.totalorder %v264_v49, 2 }
  0xc0   : > { %v269_v5 = vshrl.u32 %v11421_v61, %v266_v56  ;;  %v272_v6 = vshrl.u32 %v11416_v63, %v266_v56  ;;  %v275_v7 = vshrl.u32 %v11412_v1, %v266_v56  ;;  %v267_v8 = vshrl.u32 %v11423_v57, %v266_v56 }
  0xc1   : > { %v278_v9 = vshrl.u32 %v11414_v3, %v266_v56  ;;  %v281_v11 = vshrl.u32 %v11410_v10, %v266_v56  ;;  %v370_v15 = vsub.s32 32, %v369_v59  ;;  %vm285_vm4 = vcmp.lt.s32.totalorder %v264_v49, 3 }
  0xc2   : > { %v270_v12 = vor.u32 %v269_v5, %v268_v58  ;;  %v273_v13 = vor.u32 %v272_v6, %v271_v62  ;;  %v276_v14 = vor.u32 %v275_v7, %v274_v0  ;;  %vm286_vm5 = vcmp.lt.s32.totalorder %v264_v49, 4 }
  0xc3   : > { %v279_v16 = vor.u32 %v278_v9, %v277_v2  ;;  %v282_v17 = vor.u32 %v281_v11, %v280_v4  ;;  %v372_v34 = vshll.u32 %v11423_v57, %v369_v59  ;;  %v373_v37 = vshrl.u32 %v11421_v61, %v370_v15 }
  0xc4   : > { %v287_v18 = vsel %vm283_vm2, %v267_v8, %v270_v12  ;;  %v288_v21 = vsel %vm286_vm5, %v276_v14, 2102212464  ;;  %v291_v24 = vsel %vm283_vm2, %v270_v12, %v273_v13  ;;  %v295_v28 = vsel %vm283_vm2, %v273_v13, %v276_v14 }
  0xc5   : > { %v289_v29 = vsel %vm285_vm4, %v273_v13, %v288_v21  ;;  %v292_v31 = vsel %vm286_vm5, %v279_v16, 920167782  ;;  %v296_v33 = vsel %vm286_vm5, %v282_v17, 1326507024  ;;  %v375_v38 = vshll.u32 %v11421_v61, %v369_v59 }
  0xc6   : > { %v293_v35 = vsel %vm285_vm4, %v276_v14, %v292_v31  ;;  %v297_v36 = vsel %vm285_vm4, %v279_v16, %v296_v33  ;;  %v290_v39 = vsel %vm284_vm3, %v287_v18, %v289_v29  ;;  %v376_v42 = vshrl.u32 %v11416_v63, %v370_v15 }
  0xc7   : > { %v294_v40 = vsel %vm284_vm3, %v291_v24, %v293_v35  ;;  %v298_v41 = vsel %vm284_vm3, %v295_v28, %v297_v36  ;;  %v374_v50 = vor.u32 %v373_v37, %v372_v34  ;;  %v378_v58 = vshll.u32 %v11416_v63, %v369_v59 }
  0xc8   : > { %v7944_v44 = vmul.u32.u64.low %v7909_v51, %v298_v41  ;;  %v7945_v46 = vmul.u32.u64.high %v7909_v51, %v298_v41, %v7944_v44  ;;  %v7948_v47 = vmul.u32.u64.low %v7909_v51, %v294_v40  ;;  %v7949_v48 = vmul.u32.u64.high %v7909_v51, %v294_v40, %v7948_v47 }
  0xc9   : > { %v377_v56 = vor.u32 %v376_v42, %v375_v38  ;;  %v379_v62 = vshrl.u32 %v11412_v1, %v370_v15  ;;  %v371_v0 = vshrl.u32 %v11423_v57, %v370_v15  ;;  %v381_v49 = vshll.u32 %v11412_v1, %v369_v59 }
  0xca   : > { %v382_v2 = vshrl.u32 %v11414_v3, %v370_v15  ;;  %v385_v4 = vshrl.u32 %v11410_v10, %v370_v15  ;;  %v306_v5 = vmul.u32 %v7909_v51, %v290_v39  ;;  %v384_v7 = vshll.u32 %v11414_v3, %v369_v59 }
  0xcb   : > { %v380_v6 = vor.u32 %v379_v62, %v378_v58  ;;  %vm387_vm6 = vcmp.lt.s32.totalorder %v7911_v52, 1  ;;  %vm308_vm7 = vc.u32 %v7945_v46, %v7948_v47  ;;  %v309_v8 = vadd.s32 1, %v7949_v48 }
  0xcc   : > { %v383_v9 = vor.u32 %v382_v2, %v381_v49  ;;  %vm388_vm8 = vcmp.lt.s32.totalorder %v7911_v52, 2  ;;  %v386_v11 = vor.u32 %v385_v4, %v384_v7  ;;  %vm389_vm9 = vcmp.lt.s32.totalorder %v7911_v52, 3 }
  0xcd   : > { %vm390_vm10 = vcmp.lt.s32.totalorder %v7911_v52, 4  ;;  %v395_v12 = vsel %vm387_vm6, %v374_v50, %v377_v56  ;;  %v310_v51 = vsel %vm308_vm7, %v309_v8, %v7949_v48  ;;  %v399_v59 = vsel %vm387_vm6, %v377_v56, %v380_v6 }
  0xce   : > { %v392_v13 = vsel %vm390_vm10, %v380_v6, 2102212464  ;;  %v396_v14 = vsel %vm390_vm10, %v383_v9, 920167782  ;;  %v311_v15 = vadd.s32 %v310_v51, %v306_v5  ;;  %v391_v16 = vsel %vm387_vm6, %v371_v0, %v374_v50 }
  0xcf   : > { %v397_v17 = vsel %vm389_vm9, %v380_v6, %v396_v14  ;;  %v400_v18 = vsel %vm390_vm10, %v386_v11, 1326507024  ;;  %v393_v21 = vsel %vm389_vm9, %v377_v56, %v392_v13  ;;  %v469_v29 = vadd.s32 1, %v7921_v60 }
  0xd0   : > { %v398_v24 = vsel %vm388_vm8, %v395_v12, %v397_v17  ;;  %v401_v28 = vsel %vm389_vm9, %v383_v9, %v400_v18  ;;  %v312_v31 = vadd.s32 536870912, %v311_v15  ;;  %v567_v38 = vshrl.u32 %v566_v55, 23 }
  0xd1   : > { %v402_v33 = vsel %vm388_vm8, %v399_v59, %v401_v28  ;;  %v7972_v34 = vmul.u32.u64.low %v7913_v53, %v398_v24  ;;  %v7973_v35 = vmul.u32.u64.high %v7913_v53, %v398_v24, %v7972_v34  ;;  %vm470_vm11 = vcmp.gt.s32.totalorder %v469_v29, 0 }
  0xd2   : > { %v7976_v36 = vmul.u32.u64.low %v7913_v53, %v402_v33  ;;  %v7977_v37 = vmul.u32.u64.high %v7913_v53, %v402_v33, %v7976_v36  ;;  %v313_v39 = vshrl.u32 %v312_v31, 30  ;;  %v394_v60 = vsel %vm388_vm8, %v391_v16, %v393_v21 }
  0xd3   : > { %v471_v40 = vsel %vm470_vm11, %v469_v29, 0  ;;  %v413_v44 = vadd.s32 1, %v7973_v35  ;;  %v467_v48 = vor.u32 8388608, %v7917_v54  ;;  %v563_v50 = vand.u32 2147483647, %v7906_v43 }
  0xd4   : > { %v473_v41 = vand.u32 31, %v471_v40  ;;  %v314_v42 = vshll.u32 %v313_v39, 30  ;;  %v410_v56 = vmul.u32 %v7913_v53, %v394_v60  ;;  %vm412_vm12 = vc.u32 %v7977_v37, %v7972_v34 }
  0xd5   : > { %v7175_v62 = vadd.s32 4294967169, %v567_v38  ;;  %v337_v0 = vsub.s32 4, %v313_v39  ;;  %v414_v52 = vsel %vm412_vm12, %v413_v44, %v7973_v35  ;;  %v307_v53 = vadd.s32 %v7948_v47, %v7945_v46 }
  0xd6   : > { %v474_v58 = vsub.s32 32, %v473_v41  ;;  %v7988_v55 = vsub.s32 %v311_v15, %v314_v42  ;;  %v415_v54 = vadd.s32 %v414_v52, %v410_v56  ;;  %v8000_v4 = vshll.u32 %v467_v48, 8 }
  0xd7   : > { %v8004_v5 = vand.u32 8388607, %v563_v50  ;;  %v8006_v7 = vshrl.u32 %v471_v40, 5  ;;  %v8009_v8 = vadd.s32 1, %v7175_v62  ;;  %v338_v46 = vsel %vm253_vm14, %v337_v0, %v313_v39 }
  0xd8   : > { %v317_v2 = vsub.s32 0, %v7988_v55  ;;  %v416_v6 = vadd.s32 536870912, %v415_v54  ;;  %v477_v27 = vshrl.u32 %v11421_v61, %v474_v58  ;;  %v480_v47 = vshrl.u32 %v11416_v63, %v474_v58 }
  0xd9   : > { %v483_v11 = vshrl.u32 %v11412_v1, %v474_v58  ;;  %v8017_v12 = vadd.s32 %v7972_v34, %v7977_v37  ;;  %v476_v13 = vshll.u32 %v11423_v57, %v473_v41  ;;  %v486_v14 = vshrl.u32 %v11414_v3, %v474_v58 }
  0xda   : > { %v7164_v9 = vmin.u32 %v317_v2, %v7988_v55  ;;  %v417_v51 = vshrl.u32 %v416_v6, 30  ;;  %v479_v15 = vshll.u32 %v11421_v61, %v473_v41  ;;  %v482_v16 = vshll.u32 %v11416_v63, %v473_v41 }
  0xdb   : > { %v489_v17 = vshrl.u32 %v11410_v10, %v474_v58  ;;  %v8027_v18 = vsel %vm7993_vm13, 0, %v338_v46  ;;  %v478_v24 = vor.u32 %v477_v27, %v476_v13  ;;  %v485_v28 = vshll.u32 %v11412_v1, %v473_v41 }
  0xdc   : > { %v319_v59 = vclz %v7164_v9  ;;  %v418_v21 = vshll.u32 %v417_v51, 30  ;;  %v481_v31 = vor.u32 %v480_v47, %v479_v15  ;;  %v484_v33 = vor.u32 %v483_v11, %v482_v16 }
  0xdd   : > { %v488_v34 = vshll.u32 %v11414_v3, %v473_v41  ;;  %v441_v37 = vsub.s32 4, %v417_v51  ;;  %v475_v38 = vshrl.u32 %v11423_v57, %v474_v58  ;;  %v487_v39 = vor.u32 %v486_v14, %v485_v28 }
  0xde   : > { %v7165_v29 = vadd.s32 4294967294, %v319_v59  ;;  %v8037_v36 = vsub.s32 %v415_v54, %v418_v21  ;;  %vm491_vm2 = vcmp.lt.s32.totalorder %v8006_v7, 1  ;;  %vm492_vm3 = vcmp.lt.s32.totalorder %v8006_v7, 2 }
  0xdf   : > { %v490_v60 = vor.u32 %v489_v17, %v488_v34  ;;  %vm493_vm4 = vcmp.lt.s32.totalorder %v8006_v7, 3  ;;  %vm494_vm5 = vcmp.lt.s32.totalorder %v8006_v7, 4  ;;  %v499_v48 = vsel %vm491_vm2, %v478_v24, %v481_v31 }
  0xe0   : > { %vm7166_vm1 = vcmp.lt.s32.totalorder %v7165_v29, 0  ;;  %v421_v41 = vsub.s32 0, %v8037_v36  ;;  %v496_v44 = vsel %vm494_vm5, %v484_v33, 2102212464  ;;  %v500_v62 = vsel %vm494_vm5, %v487_v39, 920167782 }
  0xe1   : > { %v322_v40 = vsel %vm7166_vm1, 0, %v7165_v29  ;;  %v503_v0 = vsel %vm491_vm2, %v481_v31, %v484_v33  ;;  %v501_v2 = vsel %vm493_vm4, %v484_v33, %v500_v62  ;;  %v504_v6 = vsel %vm494_vm5, %v490_v60, 1326507024 }
  0xe2   : > { %v323_v30 = vsub.s32 32, %v322_v40  ;;  %v327_v42 = vsub.s32 4294967266, %v322_v40  ;;  %v324_v56 = vshll.u32 %v7988_v55, %v322_v40  ;;  %v7168_v58 = vmin.u32 %v421_v41, %v8037_v36 }
  0xe3   : > { %v442_v9 = vsel %vm357_vm15, %v441_v37, %v417_v51  ;;  %v495_v46 = vsel %vm491_vm2, %v475_v38, %v478_v24  ;;  %v497_v55 = vsel %vm493_vm4, %v481_v31, %v496_v44  ;;  %v505_v13 = vsel %vm493_vm4, %v487_v39, %v504_v6  ;;  %v218_v38 = vpop.permute.xlu1 %217 }
  0xe4   : > { %v325_v52 = vshrl.u32 %v307_v53, %v323_v30  ;;  %v328_v54 = vadd.s32 127, %v327_v42  ;;  %v423_v27 = vclz %v7168_v58  ;;  %v502_v53 = vsel %vm492_vm3, %v499_v48, %v501_v2 }
  0xe5   : > { %v506_v59 = vsel %vm492_vm3, %v503_v0, %v505_v13  ;;  %v8066_v51 = vmul.u32.u64.low %v8000_v4, %v502_v53  ;;  %v8067_v15 = vmul.u32.u64.high %v8000_v4, %v502_v53, %v8066_v51  ;;  %v8072_v17 = vsel %vm8033_vm0, 0, %v442_v9 }
  0xe6   : > { %v326_v47 = vor.u32 %v325_v52, %v324_v56  ;;  %v329_v11 = vshll.u32 %v328_v54, 23  ;;  %v7169_v14 = vadd.s32 4294967294, %v423_v27  ;;  %v344_v28 = vadd.s32 3, %v8027_v18 }
  0xe7   : > { %v8075_v21 = vmul.u32.u64.low %v8000_v4, %v506_v59  ;;  %v8076_v24 = vmul.u32.u64.high %v8000_v4, %v506_v59, %v8075_v21  ;;  %v498_v29 = vsel %vm492_vm3, %v495_v46, %v497_v55  ;;  %vm574_vm7 = vcmp.gt.s32.totalorder %v8009_v8, 0 }
  0xe8   : > { %v330_v16 = vor.u32 4788187, %v329_v11  ;;  %vm7170_vm6 = vcmp.lt.s32.totalorder %v7169_v14, 0  ;;  %v333_v33 = vcvt.s32.f32 %v326_v47  ;;  %v575_v37 = vsel %vm574_vm7, %v8009_v8, 0 }
  0xe9   : > { %v426_v34 = vsel %vm7170_vm6, 0, %v7169_v14  ;;  %v448_v40 = vadd.s32 3, %v8072_v17  ;;  %v517_v41 = vadd.s32 1, %v8067_v15  ;;  %v514_v7 = vmul.u32 %v8000_v4, %v498_v29 }
  0xea   : > { %v331_v31 = vand.u32 2147483647, %v330_v16  ;;  %v427_v39 = vsub.s32 32, %v426_v34  ;;  %v431_v60 = vsub.s32 4294967266, %v426_v34  ;;  %v428_v42 = vshll.u32 %v8037_v36, %v426_v34 }
  0xeb   : > { %vm516_vm8 = vc.u32 %v8076_v24, %v8066_v51  ;;  %v577_v56 = vand.u32 31, %v575_v37  ;;  %v8092_v58 = vmul.f32 %v7882_v22, %v218_v38  ;;  %v8095_v52 = vmul.f32 %v7885_v23, %v218_v38 }
  0xec   : > { %v334_v30 = vmul.f32 %v333_v33, %v331_v31  ;;  %v429_v44 = vshrl.u32 %v8017_v12, %v427_v39  ;;  %v432_v48 = vadd.s32 127, %v431_v60  ;;  %v518_v8 = vsel %vm516_vm8, %v517_v41, %v8067_v15 }
  0xed   : > { %v519_v0 = vadd.s32 %v518_v8, %v514_v7  ;;  %11520 = vst [vmem:[#allocation7_spill] sm:$0xff] %v8095_v52  ;;  %v578_v4 = vsub.s32 32, %v577_v56  ;;  %v8099_v6 = vand.u32 3, %v344_v28  ;;  %v571_v27 = vor.u32 8388608, %v8004_v5 }
  0xee   : > { %v335_v62 = vxor.u32 2147483648, %v334_v30  ;;  %v430_v36 = vor.u32 %v429_v44, %v428_v42  ;;  %v433_v54 = vshll.u32 %v432_v48, 23  ;;  %v8105_v55 = vand.u32 3, %v448_v40 }
  0xef   : > { %v520_v12 = vadd.s32 536870912, %v519_v0  ;;  %v586_v47 = vshll.u32 %v11416_v63, %v577_v56  ;;  %v581_v53 = vshrl.u32 %v11421_v61, %v578_v4  ;;  %v584_v13 = vshrl.u32 %v11416_v63, %v578_v4 }
  0xf0   : > { %v336_v2 = vsel %vm253_vm14, %v335_v62, %v334_v30  ;;  %v434_v46 = vor.u32 4788187, %v433_v54  ;;  %v437_v59 = vcvt.s32.f32 %v430_v36  ;;  %v587_v5 = vshrl.u32 %v11412_v1, %v578_v4 }
  0xf1   : > { %v339_v9 = vsel %vm7993_vm13, %v7888_v25, %v336_v2  ;;  %v8108_v11 = vshrl.u32 %v520_v12, 30  ;;  %v576_v15 = vshrl.u32 %v575_v37, 5  ;;  %v580_v16 = vshll.u32 %v11423_v57, %v577_v56 }
  0xf2   : > { %7598 = vcosq.f32 %v339_v9  ;;  %v435_v14 = vand.u32 2147483647, %v434_v46  ;;  %v583_v21 = vshll.u32 %v11421_v61, %v577_v56  ;;  %v588_v29 = vor.u32 %v587_v5, %v586_v47 }
  0xf3   : > { %7600 = vsinq.f32 %v339_v9  ;;  %v522_v49 = vshll.u32 %v8108_v11, 30  ;;  %v589_v31 = vshll.u32 %v11412_v1, %v577_v56  ;;  %v590_v33 = vshrl.u32 %v11414_v3, %v578_v4 }
  0xf4   : > { %v438_v28 = vmul.f32 %v437_v59, %v435_v14  ;;  %vm350_vm9 = vcmp.eq.s32.totalorder %v8099_v6, 2  ;;  %v582_v38 = vor.u32 %v581_v53, %v580_v16  ;;  %v585_v39 = vor.u32 %v584_v13, %v583_v21 }
  0xf5   : > { %v8119_v34 = vsub.s32 %v519_v0, %v522_v49  ;;  %v593_v60 = vshrl.u32 %v11410_v10, %v578_v4  ;;  %vm347_vm10 = vcmp.eq.s32.totalorder %v8099_v6, 0  ;;  %v591_v40 = vor.u32 %v590_v33, %v589_v31 }
  0xf6   : > { %v439_v37 = vxor.u32 2147483648, %v438_v28  ;;  %v592_v41 = vshll.u32 %v11414_v3, %v577_v56  ;;  %v8124_v30 = vshll.u32 %v571_v27, 8  ;;  %vm346_vm11 = vcmp.lt.s32.totalorder %v8099_v6, 2 }
  0xf7   : > { %v525_v42 = vsub.s32 0, %v8119_v34  ;;  %v579_v7 = vshrl.u32 %v11423_v57, %v578_v4  ;;  %vm595_vm12 = vcmp.lt.s32.totalorder %v576_v15, 1  ;;  %vm598_vm13 = vcmp.lt.s32.totalorder %v576_v15, 4 }
  0xf8   : > { %vm343_vm14 = vweird.f32 %v7888_v25  ;;  %v440_v44 = vsel %vm357_vm15, %v439_v37, %v438_v28  ;;  %vm461_vm1 = vcmp.lt.s32.totalorder %v7898_v32, 0  ;;  %v594_v48 = vor.u32 %v593_v60, %v592_v41 }
  0xf9   : > { %v600_v8 = vsel %vm598_vm13, %v588_v29, 2102212464  ;;  %v604_v56 = vsel %vm598_vm13, %v591_v40, 920167782  ;;  %v443_v62 = vsel %vm8033_vm0, %v7891_v26, %v440_v44  ;;  %v7172_v0 = vmin.u32 %v525_v42, %v8119_v34 }
  0xfa   : > { %vm597_vm2 = vcmp.lt.s32.totalorder %v576_v15, 3  ;;  %v603_v36 = vsel %vm595_vm12, %v582_v38, %v585_v39  ;;  %7602 = vcosq.f32 %v443_v62  ;;  %v599_v54 = vsel %vm595_vm12, %v579_v7, %v582_v38 }
  0xfb   : > { %v601_v4 = vsel %vm597_vm2, %v585_v39, %v600_v8  ;;  %v605_v2 = vsel %vm597_vm2, %v588_v29, %v604_v56  ;;  %7604 = vsinq.f32 %v443_v62  ;;  %vm8147_vm15 = vcmp.le.f32.partialorder %v459_v45, 0.7853982 }
  0xfc   : > { %v8143_v12 = vpop.eup %7598  ;;  %v527_v27 = vclz %v7172_v0  ;;  %vm596_vm0 = vcmp.lt.s32.totalorder %v576_v15, 2  ;;  %v607_v9 = vsel %vm595_vm12, %v585_v39, %v588_v29  ;;  %v545_v53 = vsub.s32 4, %v8108_v11 }
  0xfd   : > { %v8152_v46 = vpop.eup %7600  ;;  %v11407_v47 = vxor.u32 2147483648, %v8143_v12  ;;  %v606_v13 = vsel %vm596_vm0, %v603_v36, %v605_v2  ;;  %v608_v14 = vsel %vm598_vm13, %v594_v48, 1326507024  ;;  %v602_v5 = vsel %vm596_vm0, %v599_v54, %v601_v4 }
  0xfe   : > { %v11408_v59 = vxor.u32 2147483648, %v8152_v46  ;;  %v7173_v45 = vadd.s32 4294967294, %v527_v27  ;;  %v609_v49 = vsel %vm597_vm2, %v591_v40, %v608_v14  ;;  %v515_v39 = vadd.s32 %v8066_v51, %v8076_v24 }
  0xff   : > { %v352_v16 = vsel %vm350_vm9, %v11407_v47, %v8152_v46  ;;  %v610_v21 = vsel %vm596_vm0, %v607_v9, %v609_v49  ;;  %v8166_v28 = vmul.u32.u64.low %v8124_v30, %v606_v13  ;;  %v8167_v29 = vmul.u32.u64.high %v8124_v30, %v606_v13, %v8166_v28 }
 0x100   : > { %v349_v15 = vsel %vm347_vm10, %v8143_v12, %v11408_v59  ;;  %vm7174_vm3 = vcmp.lt.s32.totalorder %v7173_v45, 0  ;;  %v8180_v31 = vmul.u32.u64.low %v8124_v30, %v610_v21  ;;  %v8181_v33 = vmul.u32.u64.high %v8124_v30, %v610_v21, %v8180_v31 }
 0x101   : > { %v353_v38 = vsel %vm346_vm11, %v349_v15, %v352_v16  ;;  %v530_v60 = vsel %vm7174_vm3, 0, %v7173_v45  ;;  %v670_v37 = vand.u32 2139095040, %v8092_v58  ;;  %vm447_vm4 = vweird.f32 %v7891_v26 }
 0x102   : > { %v354_v40 = vsel %vm343_vm14, nan, %v353_v38  ;;  %v531_v41 = vsub.s32 32, %v530_v60  ;;  %v535_v42 = vsub.s32 4294967266, %v530_v60  ;;  %v546_v7 = vsel %vm461_vm1, %v545_v53, %v8108_v11 }
 0x103   : > { %v618_v6 = vmul.u32 %v8124_v30, %v602_v5  ;;  %v621_v44 = vadd.s32 1, %v8167_v29  ;;  %v667_v51 = vand.u32 2147483647, %v8092_v58  ;;  %v671_v24 = vshrl.u32 %v670_v37, 23  ;;  %1291 = vst [vmem:[%s8172_s12] sm:$0xff] %v354_v40 }
 0x104   : > { %v532_v48 = vshll.u32 %v8119_v34, %v530_v60  ;;  %v533_v8 = vshrl.u32 %v515_v39, %v531_v41  ;;  %v536_v56 = vadd.s32 127, %v535_v42  ;;  %vm620_vm5 = vc.u32 %v8181_v33, %v8166_v28  ;;  %v8200_v62 = vpop.eup %7602 }
 0x105   : > { %vm450_vm6 = vcmp.lt.s32.totalorder %v8105_v55, 2  ;;  %v8205_v11 = vsel %vm8147_vm15, 0, %v546_v7  ;;  %v622_v30 = vsel %vm620_vm5, %v621_v44, %v8167_v29  ;;  %v7179_v0 = vadd.s32 4294967169, %v671_v24  ;;  %v8208_v36 = vpop.eup %7604 }
 0x106   : > { %v11404_v54 = vxor.u32 2147483648, %v8200_v62  ;;  %v534_v34 = vor.u32 %v533_v8, %v532_v48  ;;  %v537_v4 = vshll.u32 %v536_v56, 23  ;;  %v623_v2 = vadd.s32 %v622_v30, %v618_v6 }
 0x107   : > { %vm451_vm7 = vcmp.eq.s32.totalorder %v8105_v55, 0  ;;  %v11405_v27 = vxor.u32 2147483648, %v8208_v36  ;;  %vm454_vm8 = vcmp.eq.s32.totalorder %v8105_v55, 2  ;;  %v677_v9 = vadd.s32 1, %v7179_v0 }
 0x108   : > { %v456_v53 = vsel %vm454_vm8, %v11404_v54, %v8208_v36  ;;  %v538_v13 = vor.u32 4788187, %v537_v4  ;;  %v552_v14 = vadd.s32 3, %v8205_v11  ;;  %v624_v45 = vadd.s32 536870912, %v623_v2 }
 0x109   : > { %v453_v5 = vsel %vm451_vm7, %v8200_v62, %v11405_v27  ;;  %v541_v49 = vcvt.s32.f32 %v534_v34  ;;  %v674_v16 = vand.u32 8388607, %v667_v51  ;;  %vm678_vm9 = vcmp.gt.s32.totalorder %v677_v9, 0 }
 0x10a   : > { %v457_v21 = vsel %vm450_vm6, %v453_v5, %v456_v53  ;;  %v539_v29 = vand.u32 2147483647, %v538_v13  ;;  %v625_v15 = vshrl.u32 %v624_v45, 30  ;;  %v679_v31 = vsel %vm678_vm9, %v677_v9, 0 }
 0x10b   : > { %v458_v38 = vsel %vm447_vm4, nan, %v457_v21  ;;  %v681_v39 = vand.u32 31, %v679_v31  ;;  %v8227_v37 = vand.u32 3, %v552_v14  ;;  %vm565_vm10 = vcmp.lt.s32.totalorder %v7906_v43, 0 }
 0x10c   : > { %v542_v60 = vmul.f32 %v541_v49, %v539_v29  ;;  %v626_v40 = vshll.u32 %v625_v15, 30  ;;  %1292 = vst [vmem:[%s8172_s12 + $0x8] sm:$0xff] %v458_v38  ;;  %v8232_v41 = vadd.s32 %v8166_v28, %v8181_v33  ;;  %v675_v42 = vor.u32 8388608, %v674_v16 }
 0x10d   : > { %v682_v55 = vsub.s32 32, %v681_v39  ;;  %v774_v7 = vand.u32 2139095040, %v8095_v52  ;;  %v649_v24 = vsub.s32 4, %v625_v15  ;;  %v8237_v48 = vshrl.u32 %v679_v31, 5 }
 0x10e   : > { %v543_v6 = vxor.u32 2147483648, %v542_v60  ;;  %v8235_v44 = vsub.s32 %v623_v2, %v626_v40  ;;  %v684_v8 = vshll.u32 %v11423_v57, %v681_v39  ;;  %v687_v30 = vshll.u32 %v11421_v61, %v681_v39 }
 0x10f   : > { %v685_v56 = vshrl.u32 %v11421_v61, %v682_v55  ;;  %v688_v0 = vshrl.u32 %v11416_v63, %v682_v55  ;;  %vm8247_vm11 = vcmp.le.f32.partialorder %v563_v50, 0.7853982  ;;  %v690_v4 = vshll.u32 %v11416_v63, %v681_v39 }
 0x110   : > { %v544_v28 = vsel %vm461_vm1, %v543_v6, %v542_v60  ;;  %v629_v34 = vsub.s32 0, %v8235_v44  ;;  %v691_v2 = vshrl.u32 %v11412_v1, %v682_v55  ;;  %v693_v13 = vshll.u32 %v11412_v1, %v681_v39 }
 0x111   : > { %v547_v9 = vsel %vm8147_vm15, %v7898_v32, %v544_v28  ;;  %v686_v53 = vor.u32 %v685_v56, %v684_v8  ;;  %v694_v14 = vshrl.u32 %v11414_v3, %v682_v55  ;;  %v689_v45 = vor.u32 %v688_v0, %v687_v30 }
 0x112   : > { %7606 = vcosq.f32 %v547_v9  ;;  %v7176_v50 = vmin.u32 %v629_v34, %v8235_v44  ;;  %v692_v5 = vor.u32 %v691_v2, %v690_v4  ;;  %v696_v16 = vshll.u32 %v11414_v3, %v681_v39 }
 0x113   : > { %7608 = vsinq.f32 %v547_v9  ;;  %v695_v49 = vor.u32 %v694_v14, %v693_v13  ;;  %v697_v21 = vshrl.u32 %v11410_v10, %v682_v55  ;;  %v8262_v31 = vshll.u32 %v675_v42, 8 }
 0x114   : > { %v631_v29 = vclz %v7176_v50  ;;  %v771_v35 = vand.u32 2147483647, %v8095_v52  ;;  %v775_v38 = vshrl.u32 %v774_v7, 23  ;;  %v650_v60 = vsel %vm565_vm10, %v649_v24, %v625_v15 }
 0x115   : > { %v683_v40 = vshrl.u32 %v11423_v57, %v682_v55  ;;  %v698_v6 = vor.u32 %v697_v21, %v696_v16  ;;  %vm699_vm12 = vcmp.lt.s32.totalorder %v8237_v48, 1  ;;  %vm701_vm13 = vcmp.lt.s32.totalorder %v8237_v48, 3 }
 0x116   : > { %v7177_v8 = vadd.s32 4294967294, %v631_v29  ;;  %vm702_vm1 = vcmp.lt.s32.totalorder %v8237_v48, 4  ;;  %v707_v39 = vsel %vm699_vm12, %v686_v53, %v689_v45  ;;  %vm555_vm2 = vcmp.eq.s32.totalorder %v8227_v37, 0 }
 0x117   : > { %v704_v42 = vsel %vm702_vm1, %v692_v5, 2102212464  ;;  %v708_v7 = vsel %vm702_vm1, %v695_v49, 920167782  ;;  %v711_v15 = vsel %vm699_vm12, %v689_v45, %v692_v5  ;;  %v712_v24 = vsel %vm702_vm1, %v698_v6, 1326507024 }
 0x118   : > { %vm554_vm15 = vcmp.lt.s32.totalorder %v8227_v37, 2  ;;  %vm7178_vm0 = vcmp.lt.s32.totalorder %v7177_v8, 0  ;;  %vm700_vm3 = vcmp.lt.s32.totalorder %v8237_v48, 2  ;;  %v709_v55 = vsel %vm701_vm13, %v692_v5, %v708_v7 }
 0x119   : > { %v713_v56 = vsel %vm701_vm13, %v695_v49, %v712_v24  ;;  %vm551_vm5 = vweird.f32 %v7898_v32  ;;  %v634_v30 = vsel %vm7178_vm0, 0, %v7177_v8  ;;  %v8285_v0 = vsel %vm8247_vm11, 0, %v650_v60 }
 0x11a   : > { %v710_v28 = vsel %vm700_vm3, %v707_v39, %v709_v55  ;;  %v714_v34 = vsel %vm700_vm3, %v711_v15, %v713_v56  ;;  %v635_v4 = vsub.s32 32, %v634_v30  ;;  %v639_v2 = vsub.s32 4294967266, %v634_v30  ;;  %v223_v56 = vpop.permute.xlu1 %222 }
 0x11b   : > { %v703_v9 = vsel %vm699_vm12, %v683_v40, %v686_v53  ;;  %v705_v13 = vsel %vm701_vm13, %v689_v45, %v704_v42  ;;  %v8296_v14 = vmul.u32.u64.low %v8262_v31, %v714_v34  ;;  %v8297_v50 = vmul.u32.u64.high %v8262_v31, %v714_v34, %v8296_v14 }
 0x11c   : > { %v8300_v5 = vmul.u32.u64.low %v8262_v31, %v710_v28  ;;  %v8301_v49 = vmul.u32.u64.high %v8262_v31, %v710_v28, %v8300_v5  ;;  %v8304_v16 = vpop.eup %7606  ;;  %v636_v21 = vshll.u32 %v8235_v44, %v634_v30  ;;  %v637_v29 = vshrl.u32 %v8232_v41, %v635_v4 }
 0x11d   : > { %v640_v60 = vadd.s32 127, %v639_v2  ;;  %v7183_v53 = vadd.s32 4294967169, %v775_v38  ;;  %v8308_v40 = vpop.eup %7608  ;;  %vm558_vm6 = vcmp.eq.s32.totalorder %v8227_v37, 2  ;;  %v11401_v45 = vxor.u32 2147483648, %v8304_v16 }
 0x11e   : > { %v706_v6 = vsel %vm700_vm3, %v703_v9, %v705_v13  ;;  %v778_v8 = vand.u32 8388607, %v771_v35  ;;  %v11403_v39 = vxor.u32 2147483648, %v8308_v40  ;;  %v638_v42 = vor.u32 %v637_v29, %v636_v21 }
 0x11f   : > { %v641_v44 = vshll.u32 %v640_v60, 23  ;;  %v781_v7 = vadd.s32 1, %v7183_v53  ;;  %v560_v41 = vsel %vm558_vm6, %v11401_v45, %v8308_v40  ;;  %v656_v38 = vadd.s32 3, %v8285_v0 }
 0x120   : > { %vm724_vm7 = vc.u32 %v8297_v50, %v8300_v5  ;;  %v725_v48 = vadd.s32 1, %v8301_v49  ;;  %v557_v15 = vsel %vm555_vm2, %v8304_v16, %v11403_v39  ;;  %v722_v55 = vmul.u32 %v8262_v31, %v706_v6 }
 0x121   : > { %v642_v24 = vor.u32 4788187, %v641_v44  ;;  %vm782_vm8 = vcmp.gt.s32.totalorder %v781_v7, 0  ;;  %v561_v30 = vsel %vm554_vm15, %v557_v15, %v560_v41  ;;  %v779_v34 = vor.u32 8388608, %v778_v8 }
 0x122   : > { %v726_v28 = vsel %vm724_vm7, %v725_v48, %v8301_v49  ;;  %v783_v4 = vsel %vm782_vm8, %v781_v7, 0  ;;  %v562_v2 = vsel %vm551_vm5, nan, %v561_v30  ;;  %v645_v13 = vcvt.s32.f32 %v638_v42 }
 0x123   : > { %v643_v9 = vand.u32 2147483647, %v642_v24  ;;  %v727_v14 = vadd.s32 %v726_v28, %v722_v55  ;;  %v785_v21 = vand.u32 31, %v783_v4  ;;  %1293 = vst [vmem:[%s8172_s12 + $0x10] sm:$0xff] %v562_v2  ;;  %v8337_v29 = vmul.f32 %v7882_v22, %v223_v56 }
 0x124   : > { %v8340_v31 = vmul.f32 %v7885_v23, %v223_v56  ;;  %v8342_v53 = vand.u32 3, %v656_v38  ;;  %v784_v49 = vshrl.u32 %v783_v4, 5  ;;  %v8344_v8 = vshll.u32 %v779_v34, 8 }
 0x125   : > { %v646_v37 = vmul.f32 %v645_v13, %v643_v9  ;;  %v728_v60 = vadd.s32 536870912, %v727_v14  ;;  %v786_v6 = vsub.s32 32, %v785_v21  ;;  %vm669_vm9 = vcmp.lt.s32.totalorder %v8092_v58, 0 }
 0x126   : > { %v788_v7 = vshll.u32 %v11423_v57, %v785_v21  ;;  %v791_v41 = vshll.u32 %v11421_v61, %v785_v21  ;;  %v794_v24 = vshll.u32 %v11416_v63, %v785_v21  ;;  %v797_v30 = vshll.u32 %v11412_v1, %v785_v21 }
 0x127   : > { %v647_v44 = vxor.u32 2147483648, %v646_v37  ;;  %v729_v42 = vshrl.u32 %v728_v60, 30  ;;  %v789_v48 = vshrl.u32 %v11421_v61, %v786_v6  ;;  %v792_v15 = vshrl.u32 %v11416_v63, %v786_v6 }
 0x128   : > { %v795_v38 = vshrl.u32 %v11412_v1, %v786_v6  ;;  %v798_v28 = vshrl.u32 %v11414_v3, %v786_v6  ;;  %vm8362_vm12 = vcmp.le.f32.partialorder %v667_v51, 0.7853982  ;;  %v800_v33 = vshll.u32 %v11414_v3, %v785_v21 }
 0x129   : > { %v648_v55 = vsel %vm565_vm10, %v647_v44, %v646_v37  ;;  %v730_v56 = vshll.u32 %v729_v42, 30  ;;  %v790_v2 = vor.u32 %v789_v48, %v788_v7  ;;  %v793_v9 = vor.u32 %v792_v15, %v791_v41 }
 0x12a   : > { %v651_v34 = vsel %vm8247_vm11, %v7906_v43, %v648_v55  ;;  %v796_v13 = vor.u32 %v795_v38, %v794_v24  ;;  %v799_v60 = vor.u32 %v798_v28, %v797_v30  ;;  %v878_v44 = vand.u32 2139095040, %v8337_v29 }
 0x12b   : > { %7610 = vcosq.f32 %v651_v34  ;;  %v8366_v37 = vsub.s32 %v727_v14, %v730_v56  ;;  %v753_v45 = vsub.s32 4, %v729_v42  ;;  %v801_v55 = vshrl.u32 %v11410_v10, %v786_v6 }
 0x12c   : > { %7612 = vsinq.f32 %v651_v34  ;;  %vm803_vm10 = vcmp.lt.s32.totalorder %v784_v49, 1  ;;  %vm805_vm11 = vcmp.lt.s32.totalorder %v784_v49, 3  ;;  %vm806_vm13 = vcmp.lt.s32.totalorder %v784_v49, 4 }
 0x12d   : > { %v733_v51 = vsub.s32 0, %v8366_v37  ;;  %v802_v7 = vor.u32 %v801_v55, %v800_v33  ;;  %v808_v41 = vsel %vm806_vm13, %v796_v13, 2102212464  ;;  %v811_v48 = vsel %vm803_vm10, %v790_v2, %v793_v9 }
 0x12e   : > { %v812_v14 = vsel %vm806_vm13, %v799_v60, 920167782  ;;  %v787_v24 = vshrl.u32 %v11423_v57, %v786_v6  ;;  %vm804_vm1 = vcmp.lt.s32.totalorder %v784_v49, 2  ;;  %v754_v21 = vsel %vm669_vm9, %v753_v45, %v729_v42 }
 0x12f   : > { %v7180_v15 = vmin.u32 %v733_v51, %v8366_v37  ;;  %v813_v38 = vsel %vm805_vm11, %v796_v13, %v812_v14  ;;  %v815_v30 = vsel %vm803_vm10, %v793_v9, %v796_v13  ;;  %v816_v28 = vsel %vm806_vm13, %v802_v7, 1326507024 }
 0x130   : > { %v814_v56 = vsel %vm804_vm1, %v811_v48, %v813_v38  ;;  %vm658_vm2 = vcmp.lt.s32.totalorder %v8342_v53, 2  ;;  %v807_v33 = vsel %vm803_vm10, %v787_v24, %v790_v2  ;;  %v809_v55 = vsel %vm805_vm11, %v793_v9, %v808_v41 }
 0x131   : > { %v735_v34 = vclz %v7180_v15  ;;  %v11409_v6 = vand.u32 2147483647, %v8337_v29  ;;  %vm655_vm15 = vweird.f32 %v7906_v43  ;;  %vm659_vm0 = vcmp.eq.s32.totalorder %v8342_v53, 0 }
 0x132   : > { %v817_v45 = vsel %vm805_vm11, %v799_v60, %v816_v28  ;;  %v8388_v42 = vmul.u32.u64.low %v8344_v8, %v814_v56  ;;  %v8389_v51 = vmul.u32.u64.high %v8344_v8, %v814_v56, %v8388_v42  ;;  %v8394_v7 = vsel %vm8362_vm12, 0, %v754_v21 }
 0x133   : > { %v7181_v13 = vadd.s32 4294967294, %v735_v34  ;;  %v818_v2 = vsel %vm804_vm1, %v815_v30, %v817_v45  ;;  %v879_v9 = vshrl.u32 %v878_v44, 23  ;;  %vm662_vm3 = vcmp.eq.s32.totalorder %v8342_v53, 2 }
 0x134   : > { %v810_v41 = vsel %vm804_vm1, %v807_v33, %v809_v55  ;;  %v8400_v48 = vmul.u32.u64.low %v8344_v8, %v818_v2  ;;  %v8401_v60 = vmul.u32.u64.high %v8344_v8, %v818_v2, %v8400_v48  ;;  %v723_v15 = vadd.s32 %v8300_v5, %v8297_v50 }
 0x135   : > { %v8403_v14 = vpop.eup %7610  ;;  %vm7182_vm6 = vcmp.lt.s32.totalorder %v7181_v13, 0  ;;  %v7187_v24 = vadd.s32 4294967169, %v879_v9  ;;  %v882_v38 = vand.u32 8388607, %v11409_v6  ;;  %v760_v56 = vadd.s32 3, %v8394_v7 }
 0x136   : > { %v8409_v21 = vpop.eup %7612  ;;  %v11402_v44 = vxor.u32 2147483648, %v8403_v14  ;;  %v738_v49 = vsel %vm7182_vm6, 0, %v7181_v13  ;;  %v829_v30 = vadd.s32 1, %v8389_v51  ;;  %v826_v50 = vmul.u32 %v8344_v8, %v810_v41  ;;  %v8430_v41 = vpop.permute.xlu0 %227 }
 0x137   : > { %v11406_v28 = vxor.u32 2147483648, %v8409_v21  ;;  %v739_v34 = vsub.s32 32, %v738_v49  ;;  %v743_v33 = vsub.s32 4294967266, %v738_v49  ;;  %v740_v55 = vshll.u32 %v8366_v37, %v738_v49 }
 0x138   : > { %v664_v5 = vsel %vm662_vm3, %v11402_v44, %v8409_v21  ;;  %vm828_vm7 = vc.u32 %v8401_v60, %v8388_v42  ;;  %v885_v45 = vadd.s32 1, %v7187_v24  ;;  %v883_v49 = vor.u32 8388608, %v882_v38 }
 0x139   : > { %v661_v13 = vsel %vm659_vm0, %v8403_v14, %v11406_v28  ;;  %v741_v8 = vshrl.u32 %v723_v15, %v739_v34  ;;  %v744_v2 = vadd.s32 127, %v743_v33  ;;  %v830_v9 = vsel %vm828_vm7, %v829_v30, %v8389_v51 }
 0x13a   : > { %v665_v37 = vsel %vm658_vm2, %v661_v13, %v664_v5  ;;  %v831_v48 = vadd.s32 %v830_v9, %v826_v50  ;;  %vm886_vm8 = vcmp.gt.s32.totalorder %v885_v45, 0  ;;  %v8439_v51 = vmul.f32 %v7882_v22, %v8430_v41 }
 0x13b   : > { %v666_v24 = vsel %vm655_vm15, nan, %v665_v37  ;;  %v742_v44 = vor.u32 %v741_v8, %v740_v55  ;;  %v745_v39 = vshll.u32 %v744_v2, 23  ;;  %v887_v54 = vsel %vm886_vm8, %v885_v45, 0 }
 0x13c   : > { %v832_v27 = vadd.s32 536870912, %v831_v48  ;;  %v889_v28 = vand.u32 31, %v887_v54  ;;  %1294 = vst [vmem:[%s8172_s12 + $0x18] sm:$0xff] %v666_v24  ;;  %v8441_v30 = vand.u32 3, %v760_v56  ;;  %vm773_vm10 = vcmp.lt.s32.totalorder %v8095_v52, 0 }
 0x13d   : > { %v746_v15 = vor.u32 4788187, %v745_v39  ;;  %v749_v33 = vcvt.s32.f32 %v742_v44  ;;  %v8444_v50 = vshll.u32 %v883_v49, 8  ;;  %v982_v5 = vand.u32 2139095040, %v8340_v31 }
 0x13e   : > { %v833_v53 = vshrl.u32 %v832_v27, 30  ;;  %v890_v38 = vsub.s32 32, %v889_v28  ;;  %v888_v45 = vshrl.u32 %v887_v54, 5  ;;  %v892_v13 = vshll.u32 %v11423_v57, %v889_v28 }
 0x13f   : > { %v747_v34 = vand.u32 2147483647, %v746_v15  ;;  %v895_v44 = vshll.u32 %v11421_v61, %v889_v28  ;;  %v898_v9 = vshll.u32 %v11416_v63, %v889_v28  ;;  %v901_v24 = vshll.u32 %v11412_v1, %v889_v28 }
 0x140   : > { %v834_v55 = vshll.u32 %v833_v53, 30  ;;  %v893_v22 = vshrl.u32 %v11421_v61, %v890_v38  ;;  %v896_v39 = vshrl.u32 %v11416_v63, %v890_v38  ;;  %v899_v56 = vshrl.u32 %v11412_v1, %v890_v38 }
 0x141   : > { %v750_v8 = vmul.f32 %v749_v33, %v747_v34  ;;  %v902_v27 = vshrl.u32 %v11414_v3, %v890_v38  ;;  %v905_v37 = vshrl.u32 %v11410_v10, %v890_v38  ;;  %v857_v49 = vsub.s32 4, %v833_v53 }
 0x142   : > { %v8452_v2 = vsub.s32 %v831_v48, %v834_v55  ;;  %v904_v15 = vshll.u32 %v11414_v3, %v889_v28  ;;  %vm8461_vm11 = vcmp.le.f32.partialorder %v771_v35, 0.7853982  ;;  %v894_v33 = vor.u32 %v893_v22, %v892_v13 }
 0x143   : > { %v751_v54 = vxor.u32 2147483648, %v750_v8  ;;  %v897_v55 = vor.u32 %v896_v39, %v895_v44  ;;  %v900_v47 = vor.u32 %v899_v56, %v898_v9  ;;  %v827_v6 = vadd.s32 %v8388_v42, %v8401_v60 }
 0x144   : > { %v837_v48 = vsub.s32 0, %v8452_v2  ;;  %v903_v10 = vor.u32 %v902_v27, %v901_v24  ;;  %v983_v1 = vshrl.u32 %v982_v5, 23  ;;  %v891_v3 = vshrl.u32 %v11423_v57, %v890_v38 }
 0x145   : > { %v752_v59 = vsel %vm669_vm9, %v751_v54, %v750_v8  ;;  %v906_v63 = vor.u32 %v905_v37, %v904_v15  ;;  %v858_v13 = vsel %vm773_vm10, %v857_v49, %v833_v53  ;;  %vm907_vm13 = vcmp.lt.s32.totalorder %v888_v45, 1 }
 0x146   : > { %v755_v35 = vsel %vm8362_vm12, %v8092_v58, %v752_v59  ;;  %v7184_v28 = vmin.u32 %v837_v48, %v8452_v2  ;;  %vm910_vm9 = vcmp.lt.s32.totalorder %v888_v45, 4  ;;  %v915_v60 = vsel %vm907_vm13, %v894_v33, %v897_v55 }
 0x147   : > { %7614 = vcosq.f32 %v755_v35  ;;  %v912_v42 = vsel %vm910_vm9, %v900_v47, 2102212464  ;;  %vm908_vm1 = vcmp.lt.s32.totalorder %v888_v45, 2  ;;  %vm909_vm2 = vcmp.lt.s32.totalorder %v888_v45, 3 }
 0x148   : > { %7616 = vsinq.f32 %v755_v35  ;;  %v839_v22 = vclz %v7184_v28  ;;  %v916_v5 = vsel %vm910_vm9, %v903_v10, 920167782  ;;  %v919_v4 = vsel %vm907_vm13, %v897_v55, %v900_v47 }
 0x149   : > { %v911_v8 = vsel %vm907_vm13, %v891_v3, %v894_v33  ;;  %v917_v39 = vsel %vm909_vm2, %v900_v47, %v916_v5  ;;  %v920_v56 = vsel %vm910_vm9, %v906_v63, 1326507024  ;;  %v913_v38 = vsel %vm909_vm2, %v897_v55, %v912_v42 }
 0x14a   : > { %v7185_v59 = vadd.s32 4294967294, %v839_v22  ;;  %v918_v27 = vsel %vm908_vm1, %v915_v60, %v917_v39  ;;  %v921_v44 = vsel %vm909_vm2, %v903_v10, %v920_v56  ;;  %v7191_v9 = vadd.s32 4294967169, %v983_v1 }
 0x14b   : > { %v922_v53 = vsel %vm908_vm1, %v919_v4, %v921_v44  ;;  %v8480_v37 = vmul.u32.u64.low %v8444_v50, %v918_v27  ;;  %v8481_v54 = vmul.u32.u64.high %v8444_v50, %v918_v27, %v8480_v37  ;;  %v8486_v24 = vsel %vm8461_vm11, 0, %v858_v13 }
 0x14c   : > { %vm7186_vm12 = vcmp.lt.s32.totalorder %v7185_v59, 0  ;;  %v8489_v63 = vmul.u32.u64.low %v8444_v50, %v922_v53  ;;  %v8490_v3 = vmul.u32.u64.high %v8444_v50, %v922_v53, %v8489_v63  ;;  %v914_v1 = vsel %vm908_vm1, %v911_v8, %v913_v38 }
 0x14d   : > { %v842_v49 = vsel %vm7186_vm12, 0, %v7185_v59  ;;  %v989_v15 = vadd.s32 1, %v7191_v9  ;;  %v8495_v48 = vmul.f32 %v7885_v23, %v8430_v41  ;;  %vm766_vm0 = vcmp.eq.s32.totalorder %v8441_v30, 2 }
 0x14e   : > { %v843_v47 = vsub.s32 32, %v842_v49  ;;  %v847_v10 = vsub.s32 4294967266, %v842_v49  ;;  %v844_v33 = vshll.u32 %v8452_v2, %v842_v49  ;;  %v11420_v55 = vand.u32 2147483647, %v8340_v31 }
 0x14f   : > { %v933_v13 = vadd.s32 1, %v8481_v54  ;;  %vm990_vm3 = vcmp.gt.s32.totalorder %v989_v15, 0  ;;  %v864_v45 = vadd.s32 3, %v8486_v24  ;;  %v930_v42 = vmul.u32 %v8444_v50, %v914_v1 }
 0x150   : > { %v845_v35 = vshrl.u32 %v827_v6, %v843_v47  ;;  %v848_v28 = vadd.s32 127, %v847_v10  ;;  %vm932_vm6 = vc.u32 %v8490_v3, %v8480_v37  ;;  %v991_v23 = vsel %vm990_vm3, %v989_v15, 0 }
 0x151   : > { %v8501_v22 = vpop.eup %7614  ;;  %v934_v5 = vsel %vm932_vm6, %v933_v13, %v8481_v54  ;;  %v986_v8 = vand.u32 8388607, %v11420_v55  ;;  %v993_v39 = vand.u32 31, %v991_v23  ;;  %vm11440_vm7 = vweird.f32 %v8092_v58 }
 0x152   : > { %v8507_v41 = vpop.eup %7616  ;;  %v11418_v2 = vxor.u32 2147483648, %v8501_v22  ;;  %v846_v60 = vor.u32 %v845_v35, %v844_v33  ;;  %v849_v6 = vshll.u32 %v848_v28, 23  ;;  %v935_v59 = vadd.s32 %v934_v5, %v930_v42 }
 0x153   : > { %v11419_v4 = vxor.u32 2147483648, %v8507_v41  ;;  %vm763_vm8 = vcmp.eq.s32.totalorder %v8441_v30, 0  ;;  %vm762_vm13 = vcmp.lt.s32.totalorder %v8441_v30, 2  ;;  %v994_v44 = vsub.s32 32, %v993_v39 }
 0x154   : > { %v768_v50 = vsel %vm766_vm0, %v11418_v2, %v8507_v41  ;;  %v850_v56 = vor.u32 4788187, %v849_v6  ;;  %v936_v27 = vadd.s32 536870912, %v935_v59  ;;  %v853_v54 = vcvt.s32.f32 %v846_v60 }
 0x155   : > { %v765_v38 = vsel %vm763_vm8, %v8501_v22, %v11419_v4  ;;  %v8525_v49 = vand.u32 3, %v864_v45  ;;  %vm877_vm9 = vcmp.lt.s32.totalorder %v8337_v29, 0  ;;  %v987_v10 = vor.u32 8388608, %v986_v8 }
 0x156   : > { %v769_v9 = vsel %vm762_vm13, %v765_v38, %v768_v50  ;;  %v851_v53 = vand.u32 2147483647, %v850_v56  ;;  %v937_v47 = vshrl.u32 %v936_v27, 30  ;;  %v997_v30 = vshrl.u32 %v11421_v61, %v994_v44 }
 0x157   : > { %v770_v63 = vsel %vm11440_vm7, nan, %v769_v9  ;;  %v8531_v15 = vshrl.u32 %v991_v23, 5  ;;  %v11529_v33 = vmov 2131351028   ;;  %v1086_v28 = vand.u32 2139095040, %v8439_v51 }
 0x158   : > { %v854_v1 = vmul.f32 %v853_v54, %v851_v53  ;;  %v1000_v35 = vshrl.u32 %v11529_v33, %v994_v44  ;;  %1295 = vst [vmem:[%s8172_s12 + $0x20] sm:$0xff] %v770_v63  ;;  %v938_v13 = vshll.u32 %v937_v47, 30  ;;  %v996_v45 = vshll.u32 %v11423_v57, %v993_v39 }
 0x159   : > { %v11530_v42 = vmov 2102212464   ;;  %v11531_v6 = vmov 920167782   ;;  %v999_v8 = vshll.u32 %v11421_v61, %v993_v39  ;;  %v1002_v56 = vshll.u32 %v11529_v33, %v993_v39 }
 0x15a   : > { %v1003_v60 = vshrl.u32 %v11530_v42, %v994_v44  ;;  %v1006_v5 = vshrl.u32 %v11531_v6, %v994_v44  ;;  %v855_v50 = vxor.u32 2147483648, %v854_v1  ;;  %v1005_v23 = vshll.u32 %v11530_v42, %v993_v39 }
 0x15b   : > { %v8542_v38 = vsub.s32 %v935_v59, %v938_v13  ;;  %v961_v27 = vsub.s32 4, %v937_v47  ;;  %v998_v9 = vor.u32 %v997_v30, %v996_v45  ;;  %v11532_v53 = vmov 1326507024  }
 0x15c   : > { %v1009_v54 = vshrl.u32 %v11532_v53, %v994_v44  ;;  %v856_v63 = vsel %vm773_vm10, %v855_v50, %v854_v1  ;;  %v1001_v2 = vor.u32 %v1000_v35, %v999_v8  ;;  %v1007_v4 = vor.u32 %v1006_v5, %v1005_v23 }
 0x15d   : > { %v1008_v55 = vshll.u32 %v11531_v6, %v993_v39  ;;  %v859_v61 = vsel %vm8461_vm11, %v8095_v52, %v856_v63  ;;  %v941_v57 = vsub.s32 0, %v8542_v38  ;;  %v1004_v20 = vor.u32 %v1003_v60, %v1002_v56 }
 0x15e   : > { %v8552_v59 = vshll.u32 %v987_v10, 8  ;;  %7618 = vcosq.f32 %v859_v61  ;;  %v11429_v13 = vand.u32 2147483647, %v8439_v51  ;;  %v1087_v45 = vshrl.u32 %v1086_v28, 23 }
 0x15f   : > { %v1010_v30 = vor.u32 %v1009_v54, %v1008_v55  ;;  %7620 = vsinq.f32 %v859_v61  ;;  %v11533_v1 = vand.u32 2147483647, %v8337_v29  ;;  %v7188_v34 = vmin.u32 %v941_v57, %v8542_v38 }
 0x160   : > { %vm1011_vm11 = vcmp.lt.s32.totalorder %v8531_v15, 1  ;;  %vm1014_vm1 = vcmp.lt.s32.totalorder %v8531_v15, 4  ;;  %v962_v39 = vsel %vm877_vm9, %v961_v27, %v937_v47  ;;  %v11536_v55 = vmov 683565275  }
 0x161   : > { %vm8557_vm10 = vcmp.le.f32.partialorder %v11533_v1, 0.7853982  ;;  %v995_v10 = vshrl.u32 %v11536_v55, %v994_v44  ;;  %v1019_v60 = vsel %vm1011_vm11, %v998_v9, %v1001_v2  ;;  %v1020_v28 = vsel %vm1014_vm1, %v1007_v4, 920167782 }
 0x162   : > { %v943_v61 = vclz %v7188_v34  ;;  %vm1013_vm2 = vcmp.lt.s32.totalorder %v8531_v15, 3  ;;  %v1016_v5 = vsel %vm1014_vm1, %v1004_v20, 2102212464  ;;  %v1023_v50 = vsel %vm1011_vm11, %v1001_v2, %v1004_v20 }
 0x163   : > { %vm1012_vm12 = vcmp.lt.s32.totalorder %v8531_v15, 2  ;;  %v1021_v8 = vsel %vm1013_vm2, %v1004_v20, %v1020_v28  ;;  %v1024_v57 = vsel %vm1014_vm1, %v1010_v30, 1326507024  ;;  %v7195_v56 = vadd.s32 4294967169, %v1087_v45 }
 0x164   : > { %v7189_v23 = vadd.s32 4294967294, %v943_v61  ;;  %v1015_v54 = vsel %vm1011_vm11, %v995_v10, %v998_v9  ;;  %v1022_v63 = vsel %vm1012_vm12, %v1019_v60, %v1021_v8  ;;  %v1025_v47 = vsel %vm1013_vm2, %v1007_v4, %v1024_v57 }
 0x165   : > { %vm866_vm0 = vcmp.lt.s32.totalorder %v8525_v49, 2  ;;  %v1017_v44 = vsel %vm1013_vm2, %v1001_v2, %v1016_v5  ;;  %v1026_v27 = vsel %vm1012_vm12, %v1023_v50, %v1025_v47  ;;  %vm11439_vm3 = vweird.f32 %v8095_v52 }
 0x166   : > { %v8575_v1 = vmul.u32.u64.low %v8552_v59, %v1022_v63  ;;  %v8576_v34 = vmul.u32.u64.high %v8552_v59, %v1022_v63, %v8575_v1  ;;  %vm7190_vm6 = vcmp.lt.s32.totalorder %v7189_v23, 0  ;;  %v1093_v30 = vadd.s32 1, %v7195_v56 }
 0x167   : > { %v8581_v20 = vmul.u32.u64.low %v8552_v59, %v1026_v27  ;;  %v8582_v9 = vmul.u32.u64.high %v8552_v59, %v1026_v27, %v8581_v20  ;;  %vm867_vm8 = vcmp.eq.s32.totalorder %v8525_v49, 0  ;;  %vm870_vm13 = vcmp.eq.s32.totalorder %v8525_v49, 2 }
 0x168   : > { %v931_v2 = vadd.s32 %v8480_v37, %v8490_v3  ;;  %v946_v4 = vsel %vm7190_vm6, 0, %v7189_v23  ;;  %v1018_v60 = vsel %vm1012_vm12, %v1015_v54, %v1017_v44  ;;  %vm1094_vm11 = vcmp.gt.s32.totalorder %v1093_v30, 0  ;;  %v8590_v28 = vpop.eup %7618 }
 0x169   : > { %v947_v45 = vsub.s32 32, %v946_v4  ;;  %v951_v10 = vsub.s32 4294967266, %v946_v4  ;;  %11537 = vst [vmem:[#allocation8_spill] sm:$0xff] %v8590_v28  ;;  %v8594_v61 = vsel %vm8557_vm10, 0, %v962_v39  ;;  %v1037_v5 = vadd.s32 1, %v8576_v34  ;;  %v8599_v37 = vpop.eup %7620 }
 0x16a   : > { %11538 = vst [vmem:[#allocation9_spill] sm:$0xff] %v8594_v61  ;;  %v1090_v50 = vand.u32 8388607, %v11429_v13  ;;  %v1095_v8 = vsel %vm1094_vm11, %v1093_v30, 0  ;;  %11539 = vst [vmem:[#allocation10_spill] sm:$0xff] %v8599_v37  ;;  %v11427_v3 = vxor.u32 2147483648, %v8590_v28  ;;  %v948_v15 = vshll.u32 %v8542_v38, %v946_v4 }
 0x16b   : > { %v949_v57 = vshrl.u32 %v931_v2, %v947_v45  ;;  %v952_v56 = vadd.s32 127, %v951_v10  ;;  %v11428_v23 = vxor.u32 2147483648, %v8599_v37  ;;  %v1034_v54 = vmul.u32 %v8552_v59, %v1018_v60 }
 0x16c   : > { %vm1036_vm1 = vc.u32 %v8582_v9, %v8575_v1  ;;  %v1097_v39 = vand.u32 31, %v1095_v8  ;;  %v872_v63 = vsel %vm870_vm13, %v11427_v3, %v8599_v37  ;;  %v968_v27 = vadd.s32 3, %v8594_v61 }
 0x16d   : > { %v950_v47 = vor.u32 %v949_v57, %v948_v15  ;;  %v953_v44 = vshll.u32 %v952_v56, 23  ;;  %v1038_v38 = vsel %vm1036_vm1, %v1037_v5, %v8576_v34  ;;  %v869_v59 = vsel %vm867_vm8, %v8590_v28, %v11428_v23 }
 0x16e   : > { %v1039_v20 = vadd.s32 %v1038_v38, %v1034_v54  ;;  %v1098_v30 = vsub.s32 32, %v1097_v39  ;;  %v873_v2 = vsel %vm866_vm0, %v869_v59, %v872_v63  ;;  %v1091_v45 = vor.u32 8388608, %v1090_v50 }
 0x16f   : > { %v954_v4 = vor.u32 4788187, %v953_v44  ;;  %v1096_v10 = vshrl.u32 %v1095_v8, 5  ;;  %v874_v34 = vsel %vm11439_vm3, nan, %v873_v2  ;;  %vm981_vm2 = vcmp.lt.s32.totalorder %v8340_v31, 0 }
 0x170   : > { %v1040_v60 = vadd.s32 536870912, %v1039_v20  ;;  %v1100_v5 = vshll.u32 %v11536_v55, %v1097_v39  ;;  %v11540_v15 = vmov 2475754826   ;;  %v957_v3 = vcvt.s32.f32 %v950_v47  ;;  %1296 = vst [vmem:[%s8172_s12 + $0x28] sm:$0xff] %v874_v34 }
 0x171   : > { %v1101_v57 = vshrl.u32 %v11540_v15, %v1098_v30  ;;  %v955_v56 = vand.u32 2147483647, %v954_v4  ;;  %v1104_v54 = vshrl.u32 %v11529_v33, %v1098_v30  ;;  %v1107_v49 = vshrl.u32 %v11530_v42, %v1098_v30 }
 0x172   : > { %v1041_v63 = vshrl.u32 %v1040_v60, 30  ;;  %v1103_v50 = vshll.u32 %v11540_v15, %v1097_v39  ;;  %v1106_v8 = vshll.u32 %v11529_v33, %v1097_v39  ;;  %v1110_v44 = vshrl.u32 %v11531_v6, %v1098_v30 }
 0x173   : > { %v958_v38 = vmul.f32 %v957_v3, %v955_v56  ;;  %v8632_v59 = vand.u32 3, %v968_v27  ;;  %v1102_v2 = vor.u32 %v1101_v57, %v1100_v5  ;;  %v1109_v23 = vshll.u32 %v11530_v42, %v1097_v39 }
 0x174   : > { %v1042_v4 = vshll.u32 %v1041_v63, 30  ;;  %v1105_v47 = vor.u32 %v1104_v54, %v1103_v50  ;;  %v1108_v13 = vor.u32 %v1107_v49, %v1106_v8  ;;  %v1113_v19 = vshrl.u32 %v11532_v53, %v1098_v30 }
 0x175   : > { %v959_v52 = vxor.u32 2147483648, %v958_v38  ;;  %v1065_v34 = vsub.s32 4, %v1041_v63  ;;  %v1111_v60 = vor.u32 %v1110_v44, %v1109_v23  ;;  %v1112_v61 = vshll.u32 %v11531_v6, %v1097_v39 }
 0x176   : > { %v8637_v28 = vsub.s32 %v1039_v20, %v1042_v4  ;;  %v1099_v37 = vshrl.u32 %v11536_v55, %v1098_v30  ;;  %vm1115_vm12 = vcmp.lt.s32.totalorder %v1096_v10, 1  ;;  %v1131_v3 = vshll.u32 %v1091_v45, 8 }
 0x177   : > { %v960_v27 = vsel %vm877_vm9, %v959_v52, %v958_v38  ;;  %v1114_v5 = vor.u32 %v1113_v19, %v1112_v61  ;;  %vm1116_vm0 = vcmp.lt.s32.totalorder %v1096_v10, 2  ;;  %vm1118_vm6 = vcmp.lt.s32.totalorder %v1096_v10, 4 }
 0x178   : > { %v963_v57 = vsel %vm8557_vm10, %v8337_v29, %v960_v27  ;;  %v1045_v23 = vsub.s32 0, %v8637_v28  ;;  %vm1117_vm8 = vcmp.lt.s32.totalorder %v1096_v10, 3  ;;  %v1120_v39 = vsel %vm1118_vm6, %v1108_v13, 2102212464 }
 0x179   : > { %7622 = vcosq.f32 %v963_v57  ;;  %v1066_v20 = vsel %vm981_vm2, %v1065_v34, %v1041_v63  ;;  %v1123_v30 = vsel %vm1115_vm12, %v1102_v2, %v1105_v47  ;;  %v1124_v52 = vsel %vm1118_vm6, %v1111_v60, 920167782 }
 0x17a   : > { %7624 = vsinq.f32 %v963_v57  ;;  %v7192_v19 = vmin.u32 %v1045_v23, %v8637_v28  ;;  %v1119_v61 = vsel %vm1115_vm12, %v1099_v37, %v1102_v2  ;;  %v1125_v35 = vsel %vm1117_vm8, %v1108_v13, %v1124_v52 }
 0x17b   : > { %v1121_v45 = vsel %vm1117_vm8, %v1105_v47, %v1120_v39  ;;  %v1126_v56 = vsel %vm1116_vm0, %v1123_v30, %v1125_v35  ;;  %v1127_v54 = vsel %vm1115_vm12, %v1105_v47, %v1108_v13  ;;  %v1128_v49 = vsel %vm1118_vm6, %v1114_v5, 1326507024 }
 0x17c   : > { %v11541_v63 = vand.u32 2147483647, %v8340_v31  ;;  %v1047_v8 = vclz %v7192_v19  ;;  %v1187_v44 = vand.u32 2147483647, %v8495_v48  ;;  %v1129_v38 = vsel %vm1117_vm8, %v1111_v60, %v1128_v49 }
 0x17d   : > { %v8670_v2 = vmul.u32.u64.low %v1131_v3, %v1126_v56  ;;  %v8671_v4 = vmul.u32.u64.high %v1131_v3, %v1126_v56, %v8670_v2  ;;  %vm971_vm10 = vcmp.eq.s32.totalorder %v8632_v59, 0  ;;  %v1122_v47 = vsel %vm1116_vm0, %v1119_v61, %v1121_v45 }
 0x17e   : > { %vm8660_vm9 = vcmp.le.f32.partialorder %v11541_v63, 0.7853982  ;;  %v7193_v13 = vadd.s32 4294967294, %v1047_v8  ;;  %v1130_v34 = vsel %vm1116_vm0, %v1127_v54, %v1129_v38  ;;  %v1190_v27 = vand.u32 2139095040, %v8495_v48 }
 0x17f   : > { %v8667_v37 = vsel %vm8660_vm9, 0, %v1066_v20  ;;  %vm970_vm13 = vcmp.lt.s32.totalorder %v8632_v59, 2  ;;  %vm974_vm11 = vcmp.eq.s32.totalorder %v8632_v59, 2  ;;  %v1394_v60 = vand.u32 3, %v8027_v18 }
 0x180   : > { %v8680_v5 = vmul.u32.u64.low %v1131_v3, %v1130_v34  ;;  %v8681_v57 = vmul.u32.u64.high %v1131_v3, %v1130_v34, %v8680_v5  ;;  %v1035_v23 = vadd.s32 %v8575_v1, %v8582_v9  ;;  %vm7194_vm1 = vcmp.lt.s32.totalorder %v7193_v13, 0 }
 0x181   : > { %v1072_v39 = vadd.s32 3, %v8667_v37  ;;  %v1191_v20 = vshrl.u32 %v1190_v27, 23  ;;  %v1050_v10 = vsel %vm7194_vm1, 0, %v7193_v13  ;;  %v1138_v30 = vmul.u32 %v1131_v3, %v1122_v47 }
 0x182   : > { %v1141_v52 = vadd.s32 1, %v8671_v4  ;;  %v1194_v19 = vand.u32 8388607, %v1187_v44  ;;  %v1051_v61 = vsub.s32 32, %v1050_v10  ;;  %v1055_v35 = vsub.s32 4294967266, %v1050_v10 }
 0x183   : > { %v7199_v45 = vadd.s32 4294967169, %v1191_v20  ;;  %vm1396_vm12 = vcmp.eq.s32.totalorder %v1394_v60, 0  ;;  %v8690_v56 = vpop.eup %7622  ;;  %v1052_v18 = vshll.u32 %v8637_v28, %v1050_v10  ;;  %vm1140_vm0 = vc.u32 %v8681_v57, %v8670_v2 }
 0x184   : > { %vm1395_vm6 = vcmp.lt.s32.totalorder %v1394_v60, 2  ;;  %v11544_v1 = vxor.u32 2147483648, %v8152_v46  ;;  %v8698_v3 = vpop.eup %7624  ;;  %v975_v54 = vxor.u32 2147483648, %v8690_v56  ;;  %v1053_v49 = vshrl.u32 %v1035_v23, %v1051_v61 }
 0x185   : > { %v1056_v63 = vadd.s32 127, %v1055_v35  ;;  %v1142_v8 = vsel %vm1140_vm0, %v1141_v52, %v8671_v4  ;;  %v972_v38 = vxor.u32 2147483648, %v8698_v3  ;;  %v1197_v28 = vadd.s32 1, %v7199_v45 }
 0x186   : > { %v1398_v9 = vsel %vm1396_vm12, %v8143_v12, %v11544_v1  ;;  %v1143_v13 = vadd.s32 %v1142_v8, %v1138_v30  ;;  %vm1399_vm8 = vcmp.eq.s32.totalorder %v1394_v60, 2  ;;  %v976_v47 = vsel %vm974_vm11, %v975_v54, %v8698_v3 }
 0x187   : > { %v1054_v34 = vor.u32 %v1053_v49, %v1052_v18  ;;  %v1057_v27 = vshll.u32 %v1056_v63, 23  ;;  %v11545_v5 = vxor.u32 2147483648, %v8143_v12  ;;  %v973_v4 = vsel %vm971_vm10, %v8690_v56, %v972_v38 }
 0x188   : > { %v1144_v20 = vadd.s32 536870912, %v1143_v13  ;;  %vm1198_vm1 = vcmp.gt.s32.totalorder %v1197_v28, 0  ;;  %vm11438_vm12 = vweird.f32 %v8337_v29  ;;  %v977_v30 = vsel %vm970_vm13, %v973_v4, %v976_v47 }
 0x189   : > { %v1401_v23 = vsel %vm1399_vm8, %v11545_v5, %v8152_v46  ;;  %v1058_v52 = vor.u32 4788187, %v1057_v27  ;;  %v1199_v12 = vsel %vm1198_vm1, %v1197_v28, 0  ;;  %v978_v46 = vsel %vm11438_vm12, nan, %v977_v30 }
 0x18a   : > { %v1402_v10 = vsel %vm1395_vm6, %v1398_v9, %v1401_v23  ;;  %v1145_v61 = vshrl.u32 %v1144_v20, 30  ;;  %v1195_v35 = vor.u32 8388608, %v1194_v19  ;;  %v1201_v45 = vand.u32 31, %v1199_v12  ;;  %1297 = vst [vmem:[%s8172_s12 + $0x30] sm:$0xff] %v978_v46 }
 0x18b   : > { %v1059_v18 = vand.u32 2147483647, %v1058_v52  ;;  %v1061_v1 = vcvt.s32.f32 %v1054_v34  ;;  %vm1085_vm10 = vcmp.lt.s32.totalorder %v8439_v51, 0  ;;  %v1403_v60 = vsel %vm343_vm14, nan, %v1402_v10 }
 0x18c   : > { %v8726_v9 = vand.u32 3, %v1072_v39  ;;  %v11546_v59 = vand.u32 2147483647, %v8439_v51  ;;  %v1146_v63 = vshll.u32 %v1145_v61, 30  ;;  %v1202_v8 = vsub.s32 32, %v1201_v45  ;;  %2331 = vst [vmem:[%s8172_s12 + $0x50] sm:$0xff] %v1403_v60 }
 0x18d   : > { %v1062_v19 = vmul.f32 %v1061_v1, %v1059_v18  ;;  %v8737_v28 = vadd.s32 %v8670_v2, %v8681_v57  ;;  %v1169_v47 = vsub.s32 4, %v1145_v61  ;;  %v8740_v25 = vand.u32 3, %v8072_v17 }
 0x18e   : > { %vm8730_vm13 = vcmp.le.f32.partialorder %v11546_v59, 0.7853982  ;;  %v8742_v39 = vsub.s32 %v1143_v13, %v1146_v63  ;;  %v1200_v34 = vshrl.u32 %v1199_v12, 5  ;;  %v1205_v27 = vshrl.u32 %v11540_v15, %v1202_v8 }
 0x18f   : > { %v8745_v5 = vshll.u32 %v1195_v35, 8  ;;  %v1063_v23 = vxor.u32 2147483648, %v1062_v19  ;;  %v1204_v4 = vshll.u32 %v11536_v55, %v1201_v45  ;;  %v1208_v20 = vshrl.u32 %v11529_v33, %v1202_v8 }
 0x190   : > { %v1211_v10 = vshrl.u32 %v11530_v42, %v1202_v8  ;;  %v1149_v2 = vsub.s32 0, %v8742_v39  ;;  %v1207_v57 = vshll.u32 %v11540_v15, %v1201_v45  ;;  %v1210_v17 = vshll.u32 %v11529_v33, %v1201_v45 }
 0x191   : > { %v1214_v13 = vshrl.u32 %v11531_v6, %v1202_v8  ;;  %v1064_v30 = vsel %vm981_vm2, %v1063_v23, %v1062_v19  ;;  %v1170_v52 = vsel %vm1085_vm10, %v1169_v47, %v1145_v61  ;;  %v1206_v12 = vor.u32 %v1205_v27, %v1204_v4 }
 0x192   : > { %v1213_v46 = vshll.u32 %v11530_v42, %v1201_v45  ;;  %vm1499_vm14 = vcmp.eq.s32.totalorder %v8740_v25, 0  ;;  %v1067_v35 = vsel %vm8660_vm9, %v8340_v31, %v1064_v30  ;;  %v7196_v18 = vmin.u32 %v1149_v2, %v8742_v39 }
 0x193   : > { %v1209_v1 = vor.u32 %v1208_v20, %v1207_v57  ;;  %v1212_v60 = vor.u32 %v1211_v10, %v1210_v17  ;;  %7626 = vcosq.f32 %v1067_v35  ;;  %v1216_v63 = vshll.u32 %v11531_v6, %v1201_v45 }
 0x194   : > { %v1215_v59 = vor.u32 %v1214_v13, %v1213_v46  ;;  %v1217_v19 = vshrl.u32 %v11532_v53, %v1202_v8  ;;  %7628 = vsinq.f32 %v1067_v35  ;;  %v1151_v61 = vclz %v7196_v18 }
 0x195   : > { %v8768_v47 = vsel %vm8730_vm13, 0, %v1170_v52  ;;  %v1203_v27 = vshrl.u32 %v11536_v55, %v1202_v8  ;;  %vm1219_vm2 = vcmp.lt.s32.totalorder %v1200_v34, 1  ;;  %vm1221_vm9 = vcmp.lt.s32.totalorder %v1200_v34, 3 }
 0x196   : > { %v1218_v50 = vor.u32 %v1217_v19, %v1216_v63  ;;  %vm1222_vm11 = vcmp.lt.s32.totalorder %v1200_v34, 4  ;;  %vm1498_vm0 = vcmp.lt.s32.totalorder %v8740_v25, 2  ;;  %v7197_v23 = vadd.s32 4294967294, %v1151_v61 }
 0x197   : > { %v1223_v4 = vsel %vm1219_vm2, %v1203_v27, %v1206_v12  ;;  %v1224_v20 = vsel %vm1222_vm11, %v1212_v60, 2102212464  ;;  %v1227_v45 = vsel %vm1219_vm2, %v1206_v12, %v1209_v1  ;;  %vm1078_vm6 = vcmp.eq.s32.totalorder %v8726_v9, 2 }
 0x198   : > { %v1225_v10 = vsel %vm1221_vm9, %v1209_v1, %v1224_v20  ;;  %v1228_v2 = vsel %vm1222_vm11, %v1215_v59, 920167782  ;;  %v1231_v57 = vsel %vm1219_vm2, %v1209_v1, %v1212_v60  ;;  %v1232_v17 = vsel %vm1222_vm11, %v1218_v50, 1326507024 }
 0x199   : > { %vm1075_vm8 = vcmp.eq.s32.totalorder %v8726_v9, 0  ;;  %vm7198_vm1 = vcmp.lt.s32.totalorder %v7197_v23, 0  ;;  %vm1220_vm12 = vcmp.lt.s32.totalorder %v1200_v34, 2  ;;  %v1229_v8 = vsel %vm1221_vm9, %v1212_v60, %v1228_v2 }
 0x19a   : > { %v1233_v13 = vsel %vm1221_vm9, %v1215_v59, %v1232_v17  ;;  %vm1074_vm3 = vcmp.lt.s32.totalorder %v8726_v9, 2  ;;  %v1154_v30 = vsel %vm7198_vm1, 0, %v7197_v23  ;;  %v8779_v52 = vadd.s32 3, %v8768_v47 }
 0x19b   : > { %v1230_v12 = vsel %vm1220_vm12, %v1227_v45, %v1229_v8  ;;  %v1234_v46 = vsel %vm1220_vm12, %v1231_v57, %v1233_v13  ;;  %vm1071_vm7 = vweird.f32 %v8340_v31  ;;  %v1155_v35 = vsub.s32 32, %v1154_v30 }
 0x19c   : > { %v1159_v18 = vsub.s32 4294967266, %v1154_v30  ;;  %v1226_v1 = vsel %vm1220_vm12, %v1223_v4, %v1225_v10  ;;  %v11549_v63 = vxor.u32 2147483648, %v8208_v36  ;;  %v1156_v27 = vshll.u32 %v8742_v39, %v1154_v30 }
 0x19d   : > { %v8788_v60 = vmul.u32.u64.low %v8745_v5, %v1234_v46  ;;  %v8789_v59 = vmul.u32.u64.high %v8745_v5, %v1234_v46, %v8788_v60  ;;  %v8792_v19 = vmul.u32.u64.low %v8745_v5, %v1230_v12  ;;  %v8793_v61 = vmul.u32.u64.high %v8745_v5, %v1230_v12, %v8792_v19  ;;  %v8799_v4 = vpop.eup %7626 }
 0x19e   : > { %v1501_v34 = vsel %vm1499_vm14, %v8200_v62, %v11549_v63  ;;  %v1157_v50 = vshrl.u32 %v8737_v28, %v1155_v35  ;;  %v1160_v23 = vadd.s32 127, %v1159_v18  ;;  %vm1502_vm12 = vcmp.eq.s32.totalorder %v8740_v25, 2  ;;  %v8807_v17 = vpop.eup %7628 }
 0x19f   : > { %v1242_v20 = vmul.u32 %v8745_v5, %v1226_v1  ;;  %v11550_v45 = vxor.u32 2147483648, %v8200_v62  ;;  %v1600_v2 = vand.u32 3, %v8205_v11  ;;  %v1703_v57 = vand.u32 3, %v8285_v0 }
 0x1a0   : > { %v1079_v39 = vxor.u32 2147483648, %v8799_v4  ;;  %v1158_v28 = vor.u32 %v1157_v50, %v1156_v27  ;;  %v1161_v8 = vshll.u32 %v1160_v23, 23  ;;  %v1076_v5 = vxor.u32 2147483648, %v8807_v17 }
 0x1a1   : > { %v1504_v10 = vsel %vm1502_vm12, %v11550_v45, %v8208_v36  ;;  %vm1244_vm14 = vc.u32 %v8789_v59, %v8792_v19  ;;  %v1245_v62 = vadd.s32 1, %v8793_v61  ;;  %v1806_v11 = vand.u32 3, %v8394_v7 }
 0x1a2   : > { %v1505_v13 = vsel %vm1498_vm0, %v1501_v34, %v1504_v10  ;;  %v1080_v36 = vsel %vm1078_vm6, %v1079_v39, %v8807_v17  ;;  %v1162_v0 = vor.u32 4788187, %v1161_v8  ;;  %v1909_v30 = vand.u32 3, %v8486_v24 }
 0x1a3   : > { %v1506_v25 = vsel %vm447_vm4, nan, %v1505_v13  ;;  %v1077_v12 = vsel %vm1075_vm8, %v8799_v4, %v1076_v5  ;;  %v1165_v7 = vcvt.s32.f32 %v1158_v28  ;;  %v1246_v46 = vsel %vm1244_vm14, %v1245_v62, %v8793_v61 }
 0x1a4   : > { %vm1602_vm2 = vcmp.eq.s32.totalorder %v1600_v2, 0  ;;  %2332 = vst [vmem:[%s8172_s12 + $0x58] sm:$0xff] %v1506_v25  ;;  %v1081_v35 = vsel %vm1074_vm3, %v1077_v12, %v1080_v36  ;;  %v1163_v18 = vand.u32 2147483647, %v1162_v0  ;;  %v1247_v26 = vadd.s32 %v1246_v46, %v1242_v20  ;;  %v11558_v25 = vld [vmem:[#allocation10_spill] sm:$0xff]  ;;  %v11560_v12 = vld [vmem:[#allocation8_spill] sm:$0xff] }
 0x1a5   : > { %v11551_v1 = vxor.u32 2147483648, %v8308_v40  ;;  %v1082_v63 = vsel %vm1071_vm7, nan, %v1081_v35  ;;  %vm1601_vm4 = vcmp.lt.s32.totalorder %v1600_v2, 2  ;;  %vm1605_vm9 = vcmp.eq.s32.totalorder %v1600_v2, 2  ;;  %v11562_v46 = vld [vmem:[#allocation9_spill] sm:$0xff] }
 0x1a6   : > { %vm1705_vm11 = vcmp.eq.s32.totalorder %v1703_v57, 0  ;;  %v1166_v34 = vmul.f32 %v1165_v7, %v1163_v18  ;;  %v1248_v60 = vadd.s32 536870912, %v1247_v26  ;;  %1298 = vst [vmem:[%s8172_s12 + $0x38] sm:$0xff] %v1082_v63  ;;  %v11552_v9 = vxor.u32 2147483648, %v8304_v16 }
 0x1a7   : > { %v1604_v24 = vsel %vm1602_vm2, %v8304_v16, %v11551_v1  ;;  %v11553_v27 = vxor.u32 2147483648, %v8409_v21  ;;  %vm1704_vm3 = vcmp.lt.s32.totalorder %v1703_v57, 2  ;;  %vm1708_vm0 = vcmp.eq.s32.totalorder %v1703_v57, 2  ;;  %v11563_v1 = vld [vmem:[#allocation7_spill] sm:$0xff] }
 0x1a8   : > { %v1607_v61 = vsel %vm1605_vm9, %v11552_v9, %v8308_v40  ;;  %vm1808_vm6 = vcmp.eq.s32.totalorder %v1806_v11, 0  ;;  %v1167_v20 = vxor.u32 2147483648, %v1166_v34  ;;  %v8846_v45 = vshrl.u32 %v1248_v60, 30 }
 0x1a9   : > { %v1707_v50 = vsel %vm1705_vm11, %v8403_v14, %v11553_v27  ;;  %v1608_v23 = vsel %vm1601_vm4, %v1604_v24, %v1607_v61  ;;  %v11554_v2 = vxor.u32 2147483648, %v8403_v14  ;;  %v11555_v28 = vxor.u32 2147483648, %v8507_v41  ;;  %v2346_v27 = vld [vmem:[%s7874_s6] ss:$4 sm:$0x3] }
 0x1aa   : > { %v1609_v10 = vsel %vm551_vm5, nan, %v1608_v23  ;;  %v1168_v57 = vsel %vm1085_vm10, %v1167_v20, %v1166_v34  ;;  %v1250_v13 = vshll.u32 %v8846_v45, 30  ;;  %vm1811_vm8 = vcmp.eq.s32.totalorder %v1806_v11, 2  ;;  %v11566_v23 = vld [vmem:[#allocation5_spill] sm:$0xff] }
 0x1ab   : > { %v1710_v16 = vsel %vm1708_vm0, %v11554_v2, %v8409_v21  ;;  %v1810_v8 = vsel %vm1808_vm6, %v8501_v22, %v11555_v28  ;;  %2333 = vst [vmem:[%s8172_s12 + $0x60] sm:$0xff] %v1609_v10  ;;  %v1171_v32 = vsel %vm8730_vm13, %v8439_v51, %v1168_v57  ;;  %v8866_v14 = vand.u32 3, %v8779_v52 }
 0x1ac   : > { %v1711_v40 = vsel %vm1704_vm3, %v1707_v50, %v1710_v16  ;;  %vm1807_vm5 = vcmp.lt.s32.totalorder %v1806_v11, 2  ;;  %v11556_v21 = vxor.u32 2147483648, %v8501_v22  ;;  %7630 = vcosq.f32 %v1171_v32 }
 0x1ad   : > { %v1712_v62 = vsel %vm655_vm15, nan, %v1711_v40  ;;  %v8872_v0 = vsub.s32 %v1247_v26, %v1250_v13  ;;  %vm1911_vm15 = vcmp.eq.s32.totalorder %v1909_v30, 0  ;;  %7632 = vsinq.f32 %v1171_v32  ;;  %v11567_v40 = vld [vmem:[#allocation6_spill] sm:$0xff] }
 0x1ae   : > { %v1813_v36 = vsel %vm1811_vm8, %v11556_v21, %v8507_v41  ;;  %2334 = vst [vmem:[%s8172_s12 + $0x68] sm:$0xff] %v1712_v62  ;;  %vm11557_vm10 = vweird.f32 %v8092_v58  ;;  %v11559_v52 = vxor.u32 2147483648, %v11558_v25  ;;  %vm1914_vm13 = vcmp.eq.s32.totalorder %v1909_v30, 2 }
 0x1af   : > { %v1814_v43 = vsel %vm1807_vm5, %v1810_v8, %v1813_v36  ;;  %v1253_v11 = vsub.s32 0, %v8872_v0  ;;  %vm1910_vm1 = vcmp.lt.s32.totalorder %v1909_v30, 2  ;;  %v11561_v22 = vxor.u32 2147483648, %v11560_v12 }
 0x1b0   : > { %v1815_v49 = vsel %vm11557_vm10, nan, %v1814_v43  ;;  %v1913_v7 = vsel %vm1911_vm15, %v11560_v12, %v11559_v52  ;;  %v2012_v35 = vand.u32 3, %v11562_v46  ;;  %v2115_v58 = vand.u32 3, %v8667_v37  ;;  %v8941_v12 = vpop.permute.xlu0 %2354 }
 0x1b1   : > { %v1916_v41 = vsel %vm1914_vm13, %v11561_v22, %v11558_v25  ;;  %2335 = vst [vmem:[%s8172_s12 + $0x70] sm:$0xff] %v1815_v49  ;;  %v7200_v26 = vmin.u32 %v1253_v11, %v8872_v0  ;;  %vm11564_vm12 = vweird.f32 %v11563_v1  ;;  %vm1179_vm14 = vcmp.eq.s32.totalorder %v8866_v14, 0 }
 0x1b2   : > { %v1917_v18 = vsel %vm1910_vm1, %v1913_v7, %v1916_v41  ;;  %vm2013_vm2 = vcmp.lt.s32.totalorder %v2012_v35, 2  ;;  %v2218_v30 = vand.u32 3, %v8768_v47  ;;  %vm1178_vm4 = vcmp.lt.s32.totalorder %v8866_v14, 2 }
 0x1b3   : > { %v1918_v24 = vsel %vm11564_vm12, nan, %v1917_v18  ;;  %v1255_v63 = vclz %v7200_v26  ;;  %vm2014_vm9 = vcmp.eq.s32.totalorder %v2012_v35, 0  ;;  %vm2017_vm11 = vcmp.eq.s32.totalorder %v2012_v35, 2 }
 0x1b4   : > { %2336 = vst [vmem:[%s8172_s12 + $0x78] sm:$0xff] %v1918_v24  ;;  %vm2117_vm3 = vcmp.eq.s32.totalorder %v2115_v58, 0  ;;  %vm1175_vm0 = vweird.f32 %v8439_v51  ;;  %v2016_v37 = vsel %vm2014_vm9, %v8690_v56, %v972_v38  ;;  %v2019_v34 = vsel %vm2017_vm11, %v975_v54, %v8698_v3 }
 0x1b5   : > { %v2119_v47 = vsel %vm2117_vm3, %v8799_v4, %v1076_v5  ;;  %vm2120_vm6 = vcmp.eq.s32.totalorder %v2115_v58, 2  ;;  %v7201_v60 = vadd.s32 4294967294, %v1255_v63  ;;  %v2020_v9 = vsel %vm2013_vm2, %v2016_v37, %v2019_v34 }
 0x1b6   : > { %vm2116_vm8 = vcmp.lt.s32.totalorder %v2115_v58, 2  ;;  %v2122_v61 = vsel %vm2120_vm6, %v1079_v39, %v8807_v17  ;;  %vm1182_vm5 = vcmp.eq.s32.totalorder %v8866_v14, 2  ;;  %v1243_v56 = vadd.s32 %v8792_v19, %v8789_v59  ;;  %v7631_v38 = vpop.eup %7630 }
 0x1b7   : > { %vm11565_vm15 = vweird.f32 %v8337_v29  ;;  %v2123_v54 = vsel %vm2116_vm8, %v2119_v47, %v2122_v61  ;;  %vm7202_vm10 = vcmp.lt.s32.totalorder %v7201_v60, 0  ;;  %v1273_v5 = vsub.s32 4, %v8846_v45  ;;  %v7633_v4 = vpop.eup %7632  ;;  %v2350_v29 = vpop.permute.xlu1 %2349 }
 0x1b8   : > { %v2021_v3 = vsel %vm11565_vm15, nan, %v2020_v9  ;;  %v2124_v50 = vsel %vm1071_vm7, nan, %v2123_v54  ;;  %vm2219_vm13 = vcmp.lt.s32.totalorder %v2218_v30, 2  ;;  %v1183_v17 = vxor.u32 2147483648, %v7631_v38 }
 0x1b9   : > { %2337 = vst [vmem:[%s8172_s12 + $0x80] sm:$0xff] %v2021_v3  ;;  %v1258_v39 = vsel %vm7202_vm10, 0, %v7201_v60  ;;  %vm2220_vm1 = vcmp.eq.s32.totalorder %v2218_v30, 0  ;;  %2338 = vst [vmem:[%s8172_s12 + $0x88] sm:$0xff] %v2124_v50  ;;  %v8918_v59 = vrot.slane %v2346_v27, %v11566_v23  ;;  %v1180_v19 = vxor.u32 2147483648, %v7633_v4 }
 0x1ba   : > { %v1259_v20 = vsub.s32 32, %v1258_v39  ;;  %v1263_v10 = vsub.s32 4294967266, %v1258_v39  ;;  %vm2223_vm12 = vcmp.eq.s32.totalorder %v2218_v30, 2  ;;  %v1184_v2 = vsel %vm1182_vm5, %v1183_v17, %v7633_v4 }
 0x1bb   : > { %v1260_v31 = vshll.u32 %v8872_v0, %v1258_v39  ;;  %v2225_v16 = vsel %vm2223_vm12, %v1183_v17, %v7633_v4  ;;  %v8924_v28 = vrot.slane %v2346_v27, %v11567_v40  ;;  %v1181_v8 = vsel %vm1179_vm14, %v7631_v38, %v1180_v19 }
 0x1bc   : > { %v1261_v57 = vshrl.u32 %v1243_v56, %v1259_v20  ;;  %v1264_v13 = vadd.s32 127, %v1263_v10  ;;  %v2222_v62 = vsel %vm2220_vm1, %v7631_v38, %v1180_v19  ;;  %v1185_v32 = vsel %vm1178_vm4, %v1181_v8, %v1184_v2 }
 0x1bd   : > { %v2226_v21 = vsel %vm2219_vm13, %v2222_v62, %v2225_v16  ;;  %v8932_v36 = vmul.f32 %v8918_v59, %v2350_v29  ;;  %v8935_v0 = vmul.f32 %v8924_v28, %v2350_v29  ;;  %v1186_v43 = vsel %vm1175_vm0, nan, %v1185_v32 }
 0x1be   : > { %v1262_v49 = vor.u32 %v1261_v57, %v1260_v31  ;;  %v1265_v25 = vshll.u32 %v1264_v13, 23  ;;  %v2227_v52 = vsel %vm1175_vm0, nan, %v2226_v21  ;;  %vm1189_vm7 = vcmp.lt.s32.totalorder %v8495_v48, 0  ;;  %1299 = vst [vmem:[%s8172_s12 + $0x40] sm:$0xff] %v1186_v43 }
 0x1bf   : > { %2339 = vst [vmem:[%s8172_s12 + $0x90] sm:$0xff] %v2227_v52  ;;  %v1274_v7 = vsel %vm1189_vm7, %v1273_v5, %v8846_v45  ;;  %vm8951_vm14 = vcmp.le.f32.partialorder %v1187_v44, 0.7853982  ;;  %v2393_v51 = vand.u32 2147483647, %v8932_v36  ;;  %v2396_v22 = vand.u32 2139095040, %v8932_v36 }
 0x1c0   : > { %v1266_v14 = vor.u32 4788187, %v1265_v25  ;;  %v1269_v46 = vcvt.s32.f32 %v1262_v49  ;;  %v8959_v35 = vmul.f32 %v8918_v59, %v8941_v12  ;;  %v2497_v18 = vand.u32 2147483647, %v8935_v0 }
 0x1c1   : > { %v1276_v45 = vsel %vm8951_vm14, 0, %v1274_v7  ;;  %v2397_v58 = vshrl.u32 %v2396_v22, 23  ;;  %v2500_v44 = vand.u32 2139095040, %v8935_v0  ;;  %v2400_v1 = vand.u32 8388607, %v2393_v51 }
 0x1c2   : > { %v1267_v41 = vand.u32 2147483647, %v1266_v14  ;;  %v2504_v63 = vand.u32 8388607, %v2497_v18  ;;  %v1280_v34 = vadd.s32 3, %v1276_v45  ;;  %v2604_v47 = vand.u32 2139095040, %v8959_v35 }
 0x1c3   : > { %v7243_v24 = vadd.s32 4294967169, %v2397_v58  ;;  %v2501_v30 = vshrl.u32 %v2500_v44, 23  ;;  %v8972_v27 = vand.u32 3, %v1276_v45  ;;  %v2401_v56 = vor.u32 8388608, %v2400_v1 }
 0x1c4   : > { %v1270_v26 = vmul.f32 %v1269_v46, %v1267_v41  ;;  %v2605_v3 = vshrl.u32 %v2604_v47, 23  ;;  %v2505_v38 = vor.u32 8388608, %v2504_v63  ;;  %v8977_v50 = vand.u32 3, %v1280_v34 }
 0x1c5   : > { %v2403_v60 = vadd.s32 1, %v7243_v24  ;;  %v7247_v9 = vadd.s32 4294967169, %v2501_v30  ;;  %v8979_v19 = vshll.u32 %v2401_v56, 8  ;;  %v2601_v20 = vand.u32 2147483647, %v8959_v35 }
 0x1c6   : > { %v1271_v37 = vxor.u32 2147483648, %v1270_v26  ;;  %v7251_v17 = vadd.s32 4294967169, %v2605_v3  ;;  %v8982_v31 = vshll.u32 %v2505_v38, 8  ;;  %vm1286_vm9 = vcmp.eq.s32.totalorder %v8977_v50, 2 }
 0x1c7   : > { %vm2404_vm2 = vcmp.gt.s32.totalorder %v2403_v60, 0  ;;  %v2507_v5 = vadd.s32 1, %v7247_v9  ;;  %vm2326_vm11 = vcmp.eq.s32.totalorder %v8972_v27, 2  ;;  %vm1283_vm3 = vcmp.eq.s32.totalorder %v8977_v50, 0 }
 0x1c8   : > { %v1272_v61 = vsel %vm1189_vm7, %v1271_v37, %v1270_v26  ;;  %v2405_v4 = vsel %vm2404_vm2, %v2403_v60, 0  ;;  %v8984_v16 = vadd.s32 1, %v7251_v17  ;;  %vm2323_vm0 = vcmp.eq.s32.totalorder %v8972_v27, 0 }
 0x1c9   : > { %v1275_v54 = vsel %vm8951_vm14, %v8495_v48, %v1272_v61  ;;  %v2407_v39 = vand.u32 31, %v2405_v4  ;;  %vm2508_vm4 = vcmp.gt.s32.totalorder %v2507_v5, 0  ;;  %v2406_v29 = vshrl.u32 %v2405_v4, 5 }
 0x1ca   : > { %7634 = vcosq.f32 %v1275_v54  ;;  %v2509_v2 = vsel %vm2508_vm4, %v2507_v5, 0  ;;  %vm1282_vm6 = vcmp.lt.s32.totalorder %v8977_v50, 2  ;;  %vm2322_vm8 = vcmp.lt.s32.totalorder %v8972_v27, 2 }
 0x1cb   : > { %7636 = vsinq.f32 %v1275_v54  ;;  %v2408_v10 = vsub.s32 32, %v2407_v39  ;;  %v2410_v8 = vshll.u32 %v11536_v55, %v2407_v39  ;;  %v2413_v57 = vshll.u32 %v11540_v15, %v2407_v39 }
 0x1cc   : > { %v2416_v13 = vshll.u32 %v11529_v33, %v2407_v39  ;;  %v2419_v62 = vshll.u32 %v11530_v42, %v2407_v39  ;;  %v2422_v49 = vshll.u32 %v11531_v6, %v2407_v39  ;;  %vm2425_vm5 = vcmp.lt.s32.totalorder %v2406_v29, 1 }
 0x1cd   : > { %v2411_v32 = vshrl.u32 %v11540_v15, %v2408_v10  ;;  %v2414_v21 = vshrl.u32 %v11529_v33, %v2408_v10  ;;  %v2417_v43 = vshrl.u32 %v11530_v42, %v2408_v10  ;;  %v2409_v25 = vshrl.u32 %v11536_v55, %v2408_v10 }
 0x1ce   : > { %v2420_v52 = vshrl.u32 %v11531_v6, %v2408_v10  ;;  %v2423_v14 = vshrl.u32 %v11532_v53, %v2408_v10  ;;  %vm1279_vm15 = vweird.f32 %v8495_v48  ;;  %vm2427_vm10 = vcmp.lt.s32.totalorder %v2406_v29, 3 }
 0x1cf   : > { %v2412_v7 = vor.u32 %v2411_v32, %v2410_v8  ;;  %v2415_v11 = vor.u32 %v2414_v21, %v2413_v57  ;;  %v2418_v22 = vor.u32 %v2417_v43, %v2416_v13  ;;  %vm2428_vm13 = vcmp.lt.s32.totalorder %v2406_v29, 4 }
 0x1d0   : > { %v2421_v41 = vor.u32 %v2420_v52, %v2419_v62  ;;  %v2424_v46 = vor.u32 %v2423_v14, %v2422_v49  ;;  %v2511_v45 = vand.u32 31, %v2509_v2  ;;  %vm2426_vm1 = vcmp.lt.s32.totalorder %v2406_v29, 2 }
 0x1d1   : > { %v2429_v58 = vsel %vm2425_vm5, %v2409_v25, %v2412_v7  ;;  %v2430_v44 = vsel %vm2428_vm13, %v2418_v22, 2102212464  ;;  %v2433_v26 = vsel %vm2425_vm5, %v2412_v7, %v2415_v11  ;;  %v2437_v1 = vsel %vm2425_vm5, %v2415_v11, %v2418_v22 }
 0x1d2   : > { %v2431_v30 = vsel %vm2427_vm10, %v2415_v11, %v2430_v44  ;;  %v2434_v63 = vsel %vm2428_vm13, %v2421_v41, 920167782  ;;  %v2438_v37 = vsel %vm2428_vm13, %v2424_v46, 1326507024  ;;  %v2512_v61 = vsub.s32 32, %v2511_v45 }
 0x1d3   : > { %v2435_v60 = vsel %vm2427_vm10, %v2418_v22, %v2434_v63  ;;  %v2439_v9 = vsel %vm2427_vm10, %v2421_v41, %v2438_v37  ;;  %v2432_v3 = vsel %vm2426_vm1, %v2429_v58, %v2431_v30  ;;  %v2510_v21 = vshrl.u32 %v2509_v2, 5 }
 0x1d4   : > { %v7635_v24 = vpop.eup %7634  ;;  %v2436_v54 = vsel %vm2426_vm1, %v2433_v26, %v2435_v60  ;;  %v2440_v38 = vsel %vm2426_vm1, %v2437_v1, %v2439_v9  ;;  %v2448_v32 = vmul.u32 %v8979_v19, %v2432_v3  ;;  %v2514_v25 = vshll.u32 %v11536_v55, %v2511_v45 }
 0x1d5   : > { %v7637_v34 = vpop.eup %7636  ;;  %v1287_v47 = vxor.u32 2147483648, %v7635_v24  ;;  %v9012_v17 = vmul.u32.u64.low %v8979_v19, %v2440_v38  ;;  %v9013_v39 = vmul.u32.u64.high %v8979_v19, %v2440_v38, %v9012_v17  ;;  %v2515_v52 = vshrl.u32 %v11540_v15, %v2512_v61 }
 0x1d6   : > { %v1284_v56 = vxor.u32 2147483648, %v7637_v34  ;;  %v9020_v8 = vmul.u32.u64.low %v8979_v19, %v2436_v54  ;;  %v9021_v57 = vmul.u32.u64.high %v8979_v19, %v2436_v54, %v9020_v8  ;;  %v2517_v27 = vshll.u32 %v11540_v15, %v2511_v45 }
 0x1d7   : > { %v1288_v5 = vsel %vm1286_vm9, %v1287_v47, %v7637_v34  ;;  %v2328_v4 = vsel %vm2326_vm11, %v1287_v47, %v7637_v34  ;;  %v2518_v50 = vshrl.u32 %v11529_v33, %v2512_v61  ;;  %v2520_v19 = vshll.u32 %v11529_v33, %v2511_v45 }
 0x1d8   : > { %v1285_v29 = vsel %vm1283_vm3, %v7635_v24, %v1284_v56  ;;  %v2325_v10 = vsel %vm2323_vm0, %v7635_v24, %v1284_v56  ;;  %vm2450_vm12 = vc.u32 %v9013_v39, %v9020_v8  ;;  %v2451_v2 = vadd.s32 1, %v9021_v57 }
 0x1d9   : > { %v1289_v13 = vsel %vm1282_vm6, %v1285_v29, %v1288_v5  ;;  %v2329_v62 = vsel %vm2322_vm8, %v2325_v10, %v2328_v4  ;;  %v2516_v14 = vor.u32 %v2515_v52, %v2514_v25  ;;  %v2521_v48 = vshrl.u32 %v11530_v42, %v2512_v61 }
 0x1da   : > { %v1290_v43 = vsel %vm1279_vm15, nan, %v1289_v13  ;;  %v2330_v49 = vsel %vm1279_vm15, nan, %v2329_v62  ;;  %v2523_v7 = vshll.u32 %v11530_v42, %v2511_v45  ;;  %v2519_v11 = vor.u32 %v2518_v50, %v2517_v27 }
 0x1db   : > { %1300 = vst [vmem:[%s8172_s12 + $0x48] sm:$0xff] %v1290_v43  ;;  %2340 = vst [vmem:[%s8172_s12 + $0x98] sm:$0xff] %v2330_v49  ;;  %v2524_v22 = vshrl.u32 %v11531_v6, %v2512_v61  ;;  %v2526_v41 = vshll.u32 %v11531_v6, %v2511_v45  ;;  %v2527_v46 = vshrl.u32 %v11532_v53, %v2512_v61  ;;  %vm2612_vm7 = vcmp.gt.s32.totalorder %v8984_v16, 0  ;;  %v9068_v43 = vpop.permute.xlu1 %2359 }
 0x1dc   : > { %v2452_v58 = vsel %vm2450_vm12, %v2451_v2, %v9021_v57  ;;  %v2513_v44 = vshrl.u32 %v11536_v55, %v2512_v61  ;;  %v2522_v26 = vor.u32 %v2521_v48, %v2520_v19  ;;  %vm2529_vm14 = vcmp.lt.s32.totalorder %v2510_v21, 1 }
 0x1dd   : > { %v2453_v1 = vadd.s32 %v2452_v58, %v2448_v32  ;;  %v2525_v24 = vor.u32 %v2524_v22, %v2523_v7  ;;  %v2528_v30 = vor.u32 %v2527_v46, %v2526_v41  ;;  %vm2530_vm2 = vcmp.lt.s32.totalorder %v2510_v21, 2 }
 0x1de   : > { %vm2531_vm4 = vcmp.lt.s32.totalorder %v2510_v21, 3  ;;  %vm2532_vm9 = vcmp.lt.s32.totalorder %v2510_v21, 4  ;;  %v2537_v63 = vsel %vm2529_vm14, %v2516_v14, %v2519_v11  ;;  %v2541_v47 = vsel %vm2529_vm14, %v2519_v11, %v2522_v26 }
 0x1df   : > { %v2454_v37 = vadd.s32 536870912, %v2453_v1  ;;  %v2534_v34 = vsel %vm2532_vm9, %v2522_v26, 2102212464  ;;  %v2538_v45 = vsel %vm2532_vm9, %v2525_v24, 920167782  ;;  %v2533_v60 = vsel %vm2529_vm14, %v2513_v44, %v2516_v14 }
 0x1e0   : > { %v2539_v9 = vsel %vm2531_vm4, %v2522_v26, %v2538_v45  ;;  %v2542_v56 = vsel %vm2532_vm9, %v2528_v30, 1326507024  ;;  %v2613_v61 = vsel %vm2612_vm7, %v8984_v16, 0  ;;  %v2535_v54 = vsel %vm2531_vm4, %v2519_v11, %v2534_v34 }
 0x1e1   : > { %v2455_v3 = vshrl.u32 %v2454_v37, 30  ;;  %v2540_v38 = vsel %vm2530_vm2, %v2537_v63, %v2539_v9  ;;  %v2543_v5 = vsel %vm2531_vm4, %v2525_v24, %v2542_v56  ;;  %v2608_v10 = vand.u32 8388607, %v2601_v20 }
 0x1e2   : > { %v2544_v4 = vsel %vm2530_vm2, %v2541_v47, %v2543_v5  ;;  %v9057_v17 = vmul.u32.u64.low %v8982_v31, %v2540_v38  ;;  %v9058_v29 = vmul.u32.u64.high %v8982_v31, %v2540_v38, %v9057_v17  ;;  %v2536_v16 = vsel %vm2530_vm2, %v2533_v60, %v2535_v54 }
 0x1e3   : > { %v2456_v57 = vshll.u32 %v2455_v3, 30  ;;  %v9064_v13 = vmul.u32.u64.low %v8982_v31, %v2544_v4  ;;  %v9065_v62 = vmul.u32.u64.high %v8982_v31, %v2544_v4, %v9064_v13  ;;  %v2615_v32 = vand.u32 31, %v2613_v61 }
 0x1e4   : > { %v9074_v25 = vmul.f32 %v8924_v28, %v8941_v12  ;;  %v2555_v52 = vadd.s32 1, %v9058_v29  ;;  %v2609_v27 = vor.u32 8388608, %v2608_v10  ;;  %v2552_v2 = vmul.u32 %v8982_v31, %v2536_v16 }
 0x1e5   : > { %v9070_v49 = vsub.s32 %v2453_v1, %v2456_v57  ;;  %v2616_v50 = vsub.s32 32, %v2615_v32  ;;  %vm2554_vm11 = vc.u32 %v9065_v62, %v9057_v17  ;;  %v9081_v21 = vshrl.u32 %v2613_v61, 5 }
 0x1e6   : > { %11570 = vst [vmem:[#allocation10_spill] sm:$0xff] %v9074_v25  ;;  %v9085_v14 = vmul.f32 %v8918_v59, %v9068_v43  ;;  %vm2395_vm3 = vcmp.lt.s32.totalorder %v8932_v36, 0  ;;  %v2556_v12 = vsel %vm2554_vm11, %v2555_v52, %v9058_v29  ;;  %v2618_v31 = vshll.u32 %v11536_v55, %v2615_v32 }
 0x1e7   : > { %v2459_v19 = vsub.s32 0, %v9070_v49  ;;  %v2619_v48 = vshrl.u32 %v11540_v15, %v2616_v50  ;;  %v2557_v11 = vadd.s32 %v2556_v12, %v2552_v2  ;;  %v2622_v22 = vshrl.u32 %v11529_v33, %v2616_v50 }
 0x1e8   : > { %11571 = vst [vmem:[#allocation8_spill] sm:$0xff] %v9085_v14  ;;  %v2449_v41 = vadd.s32 %v9020_v8, %v9013_v39  ;;  %v2479_v46 = vsub.s32 4, %v2455_v3  ;;  %v2625_v58 = vshrl.u32 %v11530_v42, %v2616_v50  ;;  %v9096_v44 = vshll.u32 %v2609_v27, 8 }
 0x1e9   : > { %v7244_v7 = vmin.u32 %v2459_v19, %v9070_v49  ;;  %v2620_v1 = vor.u32 %v2619_v48, %v2618_v31  ;;  %v2621_v24 = vshll.u32 %v11540_v15, %v2615_v32  ;;  %vm2633_vm0 = vcmp.lt.s32.totalorder %v9081_v21, 1 }
 0x1ea   : > { %v2558_v30 = vadd.s32 536870912, %v2557_v11  ;;  %v2624_v63 = vshll.u32 %v11529_v33, %v2615_v32  ;;  %v2627_v37 = vshll.u32 %v11530_v42, %v2615_v32  ;;  %v2628_v34 = vshrl.u32 %v11531_v6, %v2616_v50 }
 0x1eb   : > { %v2461_v26 = vclz %v7244_v7  ;;  %v2623_v39 = vor.u32 %v2622_v22, %v2621_v24  ;;  %v2630_v8 = vshll.u32 %v11531_v6, %v2615_v32  ;;  %v2631_v47 = vshrl.u32 %v11532_v53, %v2616_v50 }
 0x1ec   : > { %vm9107_vm6 = vcmp.le.f32.partialorder %v2393_v51, 0.7853982  ;;  %v2559_v9 = vshrl.u32 %v2558_v30, 30  ;;  %v2626_v56 = vor.u32 %v2625_v58, %v2624_v63  ;;  %v2629_v61 = vor.u32 %v2628_v34, %v2627_v37 }
 0x1ed   : > { %v7245_v45 = vadd.s32 4294967294, %v2461_v26  ;;  %vm2634_vm8 = vcmp.lt.s32.totalorder %v9081_v21, 2  ;;  %v2480_v54 = vsel %vm2395_vm3, %v2479_v46, %v2455_v3  ;;  %vm2499_vm15 = vcmp.lt.s32.totalorder %v8935_v0, 0 }
 0x1ee   : > { %v2632_v38 = vor.u32 %v2631_v47, %v2630_v8  ;;  %vm2635_vm10 = vcmp.lt.s32.totalorder %v9081_v21, 3  ;;  %v2560_v4 = vshll.u32 %v2559_v9, 30  ;;  %v2617_v51 = vshrl.u32 %v11536_v55, %v2616_v50 }
 0x1ef   : > { %vm7246_vm5 = vcmp.lt.s32.totalorder %v7245_v45, 0  ;;  %vm2636_vm13 = vcmp.lt.s32.totalorder %v9081_v21, 4  ;;  %v2641_v57 = vsel %vm2633_vm0, %v2620_v1, %v2623_v39  ;;  %v2645_v32 = vsel %vm2633_vm0, %v2623_v39, %v2626_v56 }
 0x1f0   : > { %v2464_v5 = vsel %vm7246_vm5, 0, %v7245_v45  ;;  %v2642_v13 = vsel %vm2636_vm13, %v2629_v61, 920167782  ;;  %v9120_v16 = vsub.s32 %v2557_v11, %v2560_v4  ;;  %v2646_v52 = vsel %vm2636_vm13, %v2632_v38, 1326507024 }
 0x1f1   : > { %v2465_v29 = vsub.s32 32, %v2464_v5  ;;  %v2469_v10 = vsub.s32 4294967266, %v2464_v5  ;;  %v2643_v3 = vsel %vm2635_vm10, %v2626_v56, %v2642_v13  ;;  %v2466_v27 = vshll.u32 %v9070_v49, %v2464_v5 }
 0x1f2   : > { %v2638_v2 = vsel %vm2636_vm13, %v2626_v56, 2102212464  ;;  %v2563_v12 = vsub.s32 0, %v9120_v16  ;;  %v2583_v48 = vsub.s32 4, %v2559_v9  ;;  %v2644_v7 = vsel %vm2634_vm8, %v2641_v57, %v2643_v3 }
 0x1f3   : > { %v2467_v50 = vshrl.u32 %v2449_v41, %v2465_v29  ;;  %v2470_v19 = vadd.s32 127, %v2469_v10  ;;  %v2647_v11 = vsel %vm2635_vm10, %v2629_v61, %v2646_v52  ;;  %v2637_v46 = vsel %vm2633_vm0, %v2617_v51, %v2620_v1 }
 0x1f4   : > { %v2648_v49 = vsel %vm2634_vm8, %v2645_v32, %v2647_v11  ;;  %v7248_v41 = vmin.u32 %v2563_v12, %v9120_v16  ;;  %v2639_v58 = vsel %vm2635_vm10, %v2623_v39, %v2638_v2  ;;  %v9145_v63 = vsel %vm9107_vm6, 0, %v2480_v54 }
 0x1f5   : > { %v2468_v31 = vor.u32 %v2467_v50, %v2466_v27  ;;  %v2471_v22 = vshll.u32 %v2470_v19, 23  ;;  %v9140_v26 = vmul.u32.u64.low %v9096_v44, %v2648_v49  ;;  %v9141_v24 = vmul.u32.u64.high %v9096_v44, %v2648_v49, %v9140_v26 }
 0x1f6   : > { %v9148_v37 = vmul.u32.u64.low %v9096_v44, %v2644_v7  ;;  %v9149_v1 = vmul.u32.u64.high %v9096_v44, %v2644_v7, %v9148_v37  ;;  %vm9154_vm1 = vcmp.le.f32.partialorder %v2497_v18, 0.7853982  ;;  %v2565_v45 = vclz %v7248_v41 }
 0x1f7   : > { %v2472_v30 = vor.u32 4788187, %v2471_v22  ;;  %v2584_v39 = vsel %vm2499_vm15, %v2583_v48, %v2559_v9  ;;  %v2705_v8 = vand.u32 2147483647, %v9074_v25  ;;  %v2475_v56 = vcvt.s32.f32 %v2468_v31 }
 0x1f8   : > { %v2640_v61 = vsel %vm2634_vm8, %v2637_v46, %v2639_v58  ;;  %v2708_v54 = vand.u32 2139095040, %v9074_v25  ;;  %v2486_v38 = vadd.s32 3, %v9145_v63  ;;  %v2553_v18 = vadd.s32 %v9057_v17, %v9065_v62  ;;  %v9188_v46 = vpop.permute.xlu0 %2364 }
 0x1f9   : > { %v2473_v47 = vand.u32 2147483647, %v2472_v30  ;;  %v7249_v5 = vadd.s32 4294967294, %v2565_v45  ;;  %vm2658_vm12 = vc.u32 %v9141_v24, %v9148_v37  ;;  %v9171_v9 = vsel %vm9154_vm1, 0, %v2584_v39 }
 0x1fa   : > { %v2659_v51 = vadd.s32 1, %v9149_v1  ;;  %v2709_v21 = vshrl.u32 %v2708_v54, 23  ;;  %v2656_v29 = vmul.u32 %v9096_v44, %v2640_v61  ;;  %v2712_v10 = vand.u32 8388607, %v2705_v8 }
 0x1fb   : > { %v2476_v4 = vmul.f32 %v2475_v56, %v2473_v47  ;;  %vm7250_vm7 = vcmp.lt.s32.totalorder %v7249_v5, 0  ;;  %v2812_v17 = vand.u32 2139095040, %v9085_v14  ;;  %v2809_v50 = vand.u32 2147483647, %v9085_v14 }
 0x1fc   : > { %v2568_v57 = vsel %vm7250_vm7, 0, %v7249_v5  ;;  %v2660_v13 = vsel %vm2658_vm12, %v2659_v51, %v9149_v1  ;;  %v7255_v3 = vadd.s32 4294967169, %v2709_v21  ;;  %v9186_v22 = vand.u32 3, %v2486_v38 }
 0x1fd   : > { %v2477_v62 = vxor.u32 2147483648, %v2476_v4  ;;  %v2569_v32 = vsub.s32 32, %v2568_v57  ;;  %v2573_v52 = vsub.s32 4294967266, %v2568_v57  ;;  %v2661_v27 = vadd.s32 %v2660_v13, %v2656_v29 }
 0x1fe   : > { %v2570_v44 = vshll.u32 %v9120_v16, %v2568_v57  ;;  %v2715_v2 = vadd.s32 1, %v7255_v3  ;;  %v2813_v12 = vshrl.u32 %v2812_v17, 23  ;;  %v2590_v16 = vadd.s32 3, %v9171_v9 }
 0x1ff   : > { %v2478_v19 = vsel %vm2395_vm3, %v2477_v62, %v2476_v4  ;;  %v2571_v7 = vshrl.u32 %v2553_v18, %v2569_v32  ;;  %v2574_v11 = vadd.s32 127, %v2573_v52  ;;  %v2662_v31 = vadd.s32 536870912, %v2661_v27 }
 0x200   : > { %v2481_v48 = vsel %vm9107_vm6, %v8932_v36, %v2478_v19  ;;  %vm2716_vm14 = vcmp.gt.s32.totalorder %v2715_v2, 0  ;;  %v7259_v30 = vadd.s32 4294967169, %v2813_v12  ;;  %v2713_v45 = vor.u32 8388608, %v2712_v10 }
 0x201   : > { %7638 = vcosq.f32 %v2481_v48  ;;  %v2572_v49 = vor.u32 %v2571_v7, %v2570_v44  ;;  %v2575_v41 = vshll.u32 %v2574_v11, 23  ;;  %v9190_v58 = vshrl.u32 %v2662_v31, 30 }
 0x202   : > { %7640 = vsinq.f32 %v2481_v48  ;;  %v2717_v26 = vsel %vm2716_vm14, %v2715_v2, 0  ;;  %v9196_v39 = vand.u32 8388607, %v2809_v50  ;;  %v9200_v47 = vmul.f32 %v8924_v28, %v9068_v43 }
 0x203   : > { %v2576_v60 = vor.u32 4788187, %v2575_v41  ;;  %v2664_v1 = vshll.u32 %v9190_v58, 30  ;;  %v9204_v56 = vmul.f32 %v8918_v59, %v9188_v46  ;;  %v2719_v61 = vand.u32 31, %v2717_v26 }
 0x204   : > { %vm2489_vm2 = vcmp.eq.s32.totalorder %v9186_v22, 0  ;;  %vm2492_vm4 = vcmp.eq.s32.totalorder %v9186_v22, 2  ;;  %v2579_v38 = vcvt.s32.f32 %v2572_v49  ;;  %vm2488_vm9 = vcmp.lt.s32.totalorder %v9186_v22, 2 }
 0x205   : > { %v2577_v54 = vand.u32 2147483647, %v2576_v60  ;;  %v9208_v18 = vsub.s32 %v2661_v27, %v2664_v1  ;;  %v9211_v5 = vand.u32 3, %v2590_v16  ;;  %v2657_v43 = vadd.s32 %v9148_v37, %v9141_v24 }
 0x206   : > { %v2720_v4 = vsub.s32 32, %v2719_v61  ;;  %v9215_v51 = vadd.s32 1, %v7259_v30  ;;  %vm2485_vm11 = vweird.f32 %v8932_v36  ;;  %v9219_v10 = vshll.u32 %v2713_v45, 8 }
 0x207   : > { %v2580_v21 = vmul.f32 %v2579_v38, %v2577_v54  ;;  %v2667_v29 = vsub.s32 0, %v9208_v18  ;;  %v2817_v17 = vor.u32 8388608, %v9196_v39  ;;  %v2687_v62 = vsub.s32 4, %v9190_v58 }
 0x208   : > { %v2723_v57 = vshrl.u32 %v11540_v15, %v2720_v4  ;;  %v2726_v13 = vshrl.u32 %v11529_v33, %v2720_v4  ;;  %v2729_v24 = vshrl.u32 %v11530_v42, %v2720_v4  ;;  %v9227_v32 = vshrl.u32 %v2717_v26, 5 }
 0x209   : > { %v2581_v37 = vxor.u32 2147483648, %v2580_v21  ;;  %v7252_v3 = vmin.u32 %v2667_v29, %v9208_v18  ;;  %v2722_v52 = vshll.u32 %v11536_v55, %v2719_v61  ;;  %v2725_v19 = vshll.u32 %v11540_v15, %v2719_v61 }
 0x20a   : > { %v2728_v44 = vshll.u32 %v11529_v33, %v2719_v61  ;;  %v2731_v2 = vshll.u32 %v11530_v42, %v2719_v61  ;;  %v2732_v12 = vshrl.u32 %v11531_v6, %v2720_v4  ;;  %vm2820_vm3 = vcmp.gt.s32.totalorder %v9215_v51, 0 }
 0x20b   : > { %v9230_v27 = vpop.eup %7638  ;;  %v2582_v11 = vsel %vm2499_vm15, %v2581_v37, %v2580_v21  ;;  %v2669_v31 = vclz %v7252_v3  ;;  %v2724_v49 = vor.u32 %v2723_v57, %v2722_v52  ;;  %v2727_v26 = vor.u32 %v2726_v13, %v2725_v19 }
 0x20c   : > { %v9237_v48 = vpop.eup %7640  ;;  %v11445_v7 = vxor.u32 2147483648, %v9230_v27  ;;  %v2585_v16 = vsel %vm9154_vm1, %v8935_v0, %v2582_v11  ;;  %v2730_v30 = vor.u32 %v2729_v24, %v2728_v44  ;;  %vm2603_vm0 = vcmp.lt.s32.totalorder %v8959_v35, 0 }
 0x20d   : > { %v11446_v41 = vxor.u32 2147483648, %v9237_v48  ;;  %7642 = vcosq.f32 %v2585_v16  ;;  %v7253_v1 = vadd.s32 4294967294, %v2669_v31  ;;  %v2733_v45 = vor.u32 %v2732_v12, %v2731_v2 }
 0x20e   : > { %v2494_v60 = vsel %vm2492_vm4, %v11445_v7, %v9237_v48  ;;  %7644 = vsinq.f32 %v2585_v16  ;;  %v2734_v54 = vshll.u32 %v11531_v6, %v2719_v61  ;;  %v2735_v38 = vshrl.u32 %v11532_v53, %v2720_v4 }
 0x20f   : > { %v2491_v34 = vsel %vm2489_vm2, %v9230_v27, %v11446_v41  ;;  %vm7254_vm6 = vcmp.lt.s32.totalorder %v7253_v1, 0  ;;  %v2721_v29 = vshrl.u32 %v11536_v55, %v2720_v4  ;;  %vm2737_vm8 = vcmp.lt.s32.totalorder %v9227_v32, 1 }
 0x210   : > { %v2495_v21 = vsel %vm2488_vm9, %v2491_v34, %v2494_v60  ;;  %vm9267_vm5 = vcmp.le.f32.partialorder %v2601_v20, 0.7853982  ;;  %v2672_v61 = vsel %vm7254_vm6, 0, %v7253_v1  ;;  %v2736_v24 = vor.u32 %v2735_v38, %v2734_v54 }
 0x211   : > { %v2496_v57 = vsel %vm2485_vm11, nan, %v2495_v21  ;;  %vm2738_vm15 = vcmp.lt.s32.totalorder %v9227_v32, 2  ;;  %v2673_v22 = vsub.s32 32, %v2672_v61  ;;  %v2677_v37 = vsub.s32 4294967266, %v2672_v61 }
 0x212   : > { %vm2739_vm10 = vcmp.lt.s32.totalorder %v9227_v32, 3  ;;  %vm2740_vm13 = vcmp.lt.s32.totalorder %v9227_v32, 4  ;;  %3433 = vst [vmem:[%s8172_s12 + $0xa0] sm:$0xff] %v2496_v57  ;;  %vm2593_vm1 = vcmp.eq.s32.totalorder %v9211_v5, 0  ;;  %v2674_v4 = vshll.u32 %v9208_v18, %v2672_v61 }
 0x213   : > { %v2742_v20 = vsel %vm2740_vm13, %v2730_v30, 2102212464  ;;  %v2745_v3 = vsel %vm2737_vm8, %v2724_v49, %v2727_v26  ;;  %v2746_v52 = vsel %vm2740_vm13, %v2733_v45, 920167782  ;;  %vm2592_vm12 = vcmp.lt.s32.totalorder %v9211_v5, 2 }
 0x214   : > { %v2675_v19 = vshrl.u32 %v2657_v43, %v2673_v22  ;;  %v2678_v44 = vadd.s32 127, %v2677_v37  ;;  %v2741_v2 = vsel %vm2737_vm8, %v2721_v29, %v2724_v49  ;;  %v2747_v12 = vsel %vm2739_vm10, %v2730_v30, %v2746_v52 }
 0x215   : > { %vm2589_vm7 = vweird.f32 %v8935_v0  ;;  %v2743_v18 = vsel %vm2739_vm10, %v2727_v26, %v2742_v20  ;;  %v2748_v11 = vsel %vm2738_vm15, %v2745_v3, %v2747_v12  ;;  %v2749_v31 = vsel %vm2737_vm8, %v2727_v26, %v2730_v30 }
 0x216   : > { %v2750_v43 = vsel %vm2740_vm13, %v2736_v24, 1326507024  ;;  %v2676_v16 = vor.u32 %v2675_v19, %v2674_v4  ;;  %v2679_v60 = vshll.u32 %v2678_v44, 23  ;;  %v2821_v1 = vsel %vm2820_vm3, %v9215_v51, 0 }
 0x217   : > { %v2751_v49 = vsel %vm2739_vm10, %v2733_v45, %v2750_v43  ;;  %v2688_v34 = vsel %vm2603_vm0, %v2687_v62, %v9190_v58  ;;  %v9310_v30 = vmul.u32.u64.low %v9219_v10, %v2748_v11  ;;  %v9311_v54 = vmul.u32.u64.high %v9219_v10, %v2748_v11, %v9310_v30  ;;  %v9314_v38 = vpop.eup %7642 }
 0x218   : > { %v2752_v26 = vsel %vm2738_vm15, %v2749_v31, %v2751_v49  ;;  %v2680_v45 = vor.u32 4788187, %v2679_v60  ;;  %v2744_v51 = vsel %vm2738_vm15, %v2741_v2, %v2743_v18  ;;  %v9322_v57 = vpop.eup %7644  ;;  %vm2596_vm14 = vcmp.eq.s32.totalorder %v9211_v5, 2 }
 0x219   : > { %v9319_v21 = vmul.u32.u64.low %v9219_v10, %v2752_v26  ;;  %v9320_v29 = vmul.u32.u64.high %v9219_v10, %v2752_v26, %v9319_v21  ;;  %v11443_v58 = vxor.u32 2147483648, %v9314_v38  ;;  %v2823_v62 = vand.u32 31, %v2821_v1 }
 0x21a   : > { %v9328_v61 = vshll.u32 %v2817_v17, 8  ;;  %v11444_v24 = vxor.u32 2147483648, %v9322_v57  ;;  %v2681_v22 = vand.u32 2147483647, %v2680_v45  ;;  %v2683_v32 = vcvt.s32.f32 %v2676_v16 }
 0x21b   : > { %v9333_v37 = vsel %vm9267_vm5, 0, %v2688_v34  ;;  %v2598_v4 = vsel %vm2596_vm14, %v11443_v58, %v9322_v57  ;;  %v2760_v20 = vmul.u32 %v9219_v10, %v2744_v51  ;;  %v2763_v3 = vadd.s32 1, %v9311_v54 }
 0x21c   : > { %v2824_v52 = vsub.s32 32, %v2823_v62  ;;  %v2595_v39 = vsel %vm2593_vm1, %v9314_v38, %v11444_v24  ;;  %v2684_v17 = vmul.f32 %v2683_v32, %v2681_v22  ;;  %vm2762_vm2 = vc.u32 %v9320_v29, %v9310_v30 }
 0x21d   : > { %v2822_v19 = vshrl.u32 %v2821_v1, 5  ;;  %v2599_v44 = vsel %vm2592_vm12, %v2595_v39, %v2598_v4  ;;  %v2764_v10 = vsel %vm2762_vm2, %v2763_v3, %v9311_v54  ;;  %v2826_v2 = vshll.u32 %v11536_v55, %v2823_v62 }
 0x21e   : > { %v2827_v12 = vshrl.u32 %v11540_v15, %v2824_v52  ;;  %v2600_v18 = vsel %vm2589_vm7, nan, %v2599_v44  ;;  %v2685_v11 = vxor.u32 2147483648, %v2684_v17  ;;  %v2765_v31 = vadd.s32 %v2764_v10, %v2760_v20 }
 0x21f   : > { %v2829_v43 = vshll.u32 %v11540_v15, %v2823_v62  ;;  %v2830_v60 = vshrl.u32 %v11529_v33, %v2824_v52  ;;  %v2832_v49 = vshll.u32 %v11529_v33, %v2823_v62  ;;  %v2833_v5 = vshrl.u32 %v11530_v42, %v2824_v52  ;;  %3434 = vst [vmem:[%s8172_s12 + $0xa8] sm:$0xff] %v2600_v18 }
 0x220   : > { %v2828_v16 = vor.u32 %v2827_v12, %v2826_v2  ;;  %v2686_v1 = vsel %vm2603_vm0, %v2685_v11, %v2684_v17  ;;  %v2766_v34 = vadd.s32 536870912, %v2765_v31  ;;  %v2835_v26 = vshll.u32 %v11530_v42, %v2823_v62 }
 0x221   : > { %v2836_v54 = vshrl.u32 %v11531_v6, %v2824_v52  ;;  %v2689_v45 = vsel %vm9267_vm5, %v8959_v35, %v2686_v1  ;;  %v2831_v51 = vor.u32 %v2830_v60, %v2829_v43  ;;  %v2834_v21 = vor.u32 %v2833_v5, %v2832_v49 }
 0x222   : > { %v2838_v22 = vshll.u32 %v11531_v6, %v2823_v62  ;;  %7646 = vcosq.f32 %v2689_v45  ;;  %v2767_v32 = vshrl.u32 %v2766_v34, 30  ;;  %v2839_v20 = vshrl.u32 %v11532_v53, %v2824_v52 }
 0x223   : > { %v2837_v4 = vor.u32 %v2836_v54, %v2835_v26  ;;  %7648 = vsinq.f32 %v2689_v45  ;;  %v2694_v3 = vadd.s32 3, %v9333_v37  ;;  %vm2841_vm4 = vcmp.lt.s32.totalorder %v2822_v19, 1 }
 0x224   : > { %vm2843_vm9 = vcmp.lt.s32.totalorder %v2822_v19, 3  ;;  %v2768_v39 = vshll.u32 %v2767_v32, 30  ;;  %v2840_v17 = vor.u32 %v2839_v20, %v2838_v22  ;;  %vm2844_vm3 = vcmp.lt.s32.totalorder %v2822_v19, 4 }
 0x225   : > { %v2849_v44 = vsel %vm2841_vm4, %v2828_v16, %v2831_v51  ;;  %v2825_v13 = vshrl.u32 %v11536_v55, %v2824_v52  ;;  %v2846_v10 = vsel %vm2844_vm3, %v2834_v21, 2102212464  ;;  %v2850_v2 = vsel %vm2844_vm3, %v2837_v4, 920167782 }
 0x226   : > { %v2853_v12 = vsel %vm2841_vm4, %v2831_v51, %v2834_v21  ;;  %v9370_v62 = vsub.s32 %v2765_v31, %v2768_v39  ;;  %vm2842_vm0 = vcmp.lt.s32.totalorder %v2822_v19, 2  ;;  %v2851_v18 = vsel %vm2843_vm9, %v2834_v21, %v2850_v2 }
 0x227   : > { %v2854_v11 = vsel %vm2844_vm3, %v2840_v17, 1326507024  ;;  %v2695_v43 = vand.u32 3, %v2694_v3  ;;  %v2845_v60 = vsel %vm2841_vm4, %v2825_v13, %v2828_v16  ;;  %v2852_v49 = vsel %vm2842_vm0, %v2849_v44, %v2851_v18 }
 0x228   : > { %v2855_v5 = vsel %vm2843_vm9, %v2837_v4, %v2854_v11  ;;  %v2771_v1 = vsub.s32 0, %v9370_v62  ;;  %v2791_v34 = vsub.s32 4, %v2767_v32  ;;  %v2847_v52 = vsel %vm2843_vm9, %v2831_v51, %v2846_v10 }
 0x229   : > { %v2856_v26 = vsel %vm2842_vm0, %v2853_v12, %v2855_v5  ;;  %v9383_v45 = vmul.u32.u64.low %v9328_v61, %v2852_v49  ;;  %v9384_v21 = vmul.u32.u64.high %v9328_v61, %v2852_v49, %v9383_v45  ;;  %vm2693_vm6 = vweird.f32 %v8959_v35 }
 0x22a   : > { %v9379_v31 = vmul.u32.u64.low %v9328_v61, %v2856_v26  ;;  %v9380_v54 = vmul.u32.u64.high %v9328_v61, %v2856_v26, %v9379_v31  ;;  %vm9390_vm8 = vcmp.le.f32.partialorder %v2705_v8, 0.7853982  ;;  %v7256_v51 = vmin.u32 %v2771_v1, %v9370_v62  ;;  %v9429_v26 = vpop.permute.xlu1 %2369 }
 0x22b   : > { %v2916_v22 = vand.u32 2139095040, %v9200_v47  ;;  %vm2696_vm5 = vcmp.lt.s32.totalorder %v2695_v43, 2  ;;  %vm2697_vm15 = vcmp.eq.s32.totalorder %v2695_v43, 0  ;;  %vm2707_vm10 = vcmp.lt.s32.totalorder %v9074_v25, 0 }
 0x22c   : > { %v2848_v4 = vsel %vm2842_vm0, %v2845_v60, %v2847_v52  ;;  %v9398_v20 = vpop.eup %7646  ;;  %vm2700_vm13 = vcmp.eq.s32.totalorder %v2695_v43, 2  ;;  %v2761_v3 = vadd.s32 %v9310_v30, %v9320_v29  ;;  %v2773_v8 = vclz %v7256_v51 }
 0x22d   : > { %v2792_v39 = vsel %vm2707_vm10, %v2791_v34, %v2767_v32  ;;  %v9404_v17 = vpop.eup %7648  ;;  %v11441_v44 = vxor.u32 2147483648, %v9398_v20  ;;  %vm2866_vm1 = vc.u32 %v9380_v54, %v9383_v45  ;;  %v2867_v19 = vadd.s32 1, %v9384_v21 }
 0x22e   : > { %v11448_v13 = vand.u32 2147483647, %v9200_v47  ;;  %v11442_v10 = vxor.u32 2147483648, %v9404_v17  ;;  %v7257_v2 = vadd.s32 4294967294, %v2773_v8  ;;  %v2864_v30 = vmul.u32 %v9328_v61, %v2848_v4 }
 0x22f   : > { %v2917_v29 = vshrl.u32 %v2916_v22, 23  ;;  %v2702_v32 = vsel %vm2700_vm13, %v11441_v44, %v9404_v17  ;;  %v9418_v12 = vsel %vm9390_vm8, 0, %v2792_v39  ;;  %v2868_v18 = vsel %vm2866_vm1, %v2867_v19, %v9384_v21 }
 0x230   : > { %v3020_v11 = vand.u32 2139095040, %v9204_v56  ;;  %v2699_v60 = vsel %vm2697_vm15, %v9398_v20, %v11442_v10  ;;  %vm7258_vm12 = vcmp.lt.s32.totalorder %v7257_v2, 0  ;;  %v2869_v61 = vadd.s32 %v2868_v18, %v2864_v30 }
 0x231   : > { %v7263_v49 = vadd.s32 4294967169, %v2917_v29  ;;  %v2703_v5 = vsel %vm2696_vm5, %v2699_v60, %v2702_v32  ;;  %v2776_v1 = vsel %vm7258_vm12, 0, %v7257_v2  ;;  %v2920_v34 = vand.u32 8388607, %v11448_v13 }
 0x232   : > { %v3021_v52 = vshrl.u32 %v3020_v11, 23  ;;  %v2704_v31 = vsel %vm2693_vm6, nan, %v2703_v5  ;;  %v2777_v21 = vsub.s32 32, %v2776_v1  ;;  %v2781_v51 = vsub.s32 4294967266, %v2776_v1 }
 0x233   : > { %v11447_v22 = vand.u32 2147483647, %v9204_v56  ;;  %v9436_v4 = vmul.f32 %v8924_v28, %v9188_v46  ;;  %v2870_v43 = vadd.s32 536870912, %v2869_v61  ;;  %v2923_v8 = vadd.s32 1, %v7263_v49  ;;  %3435 = vst [vmem:[%s8172_s12 + $0xb0] sm:$0xff] %v2704_v31 }
 0x234   : > { %v7267_v39 = vadd.s32 4294967169, %v3021_v52  ;;  %v2778_v19 = vshll.u32 %v9370_v62, %v2776_v1  ;;  %v2779_v2 = vshrl.u32 %v2761_v3, %v2777_v21  ;;  %v2782_v30 = vadd.s32 127, %v2781_v51 }
 0x235   : > { %v2798_v29 = vadd.s32 3, %v9418_v12  ;;  %v9443_v32 = vmul.f32 %v8918_v59, %v9429_v26  ;;  %v2871_v18 = vshrl.u32 %v2870_v43, 30  ;;  %v2921_v11 = vor.u32 8388608, %v2920_v34 }
 0x236   : > { %vm2924_vm14 = vcmp.gt.s32.totalorder %v2923_v8, 0  ;;  %v2780_v60 = vor.u32 %v2779_v2, %v2778_v19  ;;  %v2783_v46 = vshll.u32 %v2782_v30, 23  ;;  %v9447_v49 = vand.u32 8388607, %v11447_v22 }
 0x237   : > { %v2925_v5 = vsel %vm2924_vm14, %v2923_v8, 0  ;;  %v2872_v52 = vshll.u32 %v2871_v18, 30  ;;  %v2895_v62 = vsub.s32 4, %v2871_v18  ;;  %v3027_v1 = vadd.s32 1, %v7267_v39 }
 0x238   : > { %v2927_v3 = vand.u32 31, %v2925_v5  ;;  %v2784_v31 = vor.u32 4788187, %v2783_v46  ;;  %v9449_v21 = vand.u32 3, %v2798_v29  ;;  %vm9453_vm2 = vcmp.le.f32.partialorder %v2809_v50, 0.7853982 }
 0x239   : > { %vm2811_vm4 = vcmp.lt.s32.totalorder %v9085_v14, 0  ;;  %v2865_v34 = vadd.s32 %v9383_v45, %v9380_v54  ;;  %v9460_v51 = vsub.s32 %v2869_v61, %v2872_v52  ;;  %v9462_v8 = vshll.u32 %v2921_v11, 8 }
 0x23a   : > { %v2928_v43 = vsub.s32 32, %v2927_v3  ;;  %v2785_v39 = vand.u32 2147483647, %v2784_v31  ;;  %v2787_v19 = vcvt.s32.f32 %v2780_v60  ;;  %v2926_v2 = vshrl.u32 %v2925_v5, 5 }
 0x23b   : > { %v3025_v30 = vor.u32 8388608, %v9447_v49  ;;  %v2875_v50 = vsub.s32 0, %v9460_v51  ;;  %v2896_v29 = vsel %vm2811_vm4, %v2895_v62, %v2871_v18  ;;  %vm3028_vm9 = vcmp.gt.s32.totalorder %v3027_v1, 0 }
 0x23c   : > { %v2931_v46 = vshrl.u32 %v11540_v15, %v2928_v43  ;;  %v2788_v44 = vmul.f32 %v2787_v19, %v2785_v39  ;;  %v2930_v54 = vshll.u32 %v11536_v55, %v2927_v3  ;;  %v2934_v45 = vshrl.u32 %v11529_v33, %v2928_v43 }
 0x23d   : > { %v2937_v61 = vshrl.u32 %v11530_v42, %v2928_v43  ;;  %v7260_v11 = vmin.u32 %v2875_v50, %v9460_v51  ;;  %v2933_v60 = vshll.u32 %v11540_v15, %v2927_v3  ;;  %v2936_v5 = vshll.u32 %v11529_v33, %v2927_v3 }
 0x23e   : > { %v2940_v52 = vshrl.u32 %v11531_v6, %v2928_v43  ;;  %v2789_v31 = vxor.u32 2147483648, %v2788_v44  ;;  %v9478_v18 = vsel %vm9453_vm2, 0, %v2896_v29  ;;  %v2929_v62 = vshrl.u32 %v11536_v55, %v2928_v43 }
 0x23f   : > { %v2939_v39 = vshll.u32 %v11530_v42, %v2927_v3  ;;  %v2877_v19 = vclz %v7260_v11  ;;  %v2932_v10 = vor.u32 %v2931_v46, %v2930_v54  ;;  %v2935_v58 = vor.u32 %v2934_v45, %v2933_v60 }
 0x240   : > { %v2938_v24 = vor.u32 %v2937_v61, %v2936_v5  ;;  %v2790_v50 = vsel %vm2707_vm10, %v2789_v31, %v2788_v44  ;;  %v2942_v41 = vshll.u32 %v11531_v6, %v2927_v3  ;;  %v2943_v22 = vshrl.u32 %v11532_v53, %v2928_v43 }
 0x241   : > { %v2941_v7 = vor.u32 %v2940_v52, %v2939_v39  ;;  %v2793_v29 = vsel %vm9390_vm8, %v9074_v25, %v2790_v50  ;;  %v7261_v13 = vadd.s32 4294967294, %v2877_v19  ;;  %vm2945_vm3 = vcmp.lt.s32.totalorder %v2926_v2, 1 }
 0x242   : > { %vm2946_vm0 = vcmp.lt.s32.totalorder %v2926_v2, 2  ;;  %7650 = vcosq.f32 %v2793_v29  ;;  %v2944_v11 = vor.u32 %v2943_v22, %v2942_v41  ;;  %vm2947_vm5 = vcmp.lt.s32.totalorder %v2926_v2, 3 }
 0x243   : > { %vm2948_vm15 = vcmp.lt.s32.totalorder %v2926_v2, 4  ;;  %7652 = vsinq.f32 %v2793_v29  ;;  %vm7262_vm13 = vcmp.lt.s32.totalorder %v7261_v13, 0  ;;  %v2949_v44 = vsel %vm2945_vm3, %v2929_v62, %v2932_v10 }
 0x244   : > { %v2950_v46 = vsel %vm2948_vm15, %v2938_v24, 2102212464  ;;  %v2880_v54 = vsel %vm7262_vm13, 0, %v7261_v13  ;;  %v2953_v43 = vsel %vm2945_vm3, %v2932_v10, %v2935_v58  ;;  %v2954_v45 = vsel %vm2948_vm15, %v2941_v7, 920167782 }
 0x245   : > { %v2951_v3 = vsel %vm2947_vm5, %v2935_v58, %v2950_v46  ;;  %v2881_v16 = vsub.s32 32, %v2880_v54  ;;  %v2882_v61 = vshll.u32 %v9460_v51, %v2880_v54  ;;  %v2885_v60 = vsub.s32 4294967266, %v2880_v54 }
 0x246   : > { %v2957_v5 = vsel %vm2945_vm3, %v2935_v58, %v2938_v24  ;;  %v2952_v41 = vsel %vm2946_vm0, %v2949_v44, %v2951_v3  ;;  %v2955_v22 = vsel %vm2947_vm5, %v2938_v24, %v2954_v45  ;;  %v2958_v52 = vsel %vm2948_vm15, %v2944_v11, 1326507024 }
 0x247   : > { %v3029_v31 = vsel %vm3028_vm9, %v3027_v1, 0  ;;  %v2883_v62 = vshrl.u32 %v2865_v34, %v2881_v16  ;;  %v2886_v13 = vadd.s32 127, %v2885_v60  ;;  %v2956_v39 = vsel %vm2946_vm0, %v2953_v43, %v2955_v22 }
 0x248   : > { %v2959_v10 = vsel %vm2947_vm5, %v2941_v7, %v2958_v52  ;;  %v9501_v51 = vmul.u32.u64.low %v9462_v8, %v2956_v39  ;;  %v9502_v50 = vmul.u32.u64.high %v9462_v8, %v2956_v39, %v9501_v51  ;;  %v9505_v58 = vshrl.u32 %v3029_v31, 5 }
 0x249   : > { %v2960_v19 = vsel %vm2946_vm0, %v2957_v5, %v2959_v10  ;;  %v2884_v29 = vor.u32 %v2883_v62, %v2882_v61  ;;  %v2887_v24 = vshll.u32 %v2886_v13, 23  ;;  %vm2797_vm8 = vweird.f32 %v9074_v25 }
 0x24a   : > { %v9508_v11 = vmul.u32.u64.low %v9462_v8, %v2960_v19  ;;  %v9509_v1 = vmul.u32.u64.high %v9462_v8, %v2960_v19, %v9508_v11  ;;  %vm2800_vm10 = vcmp.lt.s32.totalorder %v9449_v21, 2  ;;  %vm2801_vm1 = vcmp.eq.s32.totalorder %v9449_v21, 0 }
 0x24b   : > { %v3031_v7 = vand.u32 31, %v3029_v31  ;;  %vm2804_vm12 = vcmp.eq.s32.totalorder %v9449_v21, 2  ;;  %v2888_v34 = vor.u32 4788187, %v2887_v24  ;;  %v2902_v2 = vadd.s32 3, %v9478_v18 }
 0x24c   : > { %v9518_v44 = vshll.u32 %v3025_v30, 8  ;;  %v9520_v46 = vpop.eup %7650  ;;  %v2891_v54 = vcvt.s32.f32 %v2884_v29  ;;  %v2968_v3 = vmul.u32 %v9462_v8, %v2952_v41  ;;  %v2971_v43 = vadd.s32 1, %v9502_v50 }
 0x24d   : > { %v3032_v45 = vsub.s32 32, %v3031_v7  ;;  %v9524_v16 = vpop.eup %7652  ;;  %v11450_v61 = vxor.u32 2147483648, %v9520_v46  ;;  %v2889_v60 = vand.u32 2147483647, %v2888_v34  ;;  %vm2970_vm14 = vc.u32 %v9509_v1, %v9501_v51 }
 0x24e   : > { %v3034_v49 = vshll.u32 %v11536_v55, %v3031_v7  ;;  %vm3049_vm9 = vcmp.lt.s32.totalorder %v9505_v58, 1  ;;  %v11451_v30 = vxor.u32 2147483648, %v9524_v16  ;;  %v2972_v5 = vsel %vm2970_vm14, %v2971_v43, %v9502_v50 }
 0x24f   : > { %v3035_v8 = vshrl.u32 %v11540_v15, %v3032_v45  ;;  %v3037_v41 = vshll.u32 %v11540_v15, %v3031_v7  ;;  %v2806_v22 = vsel %vm2804_vm12, %v11450_v61, %v9524_v16  ;;  %v2892_v52 = vmul.f32 %v2891_v54, %v2889_v60 }
 0x250   : > { %v2973_v31 = vadd.s32 %v2972_v5, %v2968_v3  ;;  %v3038_v62 = vshrl.u32 %v11529_v33, %v3032_v45  ;;  %v2803_v13 = vsel %vm2801_vm1, %v9520_v46, %v11451_v30  ;;  %v3040_v10 = vshll.u32 %v11529_v33, %v3031_v7 }
 0x251   : > { %v3036_v39 = vor.u32 %v3035_v8, %v3034_v49  ;;  %v3041_v19 = vshrl.u32 %v11530_v42, %v3032_v45  ;;  %v2807_v50 = vsel %vm2800_vm10, %v2803_v13, %v2806_v22  ;;  %v2893_v29 = vxor.u32 2147483648, %v2892_v52 }
 0x252   : > { %v2974_v24 = vadd.s32 536870912, %v2973_v31  ;;  %v3039_v11 = vor.u32 %v3038_v62, %v3037_v41  ;;  %v2808_v34 = vsel %vm2797_vm8, nan, %v2807_v50  ;;  %vm2915_vm3 = vcmp.lt.s32.totalorder %v9200_v47, 0 }
 0x253   : > { %v3042_v54 = vor.u32 %v3041_v19, %v3040_v10  ;;  %v3043_v3 = vshll.u32 %v11530_v42, %v3031_v7  ;;  %v3044_v43 = vshrl.u32 %v11531_v6, %v3032_v45  ;;  %v2894_v60 = vsel %vm2811_vm4, %v2893_v29, %v2892_v52  ;;  %3436 = vst [vmem:[%s8172_s12 + $0xb8] sm:$0xff] %v2808_v34 }
 0x254   : > { %v2975_v49 = vshrl.u32 %v2974_v24, 30  ;;  %v3046_v21 = vshll.u32 %v11531_v6, %v3031_v7  ;;  %v3047_v5 = vshrl.u32 %v11532_v53, %v3032_v45  ;;  %v2897_v8 = vsel %vm9453_vm2, %v9085_v14, %v2894_v60 }
 0x255   : > { %v3045_v41 = vor.u32 %v3044_v43, %v3043_v3  ;;  %vm3050_vm0 = vcmp.lt.s32.totalorder %v9505_v58, 2  ;;  %vm3051_vm5 = vcmp.lt.s32.totalorder %v9505_v58, 3  ;;  %7654 = vcosq.f32 %v2897_v8 }
 0x256   : > { %v2976_v22 = vshll.u32 %v2975_v49, 30  ;;  %v3048_v62 = vor.u32 %v3047_v5, %v3046_v21  ;;  %vm3052_vm4 = vcmp.lt.s32.totalorder %v9505_v58, 4  ;;  %7656 = vsinq.f32 %v2897_v8 }
 0x257   : > { %v3054_v52 = vsel %vm3052_vm4, %v3042_v54, 2102212464  ;;  %v3057_v7 = vsel %vm3049_vm9, %v3036_v39, %v3039_v11  ;;  %v3058_v13 = vsel %vm3052_vm4, %v3045_v41, 920167782  ;;  %v2999_v59 = vsub.s32 4, %v2975_v49 }
 0x258   : > { %v9568_v10 = vsub.s32 %v2973_v31, %v2976_v22  ;;  %v3033_v19 = vshrl.u32 %v11536_v55, %v3032_v45  ;;  %v3059_v50 = vsel %vm3051_vm5, %v3042_v54, %v3058_v13  ;;  %v2903_v29 = vand.u32 3, %v2902_v2 }
 0x259   : > { %v3060_v24 = vsel %vm3050_vm0, %v3057_v7, %v3059_v50  ;;  %v3061_v34 = vsel %vm3049_vm9, %v3039_v11, %v3042_v54  ;;  %v3062_v3 = vsel %vm3052_vm4, %v3048_v62, 1326507024  ;;  %v3055_v60 = vsel %vm3051_vm5, %v3039_v11, %v3054_v52 }
 0x25a   : > { %v2979_v43 = vsub.s32 0, %v9568_v10  ;;  %v3053_v31 = vsel %vm3049_vm9, %v3033_v19, %v3036_v39  ;;  %v3063_v45 = vsel %vm3051_vm5, %v3045_v41, %v3062_v3  ;;  %v3124_v54 = vand.u32 2139095040, %v9436_v4 }
 0x25b   : > { %v3064_v2 = vsel %vm3050_vm0, %v3061_v34, %v3063_v45  ;;  %v9587_v21 = vmul.u32.u64.low %v9518_v44, %v3060_v24  ;;  %v9588_v5 = vmul.u32.u64.high %v9518_v44, %v3060_v24, %v9587_v21  ;;  %v3000_v39 = vsel %vm2915_vm3, %v2999_v59, %v2975_v49 }
 0x25c   : > { %v7264_v8 = vmin.u32 %v2979_v43, %v9568_v10  ;;  %v9595_v22 = vmul.u32.u64.low %v9518_v44, %v3064_v2  ;;  %v9596_v11 = vmul.u32.u64.high %v9518_v44, %v3064_v2, %v9595_v22  ;;  %vm2901_vm2 = vweird.f32 %v9085_v14 }
 0x25d   : > { %v3056_v41 = vsel %vm3050_vm0, %v3053_v31, %v3055_v60  ;;  %v11452_v62 = vand.u32 2147483647, %v9436_v4  ;;  %v3125_v52 = vshrl.u32 %v3124_v54, 23  ;;  %vm2904_vm15 = vcmp.lt.s32.totalorder %v2903_v29, 2 }
 0x25e   : > { %vm2905_vm13 = vcmp.eq.s32.totalorder %v2903_v29, 0  ;;  %v11582_v7 = vand.u32 2147483647, %v9200_v47  ;;  %v2981_v49 = vclz %v7264_v8  ;;  %vm2908_vm1 = vcmp.eq.s32.totalorder %v2903_v29, 2 }
 0x25f   : > { %v3075_v58 = vadd.s32 1, %v9588_v5  ;;  %v7271_v19 = vadd.s32 4294967169, %v3125_v52  ;;  %v9613_v50 = vpop.eup %7654  ;;  %v2969_v24 = vadd.s32 %v9501_v51, %v9509_v1  ;;  %v3072_v3 = vmul.u32 %v9518_v44, %v3056_v41 }
 0x260   : > { %vm9604_vm10 = vcmp.le.f32.partialorder %v11582_v7, 0.7853982  ;;  %11586 = vst [vmem:[#allocation7_spill] sm:$0xff] %v9613_v50  ;;  %v7265_v34 = vadd.s32 4294967294, %v2981_v49  ;;  %vm3074_vm12 = vc.u32 %v9596_v11, %v9587_v21  ;;  %v9619_v43 = vpop.eup %7656  ;;  %v11449_v31 = vxor.u32 2147483648, %v9613_v50 }
 0x261   : > { %v9610_v59 = vsel %vm9604_vm10, 0, %v3000_v39  ;;  %v3076_v60 = vsel %vm3074_vm12, %v3075_v58, %v9588_v5  ;;  %v3128_v45 = vand.u32 8388607, %v11452_v62  ;;  %v3131_v2 = vadd.s32 1, %v7271_v19 }
 0x262   : > { %11585 = vst [vmem:[#allocation9_spill] sm:$0xff] %v9610_v59  ;;  %v11453_v54 = vxor.u32 2147483648, %v9619_v43  ;;  %vm7266_vm14 = vcmp.lt.s32.totalorder %v7265_v34, 0  ;;  %v3006_v51 = vadd.s32 3, %v9610_v59  ;;  %v3077_v1 = vadd.s32 %v3076_v60, %v3072_v3 }
 0x263   : > { %v2910_v44 = vsel %vm2908_vm1, %v11449_v31, %v9619_v43  ;;  %v2984_v8 = vsel %vm7266_vm14, 0, %v7265_v34  ;;  %vm3132_vm9 = vcmp.gt.s32.totalorder %v3131_v2, 0  ;;  %v3228_v39 = vand.u32 2139095040, %v9443_v32 }
 0x264   : > { %v2907_v5 = vsel %vm2905_vm13, %v9613_v50, %v11453_v54  ;;  %v2985_v22 = vsub.s32 32, %v2984_v8  ;;  %v2989_v41 = vsub.s32 4294967266, %v2984_v8  ;;  %v11454_v52 = vand.u32 2147483647, %v9443_v32 }
 0x265   : > { %v2911_v7 = vsel %vm2904_vm15, %v2907_v5, %v2910_v44  ;;  %v3078_v49 = vadd.s32 536870912, %v3077_v1  ;;  %v3129_v58 = vor.u32 8388608, %v3128_v45  ;;  %v3133_v19 = vsel %vm3132_vm9, %v3131_v2, 0 }
 0x266   : > { %v2912_v34 = vsel %vm2901_vm2, nan, %v2911_v7  ;;  %v2986_v3 = vshll.u32 %v9568_v10, %v2984_v8  ;;  %v2987_v60 = vshrl.u32 %v2969_v24, %v2985_v22  ;;  %v2990_v31 = vadd.s32 127, %v2989_v41 }
 0x267   : > { %v3079_v61 = vshrl.u32 %v3078_v49, 30  ;;  %v3135_v30 = vand.u32 31, %v3133_v19  ;;  %v3229_v62 = vshrl.u32 %v3228_v39, 23  ;;  %3437 = vst [vmem:[%s8172_s12 + $0xc0] sm:$0xff] %v2912_v34  ;;  %vm3019_vm0 = vcmp.lt.s32.totalorder %v9204_v56, 0 }
 0x268   : > { %v2988_v54 = vor.u32 %v2987_v60, %v2986_v3  ;;  %v2991_v40 = vshll.u32 %v2990_v31, 23  ;;  %v9643_v29 = vand.u32 3, %v3006_v51  ;;  %v11587_v45 = vand.u32 2147483647, %v9204_v56 }
 0x269   : > { %v3073_v10 = vadd.s32 %v9587_v21, %v9596_v11  ;;  %v3080_v24 = vshll.u32 %v3079_v61, 30  ;;  %v3136_v44 = vsub.s32 32, %v3135_v30  ;;  %v3103_v5 = vsub.s32 4, %v3079_v61 }
 0x26a   : > { %vm9647_vm5 = vcmp.le.f32.partialorder %v11587_v45, 0.7853982  ;;  %v2992_v8 = vor.u32 4788187, %v2991_v40  ;;  %v9652_v39 = vshll.u32 %v3129_v58, 8  ;;  %v3134_v22 = vshrl.u32 %v3133_v19, 5 }
 0x26b   : > { %v9656_v31 = vand.u32 8388607, %v11454_v52  ;;  %v9658_v51 = vsub.s32 %v3077_v1, %v3080_v24  ;;  %v3139_v41 = vshrl.u32 %v11540_v15, %v3136_v44  ;;  %v7275_v7 = vadd.s32 4294967169, %v3229_v62 }
 0x26c   : > { %v2993_v49 = vand.u32 2147483647, %v2992_v8  ;;  %v2995_v34 = vcvt.s32.f32 %v2988_v54  ;;  %v3142_v21 = vshrl.u32 %v11529_v33, %v3136_v44  ;;  %v3145_v11 = vshrl.u32 %v11530_v42, %v3136_v44 }
 0x26d   : > { %v3083_v40 = vsub.s32 0, %v9658_v51  ;;  %v3138_v58 = vshll.u32 %v11536_v55, %v3135_v30  ;;  %v3141_v3 = vshll.u32 %v11540_v15, %v3135_v30  ;;  %v3144_v60 = vshll.u32 %v11529_v33, %v3135_v30 }
 0x26e   : > { %v2996_v1 = vmul.f32 %v2995_v34, %v2993_v49  ;;  %v3104_v19 = vsel %vm3019_vm0, %v3103_v5, %v3079_v61  ;;  %v3147_v62 = vshll.u32 %v11530_v42, %v3135_v30  ;;  %v3148_v54 = vshrl.u32 %v11531_v6, %v3136_v44 }
 0x26f   : > { %v7268_v45 = vmin.u32 %v3083_v40, %v9658_v51  ;;  %v3140_v24 = vor.u32 %v3139_v41, %v3138_v58  ;;  %v3143_v8 = vor.u32 %v3142_v21, %v3141_v3  ;;  %v3151_v52 = vshrl.u32 %v11532_v53, %v3136_v44 }
 0x270   : > { %v2997_v23 = vxor.u32 2147483648, %v2996_v1  ;;  %v3146_v14 = vor.u32 %v3145_v11, %v3144_v60  ;;  %v3149_v59 = vor.u32 %v3148_v54, %v3147_v62  ;;  %v3150_v25 = vshll.u32 %v11531_v6, %v3135_v30 }
 0x271   : > { %v3085_v50 = vclz %v7268_v45  ;;  %v3137_v49 = vshrl.u32 %v11536_v55, %v3136_v44  ;;  %vm3153_vm4 = vcmp.lt.s32.totalorder %v3134_v22, 1  ;;  %vm3154_vm15 = vcmp.lt.s32.totalorder %v3134_v22, 2 }
 0x272   : > { %v2998_v61 = vsel %vm2915_vm3, %v2997_v23, %v2996_v1  ;;  %v9679_v5 = vsel %vm9647_vm5, 0, %v3104_v19  ;;  %v3152_v41 = vor.u32 %v3151_v52, %v3150_v25  ;;  %vm3155_vm13 = vcmp.lt.s32.totalorder %v3134_v22, 3 }
 0x273   : > { %v3001_v34 = vsel %vm9604_vm10, %v9200_v47, %v2998_v61  ;;  %v7269_v21 = vadd.s32 4294967294, %v3085_v50  ;;  %vm3156_vm1 = vcmp.lt.s32.totalorder %v3134_v22, 4  ;;  %v3161_v30 = vsel %vm3153_vm4, %v3140_v24, %v3143_v8 }
 0x274   : > { %7658 = vcosq.f32 %v3001_v34  ;;  %v3158_v44 = vsel %vm3156_vm1, %v3146_v14, 2102212464  ;;  %v3162_v11 = vsel %vm3156_vm1, %v3149_v59, 920167782  ;;  %v3165_v40 = vsel %vm3153_vm4, %v3143_v8, %v3146_v14 }
 0x275   : > { %7660 = vsinq.f32 %v3001_v34  ;;  %vm7270_vm3 = vcmp.lt.s32.totalorder %v7269_v21, 0  ;;  %v3163_v23 = vsel %vm3155_vm13, %v3146_v14, %v3162_v11  ;;  %v3166_v58 = vsel %vm3156_vm1, %v3152_v41, 1326507024 }
 0x276   : > { %v3088_v25 = vsel %vm7270_vm3, 0, %v7269_v21  ;;  %v3157_v52 = vsel %vm3153_vm4, %v3137_v49, %v3140_v24  ;;  %v3164_v13 = vsel %vm3154_vm15, %v3161_v30, %v3163_v23  ;;  %v3167_v50 = vsel %vm3155_vm13, %v3149_v59, %v3166_v58 }
 0x277   : > { %v3089_v3 = vsub.s32 32, %v3088_v25  ;;  %v3093_v60 = vsub.s32 4294967266, %v3088_v25  ;;  %v3159_v1 = vsel %vm3155_vm13, %v3143_v8, %v3158_v44  ;;  %v3168_v19 = vsel %vm3154_vm15, %v3165_v40, %v3167_v50 }
 0x278   : > { %v9693_v62 = vmul.u32.u64.low %v9652_v39, %v3168_v19  ;;  %v9694_v54 = vmul.u32.u64.high %v9652_v39, %v3168_v19, %v9693_v62  ;;  %v9697_v14 = vmul.u32.u64.low %v9652_v39, %v3164_v13  ;;  %v9698_v45 = vmul.u32.u64.high %v9652_v39, %v3164_v13, %v9697_v14 }
 0x279   : > { %v3090_v24 = vshll.u32 %v9658_v51, %v3088_v25  ;;  %v3091_v49 = vshrl.u32 %v3073_v10, %v3089_v3  ;;  %v3094_v61 = vadd.s32 127, %v3093_v60  ;;  %v3235_v59 = vadd.s32 1, %v7275_v7 }
 0x27a   : > { %v9704_v41 = vmul.f32 %v8924_v28, %v9429_v26  ;;  %v3110_v8 = vadd.s32 3, %v9679_v5  ;;  %v3160_v34 = vsel %vm3154_vm15, %v3157_v52, %v3159_v1  ;;  %v3233_v21 = vor.u32 8388608, %v9656_v31 }
 0x27b   : > { %vm3005_vm10 = vweird.f32 %v9200_v47  ;;  %vm3008_vm12 = vcmp.lt.s32.totalorder %v9643_v29, 2  ;;  %v3092_v30 = vor.u32 %v3091_v49, %v3090_v24  ;;  %v3095_v44 = vshll.u32 %v3094_v61, 23 }
 0x27c   : > { %vm3236_vm14 = vcmp.gt.s32.totalorder %v3235_v59, 0  ;;  %vm3009_vm9 = vcmp.eq.s32.totalorder %v9643_v29, 0  ;;  %vm3178_vm4 = vc.u32 %v9694_v54, %v9697_v14  ;;  %v3179_v28 = vadd.s32 1, %v9698_v45 }
 0x27d   : > { %v3237_v26 = vsel %vm3236_vm14, %v3235_v59, 0  ;;  %vm3012_vm13 = vcmp.eq.s32.totalorder %v9643_v29, 2  ;;  %v3096_v10 = vor.u32 4788187, %v3095_v44  ;;  %v3176_v31 = vmul.u32 %v9652_v39, %v3160_v34 }
 0x27e   : > { %v3239_v51 = vand.u32 31, %v3237_v26  ;;  %v9717_v22 = vpop.eup %7658  ;;  %v3099_v7 = vcvt.s32.f32 %v3092_v30  ;;  %v9719_v11 = vand.u32 3, %v3110_v8  ;;  %v3180_v40 = vsel %vm3178_vm4, %v3179_v28, %v9698_v45 }
 0x27f   : > { %v9722_v23 = vshll.u32 %v3233_v21, 8  ;;  %v9724_v58 = vpop.eup %7660  ;;  %v11460_v25 = vxor.u32 2147483648, %v9717_v22  ;;  %v3097_v52 = vand.u32 2147483647, %v3096_v10  ;;  %v3181_v13 = vadd.s32 %v3180_v40, %v3176_v31 }
 0x280   : > { %v3240_v50 = vsub.s32 32, %v3239_v51  ;;  %v11464_v3 = vxor.u32 2147483648, %v9724_v58  ;;  %vm3123_vm15 = vcmp.lt.s32.totalorder %v9436_v4, 0  ;;  %v9729_v39 = vshrl.u32 %v3237_v26, 5 }
 0x281   : > { %v3242_v60 = vshll.u32 %v11536_v55, %v3239_v51  ;;  %v3332_v1 = vand.u32 2139095040, %v9704_v41  ;;  %v3014_v19 = vsel %vm3012_vm13, %v11460_v25, %v9724_v58  ;;  %v3100_v62 = vmul.f32 %v3099_v7, %v3097_v52 }
 0x282   : > { %v3182_v45 = vadd.s32 536870912, %v3181_v13  ;;  %v3245_v24 = vshll.u32 %v11540_v15, %v3239_v51  ;;  %v3011_v49 = vsel %vm3009_vm9, %v9717_v22, %v11464_v3  ;;  %v3243_v61 = vshrl.u32 %v11540_v15, %v3240_v50 }
 0x283   : > { %v3246_v59 = vshrl.u32 %v11529_v33, %v3240_v50  ;;  %v3249_v8 = vshrl.u32 %v11530_v42, %v3240_v50  ;;  %v3015_v34 = vsel %vm3008_vm12, %v3011_v49, %v3014_v19  ;;  %v3101_v21 = vxor.u32 2147483648, %v3100_v62 }
 0x284   : > { %v3183_v30 = vshrl.u32 %v3182_v45, 30  ;;  %v3248_v44 = vshll.u32 %v11529_v33, %v3239_v51  ;;  %v3016_v28 = vsel %vm3005_vm10, nan, %v3015_v34  ;;  %v3244_v26 = vor.u32 %v3243_v61, %v3242_v60 }
 0x285   : > { %v3247_v10 = vor.u32 %v3246_v59, %v3245_v24  ;;  %v3251_v31 = vshll.u32 %v11530_v42, %v3239_v51  ;;  %v3102_v7 = vsel %vm3019_vm0, %v3101_v21, %v3100_v62  ;;  %v3252_v25 = vshrl.u32 %v11531_v6, %v3240_v50  ;;  %3438 = vst [vmem:[%s8172_s12 + $0xc8] sm:$0xff] %v3016_v28 }
 0x286   : > { %v3184_v40 = vshll.u32 %v3183_v30, 30  ;;  %v3207_v52 = vsub.s32 4, %v3183_v30  ;;  %v3105_v29 = vsel %vm9647_vm5, %v9204_v56, %v3102_v7  ;;  %v3250_v19 = vor.u32 %v3249_v8, %v3248_v44 }
 0x287   : > { %v3254_v45 = vshll.u32 %v11531_v6, %v3239_v51  ;;  %v3255_v60 = vshrl.u32 %v11532_v53, %v3240_v50  ;;  %7662 = vcosq.f32 %v3105_v29  ;;  %v3253_v49 = vor.u32 %v3252_v25, %v3251_v31 }
 0x288   : > { %v9762_v24 = vsub.s32 %v3181_v13, %v3184_v40  ;;  %v11461_v62 = vand.u32 2147483647, %v9704_v41  ;;  %7664 = vsinq.f32 %v3105_v29  ;;  %v3241_v61 = vshrl.u32 %v11536_v55, %v3240_v50 }
 0x289   : > { %v3256_v59 = vor.u32 %v3255_v60, %v3254_v45  ;;  %v3333_v34 = vshrl.u32 %v3332_v1, 23  ;;  %v3208_v2 = vsel %vm3123_vm15, %v3207_v52, %v3183_v30  ;;  %vm3257_vm0 = vcmp.lt.s32.totalorder %v9729_v39, 1 }
 0x28a   : > { %v3187_v21 = vsub.s32 0, %v9762_v24  ;;  %vm3260_vm5 = vcmp.lt.s32.totalorder %v9729_v39, 4  ;;  %vm3259_vm1 = vcmp.lt.s32.totalorder %v9729_v39, 3  ;;  %v3265_v25 = vsel %vm3257_vm0, %v3244_v26, %v3247_v10 }
 0x28b   : > { %v3262_v51 = vsel %vm3260_vm5, %v3250_v19, 2102212464  ;;  %v3266_v13 = vsel %vm3260_vm5, %v3253_v49, 920167782  ;;  %vm3258_vm3 = vcmp.lt.s32.totalorder %v9729_v39, 2  ;;  %v3261_v50 = vsel %vm3257_vm0, %v3241_v61, %v3244_v26 }
 0x28c   : > { %v7272_v8 = vmin.u32 %v3187_v21, %v9762_v24  ;;  %v3267_v1 = vsel %vm3259_vm1, %v3250_v19, %v3266_v13  ;;  %v3263_v30 = vsel %vm3259_vm1, %v3247_v10, %v3262_v51  ;;  %v3269_v28 = vsel %vm3257_vm0, %v3247_v10, %v3250_v19 }
 0x28d   : > { %v3268_v44 = vsel %vm3258_vm3, %v3265_v25, %v3267_v1  ;;  %v3270_v31 = vsel %vm3260_vm5, %v3256_v59, 1326507024  ;;  %vm3112_vm12 = vcmp.lt.s32.totalorder %v9719_v11, 2  ;;  %v11590_v7 = vand.u32 2147483647, %v9436_v4 }
 0x28e   : > { %v3189_v26 = vclz %v7272_v8  ;;  %v3336_v52 = vand.u32 8388607, %v11461_v62  ;;  %vm3109_vm9 = vweird.f32 %v9204_v56  ;;  %v3271_v10 = vsel %vm3259_vm1, %v3253_v49, %v3270_v31 }
 0x28f   : > { %vm9783_vm14 = vcmp.le.f32.partialorder %v11590_v7, 0.7853982  ;;  %v9797_v19 = vmul.u32.u64.low %v9722_v23, %v3268_v44  ;;  %v9798_v45 = vmul.u32.u64.high %v9722_v23, %v3268_v44, %v9797_v19  ;;  %v3264_v61 = vsel %vm3258_vm3, %v3261_v50, %v3263_v30 }
 0x290   : > { %v9792_v29 = vsel %vm9783_vm14, 0, %v3208_v2  ;;  %v7273_v60 = vadd.s32 4294967294, %v3189_v26  ;;  %v3272_v59 = vsel %vm3258_vm3, %v3269_v28, %v3271_v10  ;;  %v7279_v21 = vadd.s32 4294967169, %v3333_v34 }
 0x291   : > { %vm3113_vm4 = vcmp.eq.s32.totalorder %v9719_v11, 0  ;;  %vm3116_vm13 = vcmp.eq.s32.totalorder %v9719_v11, 2  ;;  %v9807_v2 = vmul.u32.u64.low %v9722_v23, %v3272_v59  ;;  %v9808_v51 = vmul.u32.u64.high %v9722_v23, %v3272_v59, %v9807_v2  ;;  %v9810_v49 = vpop.eup %7662 }
 0x292   : > { %v3177_v25 = vadd.s32 %v9697_v14, %v9694_v54  ;;  %vm7274_vm0 = vcmp.lt.s32.totalorder %v7273_v60, 0  ;;  %v3214_v13 = vadd.s32 3, %v9792_v29  ;;  %v3339_v8 = vadd.s32 1, %v7279_v21  ;;  %v9815_v39 = vpop.eup %7664 }
 0x293   : > { %v11462_v34 = vxor.u32 2147483648, %v9810_v49  ;;  %v3192_v50 = vsel %vm7274_vm0, 0, %v7273_v60  ;;  %v3280_v1 = vmul.u32 %v9722_v23, %v3264_v61  ;;  %v3283_v30 = vadd.s32 1, %v9798_v45 }
 0x294   : > { %v11463_v44 = vxor.u32 2147483648, %v9815_v39  ;;  %v3193_v28 = vsub.s32 32, %v3192_v50  ;;  %v3197_v31 = vsub.s32 4294967266, %v3192_v50  ;;  %v3337_v7 = vor.u32 8388608, %v3336_v52 }
 0x295   : > { %v3118_v54 = vsel %vm3116_vm13, %v11462_v34, %v9815_v39  ;;  %v3194_v14 = vshll.u32 %v9762_v24, %v3192_v50  ;;  %vm3282_vm5 = vc.u32 %v9808_v51, %v9797_v19  ;;  %vm3340_vm1 = vcmp.gt.s32.totalorder %v3339_v8, 0 }
 0x296   : > { %v3115_v23 = vsel %vm3113_vm4, %v9810_v49, %v11463_v44  ;;  %v3195_v26 = vshrl.u32 %v3177_v25, %v3193_v28  ;;  %v3198_v52 = vadd.s32 127, %v3197_v31  ;;  %v3284_v10 = vsel %vm3282_vm5, %v3283_v30, %v9798_v45 }
 0x297   : > { %v3119_v60 = vsel %vm3112_vm12, %v3115_v23, %v3118_v54  ;;  %v3285_v61 = vadd.s32 %v3284_v10, %v3280_v1  ;;  %v3341_v59 = vsel %vm3340_vm1, %v3339_v8, 0  ;;  %v9837_v24 = vand.u32 3, %v9145_v63 }
 0x298   : > { %v3120_v21 = vsel %vm3109_vm9, nan, %v3119_v60  ;;  %v3196_v2 = vor.u32 %v3195_v26, %v3194_v14  ;;  %v3199_v50 = vshll.u32 %v3198_v52, 23  ;;  %v9841_v62 = vshrl.u32 %v3341_v59, 5 }
 0x299   : > { %v3286_v34 = vadd.s32 536870912, %v3285_v61  ;;  %v3343_v25 = vand.u32 31, %v3341_v59  ;;  %3439 = vst [vmem:[%s8172_s12 + $0xd0] sm:$0xff] %v3120_v21  ;;  %v9844_v45 = vand.u32 3, %v3214_v13  ;;  %v9846_v11 = vshll.u32 %v3337_v7, 8 }
 0x29a   : > { %v3200_v28 = vor.u32 4788187, %v3199_v50  ;;  %v9849_v8 = vand.u32 3, %v9171_v9  ;;  %v9852_v63 = vadd.s32 %v9797_v19, %v9808_v51  ;;  %v9855_v31 = vand.u32 3, %v9333_v37 }
 0x29b   : > { %v3287_v1 = vshrl.u32 %v3286_v34, 30  ;;  %v3344_v30 = vsub.s32 32, %v3343_v25  ;;  %v3203_v14 = vcvt.s32.f32 %v3196_v2  ;;  %v3346_v23 = vshll.u32 %v11536_v55, %v3343_v25 }
 0x29c   : > { %v3201_v54 = vand.u32 2147483647, %v3200_v28  ;;  %vm3361_vm3 = vcmp.lt.s32.totalorder %v9841_v62, 1  ;;  %vm3538_vm12 = vcmp.eq.s32.totalorder %v9837_v24, 0  ;;  %v3349_v7 = vshll.u32 %v11540_v15, %v3343_v25 }
 0x29d   : > { %v3288_v13 = vshll.u32 %v3287_v1, 30  ;;  %v3347_v9 = vshrl.u32 %v11540_v15, %v3344_v30  ;;  %v3352_v19 = vshll.u32 %v11529_v33, %v3343_v25  ;;  %vm3227_vm4 = vcmp.lt.s32.totalorder %v9443_v32, 0 }
 0x29e   : > { %v3204_v51 = vmul.f32 %v3203_v14, %v3201_v54  ;;  %v3350_v37 = vshrl.u32 %v11529_v33, %v3344_v30  ;;  %v3353_v34 = vshrl.u32 %v11530_v42, %v3344_v30  ;;  %v3356_v26 = vshrl.u32 %v11531_v6, %v3344_v30 }
 0x29f   : > { %v9867_v52 = vsub.s32 %v3285_v61, %v3288_v13  ;;  %v3348_v10 = vor.u32 %v3347_v9, %v3346_v23  ;;  %v3355_v60 = vshll.u32 %v11530_v42, %v3343_v25  ;;  %v3359_v59 = vshrl.u32 %v11532_v53, %v3344_v30 }
 0x2a0   : > { %v3205_v21 = vxor.u32 2147483648, %v3204_v51  ;;  %v3351_v2 = vor.u32 %v3350_v37, %v3349_v7  ;;  %v3354_v50 = vor.u32 %v3353_v34, %v3352_v19  ;;  %v3358_v28 = vshll.u32 %v11531_v6, %v3343_v25 }
 0x2a1   : > { %vm3537_vm13 = vcmp.lt.s32.totalorder %v9837_v24, 2  ;;  %v3291_v54 = vsub.s32 0, %v9867_v52  ;;  %v3311_v14 = vsub.s32 4, %v3287_v1  ;;  %v3345_v44 = vshrl.u32 %v11536_v55, %v3344_v30 }
 0x2a2   : > { %v3357_v3 = vor.u32 %v3356_v26, %v3355_v60  ;;  %v3206_v61 = vsel %vm3123_vm15, %v3205_v21, %v3204_v51  ;;  %v3360_v23 = vor.u32 %v3359_v59, %v3358_v28  ;;  %vm3363_vm0 = vcmp.lt.s32.totalorder %v9841_v62, 3 }
 0x2a3   : > { %vm3364_vm5 = vcmp.lt.s32.totalorder %v9841_v62, 4  ;;  %v3209_v25 = vsel %vm9783_vm14, %v9436_v4, %v3206_v61  ;;  %v7276_v13 = vmin.u32 %v3291_v54, %v9867_v52  ;;  %v3365_v9 = vsel %vm3361_vm3, %v3345_v44, %v3348_v10 }
 0x2a4   : > { %v3366_v30 = vsel %vm3364_vm5, %v3354_v50, 2102212464  ;;  %7666 = vcosq.f32 %v3209_v25  ;;  %v3369_v19 = vsel %vm3361_vm3, %v3348_v10, %v3351_v2  ;;  %v3370_v51 = vsel %vm3364_vm5, %v3357_v3, 920167782 }
 0x2a5   : > { %v3367_v7 = vsel %vm3363_vm0, %v3351_v2, %v3366_v30  ;;  %7668 = vsinq.f32 %v3209_v25  ;;  %v3293_v40 = vclz %v7276_v13  ;;  %vm3362_vm15 = vcmp.lt.s32.totalorder %v9841_v62, 2 }
 0x2a6   : > { %v11593_v37 = vxor.u32 2147483648, %v9237_v48  ;;  %v3368_v34 = vsel %vm3362_vm15, %v3365_v9, %v3367_v7  ;;  %v3371_v26 = vsel %vm3363_vm0, %v3354_v50, %v3370_v51  ;;  %v3373_v10 = vsel %vm3361_vm3, %v3351_v2, %v3354_v50 }
 0x2a7   : > { %vm3541_vm14 = vcmp.eq.s32.totalorder %v9837_v24, 2  ;;  %v7277_v60 = vadd.s32 4294967294, %v3293_v40  ;;  %v9908_v59 = vsel %vm3227_vm4, %v3311_v14, %v3287_v1  ;;  %v3372_v21 = vsel %vm3362_vm15, %v3369_v19, %v3371_v26 }
 0x2a8   : > { %v3540_v44 = vsel %vm3538_vm12, %v9230_v27, %v11593_v37  ;;  %v3374_v28 = vsel %vm3364_vm5, %v3360_v23, 1326507024  ;;  %vm3220_vm1 = vcmp.eq.s32.totalorder %v9844_v45, 2  ;;  %v11594_v1 = vxor.u32 2147483648, %v9230_v27 }
 0x2a9   : > { %v3375_v54 = vsel %vm3363_vm0, %v3357_v3, %v3374_v28  ;;  %v9918_v2 = vmul.u32.u64.low %v9846_v11, %v3372_v21  ;;  %v9919_v50 = vmul.u32.u64.high %v9846_v11, %v3372_v21, %v9918_v2  ;;  %vm3217_vm3 = vcmp.eq.s32.totalorder %v9844_v45, 0 }
 0x2aa   : > { %v3543_v14 = vsel %vm3541_vm14, %v11594_v1, %v9237_v48  ;;  %vm7278_vm12 = vcmp.lt.s32.totalorder %v7277_v60, 0  ;;  %v3376_v61 = vsel %vm3362_vm15, %v3373_v10, %v3375_v54  ;;  %v3384_v23 = vmul.u32 %v9846_v11, %v3368_v34 }
 0x2ab   : > { %v3544_v3 = vsel %vm3537_vm13, %v3540_v44, %v3543_v14  ;;  %vm3216_vm0 = vcmp.lt.s32.totalorder %v9844_v45, 2  ;;  %v3296_v25 = vsel %vm7278_vm12, 0, %v7277_v60  ;;  %vm3213_vm5 = vweird.f32 %v9436_v4  ;;  %v11615_v4 = vld [vmem:[#allocation6_spill] sm:$0xff] }
 0x2ac   : > { %v9933_v13 = vmul.u32.u64.low %v9846_v11, %v3376_v61  ;;  %v9934_v9 = vmul.u32.u64.high %v9846_v11, %v3376_v61, %v9933_v13  ;;  %v3545_v27 = vsel %vm2485_vm11, nan, %v3544_v3  ;;  %v3297_v48 = vsub.s32 32, %v3296_v25 }
 0x2ad   : > { %v3301_v62 = vsub.s32 4294967266, %v3296_v25  ;;  %vm3640_vm15 = vcmp.lt.s32.totalorder %v9849_v8, 2  ;;  %vm3641_vm14 = vcmp.eq.s32.totalorder %v9849_v8, 0  ;;  %4473 = vst [vmem:[%s8172_s12 + $0xf0] sm:$0xff] %v3545_v27  ;;  %v3298_v24 = vshll.u32 %v9867_v52, %v3296_v25 }
 0x2ae   : > { %v3387_v30 = vadd.s32 1, %v9919_v50  ;;  %v11595_v7 = vxor.u32 2147483648, %v9322_v57  ;;  %vm3644_vm13 = vcmp.eq.s32.totalorder %v9849_v8, 2  ;;  %v3299_v36 = vshrl.u32 %v9852_v63, %v3297_v48  ;;  %v9953_v37 = vpop.eup %7666 }
 0x2af   : > { %v3302_v19 = vadd.s32 127, %v3301_v62  ;;  %v11596_v51 = vxor.u32 2147483648, %v9314_v38  ;;  %vm3744_vm11 = vcmp.eq.s32.totalorder %v9855_v31, 0  ;;  %vm3386_vm12 = vc.u32 %v9934_v9, %v9918_v2  ;;  %v9961_v44 = vpop.eup %7668 }
 0x2b0   : > { %v3643_v11 = vsel %vm3641_vm14, %v9314_v38, %v11595_v7  ;;  %vm3743_vm14 = vcmp.lt.s32.totalorder %v9855_v31, 2  ;;  %v11597_v8 = vxor.u32 2147483648, %v9404_v17  ;;  %v3221_v38 = vxor.u32 2147483648, %v9953_v37 }
 0x2b1   : > { %v3646_v40 = vsel %vm3644_vm13, %v11596_v51, %v9322_v57  ;;  %v3300_v57 = vor.u32 %v3299_v36, %v3298_v24  ;;  %v3303_v34 = vshll.u32 %v3302_v19, 23  ;;  %v3388_v26 = vsel %vm3386_vm12, %v3387_v30, %v9919_v50 }
 0x2b2   : > { %v3647_v52 = vsel %vm3640_vm15, %v3643_v11, %v3646_v40  ;;  %v3746_v63 = vsel %vm3744_vm11, %v9398_v20, %v11597_v8  ;;  %v3218_v10 = vxor.u32 2147483648, %v9961_v44  ;;  %v3389_v60 = vadd.s32 %v3388_v26, %v3384_v23 }
 0x2b3   : > { %v3648_v21 = vsel %vm2589_vm7, nan, %v3647_v52  ;;  %vm3747_vm15 = vcmp.eq.s32.totalorder %v9855_v31, 2  ;;  %v3222_v28 = vsel %vm3220_vm1, %v3221_v38, %v9961_v44  ;;  %v3304_v54 = vor.u32 4788187, %v3303_v34  ;;  %v11608_v34 = vld [vmem:[#allocation9_spill] sm:$0xff] }
 0x2b4   : > { %v3307_v1 = vcvt.s32.f32 %v3300_v57  ;;  %v11598_v50 = vxor.u32 2147483648, %v9398_v20  ;;  %4474 = vst [vmem:[%s8172_s12 + $0xf8] sm:$0xff] %v3648_v21  ;;  %v3219_v0 = vsel %vm3217_vm3, %v9953_v37, %v3218_v10  ;;  %v3390_v61 = vadd.s32 536870912, %v3389_v60 }
 0x2b5   : > { %v3845_v3 = vand.u32 3, %v9418_v12  ;;  %v3223_v25 = vsel %vm3216_vm0, %v3219_v0, %v3222_v28  ;;  %v3305_v13 = vand.u32 2147483647, %v3304_v54  ;;  %v11599_v48 = vand.u32 2147483647, %v9443_v32 }
 0x2b6   : > { %v3749_v14 = vsel %vm3747_vm15, %v11598_v50, %v9404_v17  ;;  %v3948_v17 = vand.u32 3, %v9478_v18  ;;  %v3224_v27 = vsel %vm3213_vm5, nan, %v3223_v25  ;;  %v9999_v31 = vshrl.u32 %v3390_v61, 30 }
 0x2b7   : > { %v3750_v23 = vsel %vm3743_vm14, %v3746_v63, %v3749_v14  ;;  %vm9995_vm7 = vcmp.le.f32.partialorder %v11599_v48, 0.7853982  ;;  %vm3847_vm1 = vcmp.eq.s32.totalorder %v3845_v3, 0  ;;  %v3308_v12 = vmul.f32 %v3307_v1, %v3305_v13  ;;  %3440 = vst [vmem:[%s8172_s12 + $0xd8] sm:$0xff] %v3224_v27 }
 0x2b8   : > { %v3751_v20 = vsel %vm2693_vm6, nan, %v3750_v23  ;;  %v3314_v35 = vsel %vm9995_vm7, 0, %v9908_v59  ;;  %v11602_v18 = vxor.u32 2147483648, %v9524_v16  ;;  %vm3850_vm6 = vcmp.eq.s32.totalorder %v3845_v3, 2  ;;  %v11605_v59 = vld [vmem:[#allocation7_spill] sm:$0xff] }
 0x2b9   : > { %4475 = vst [vmem:[%s8172_s12 + $0x100] sm:$0xff] %v3751_v20  ;;  %v3392_v24 = vshll.u32 %v9999_v31, 30  ;;  %vm3846_vm3 = vcmp.lt.s32.totalorder %v3845_v3, 2  ;;  %v11603_v30 = vxor.u32 2147483648, %v9520_v46  ;;  %vm3950_vm0 = vcmp.eq.s32.totalorder %v3948_v17, 0 }
 0x2ba   : > { %v3849_v45 = vsel %vm3847_vm1, %v9520_v46, %v11602_v18  ;;  %v3309_v11 = vxor.u32 2147483648, %v3308_v12  ;;  %v11604_v19 = vxor.u32 2147483648, %v9619_v43  ;;  %vm3953_vm13 = vcmp.eq.s32.totalorder %v3948_v17, 2 }
 0x2bb   : > { %v3852_v7 = vsel %vm3850_vm6, %v11603_v30, %v9524_v16  ;;  %v10016_v40 = vsub.s32 %v3389_v60, %v3392_v24  ;;  %vm3949_vm11 = vcmp.lt.s32.totalorder %v3948_v17, 2  ;;  %v11607_v63 = vxor.u32 2147483648, %v11605_v59 }
 0x2bc   : > { %v3853_v36 = vsel %vm3846_vm3, %v3849_v45, %v3852_v7  ;;  %v3952_v51 = vsel %vm3950_vm0, %v11605_v59, %v11604_v19  ;;  %v3310_v16 = vsel %vm3227_vm4, %v3309_v11, %v3308_v12  ;;  %v4051_v26 = vand.u32 3, %v11608_v34  ;;  %v7323_v45 = vld [vmem:[%s7874_s6 + $0x2] ss:$4 sm:$0x3] }
 0x2bd   : > { %v3854_v8 = vsel %vm2797_vm8, nan, %v3853_v36  ;;  %v3955_v46 = vsel %vm3953_vm13, %v11607_v63, %v9619_v43  ;;  %v3313_v60 = vsel %vm9995_vm7, %v9443_v32, %v3310_v16  ;;  %v3318_v21 = vadd.s32 3, %v3314_v35  ;;  %v11614_v19 = vld [vmem:[#allocation5_spill] sm:$0xff] }
 0x2be   : > { %v3956_v57 = vsel %vm3949_vm11, %v3952_v51, %v3955_v46  ;;  %4476 = vst [vmem:[%s8172_s12 + $0x108] sm:$0xff] %v3854_v8  ;;  %v3395_v28 = vsub.s32 0, %v10016_v40  ;;  %7670 = vcosq.f32 %v3313_v60  ;;  %vm4053_vm8 = vcmp.eq.s32.totalorder %v4051_v26, 0 }
 0x2bf   : > { %v3957_v1 = vsel %vm2901_vm2, nan, %v3956_v57  ;;  %7672 = vsinq.f32 %v3313_v60  ;;  %v11610_v50 = vxor.u32 2147483648, %v9724_v58  ;;  %vm4056_vm4 = vcmp.eq.s32.totalorder %v4051_v26, 2 }
 0x2c0   : > { %4477 = vst [vmem:[%s8172_s12 + $0x110] sm:$0xff] %v3957_v1  ;;  %v7280_v43 = vmin.u32 %v3395_v28, %v10016_v40  ;;  %v11611_v0 = vxor.u32 2147483648, %v9717_v22  ;;  %v4154_v23 = vand.u32 3, %v9679_v5  ;;  %v4257_v3 = vand.u32 3, %v9792_v29 }
 0x2c1   : > { %v4055_v14 = vsel %vm4053_vm8, %v9717_v22, %v11610_v50  ;;  %v3319_v25 = vand.u32 3, %v3318_v21  ;;  %vm4052_vm2 = vcmp.lt.s32.totalorder %v4051_v26, 2  ;;  %vm3331_vm7 = vcmp.lt.s32.totalorder %v9704_v41, 0 }
 0x2c2   : > { %v4058_v61 = vsel %vm4056_vm4, %v11611_v0, %v9724_v58  ;;  %v3397_v13 = vclz %v7280_v43  ;;  %vm4155_vm12 = vcmp.lt.s32.totalorder %v4154_v23, 2  ;;  %vm4156_vm14 = vcmp.eq.s32.totalorder %v4154_v23, 0 }
 0x2c3   : > { %v4059_v20 = vsel %vm4052_vm2, %v4055_v14, %v4058_v61  ;;  %vm4159_vm15 = vcmp.eq.s32.totalorder %v4154_v23, 2  ;;  %v11612_v22 = vxor.u32 2147483648, %v9815_v39  ;;  %v11613_v58 = vxor.u32 2147483648, %v9810_v49  ;;  %v4499_v23 = vpop.permute.xlu1 %4498 }
 0x2c4   : > { %v7281_v17 = vadd.s32 4294967294, %v3397_v13  ;;  %v4060_v27 = vsel %vm3005_vm10, nan, %v4059_v20  ;;  %vm4258_vm1 = vcmp.lt.s32.totalorder %v4257_v3, 2  ;;  %vm4259_vm6 = vcmp.eq.s32.totalorder %v4257_v3, 0 }
 0x2c5   : > { %v4158_v5 = vsel %vm4156_vm14, %v9810_v49, %v11612_v22  ;;  %v4161_v29 = vsel %vm4159_vm15, %v11613_v58, %v9815_v39  ;;  %vm4262_vm3 = vcmp.eq.s32.totalorder %v4257_v3, 2  ;;  %4478 = vst [vmem:[%s8172_s12 + $0x118] sm:$0xff] %v4060_v27  ;;  %vm3317_vm0 = vweird.f32 %v9443_v32 }
 0x2c6   : > { %v4162_v48 = vsel %vm4155_vm12, %v4158_v5, %v4161_v29  ;;  %vm7282_vm13 = vcmp.lt.s32.totalorder %v7281_v17, 0  ;;  %v4261_v62 = vsel %vm4259_vm6, %v9953_v37, %v3218_v10  ;;  %v4264_v49 = vsel %vm4262_vm3, %v3221_v38, %v9961_v44 }
 0x2c7   : > { %v4163_v47 = vsel %vm3109_vm9, nan, %v4162_v48  ;;  %vm3320_vm10 = vcmp.lt.s32.totalorder %v3319_v25, 2  ;;  %v3400_v39 = vsel %vm7282_vm13, 0, %v7281_v17  ;;  %v4265_v12 = vsel %vm4258_vm1, %v4261_v62, %v4264_v49 }
 0x2c8   : > { %v4360_v18 = vand.u32 3, %v3314_v35  ;;  %4479 = vst [vmem:[%s8172_s12 + $0x120] sm:$0xff] %v4163_v47  ;;  %v3385_v24 = vadd.s32 %v9918_v2, %v9934_v9  ;;  %v3401_v56 = vsub.s32 32, %v3400_v39  ;;  %v3405_v30 = vsub.s32 4294967266, %v3400_v39  ;;  %v7671_v10 = vpop.eup %7670  ;;  %v4494_v2 = vpop.permute.xlu0 %4493 }
 0x2c9   : > { %v4266_v7 = vsel %vm3213_vm5, nan, %v4265_v12  ;;  %vm3321_vm9 = vcmp.eq.s32.totalorder %v3319_v25, 0  ;;  %vm3324_vm11 = vcmp.eq.s32.totalorder %v3319_v25, 2  ;;  %v3402_v37 = vshll.u32 %v10016_v40, %v3400_v39  ;;  %v7673_v38 = vpop.eup %7672 }
 0x2ca   : > { %v3415_v44 = vsub.s32 4, %v9999_v31  ;;  %4480 = vst [vmem:[%s8172_s12 + $0x128] sm:$0xff] %v4266_v7  ;;  %v3325_v35 = vxor.u32 2147483648, %v7671_v10  ;;  %v3403_v11 = vshrl.u32 %v3385_v24, %v3401_v56  ;;  %v3406_v36 = vadd.s32 127, %v3405_v30 }
 0x2cb   : > { %v10072_v59 = vrot.slane %v7323_v45, %v11614_v19  ;;  %v3322_v9 = vxor.u32 2147483648, %v7673_v38  ;;  %vm4362_vm8 = vcmp.eq.s32.totalorder %v4360_v18, 0  ;;  %vm4365_vm4 = vcmp.eq.s32.totalorder %v4360_v18, 2 }
 0x2cc   : > { %v10075_v51 = vrot.slane %v7323_v45, %v11615_v4  ;;  %v3326_v52 = vsel %vm3324_vm11, %v3325_v35, %v7673_v38  ;;  %v3404_v8 = vor.u32 %v3403_v11, %v3402_v37  ;;  %v3407_v40 = vshll.u32 %v3406_v36, 23 }
 0x2cd   : > { %v4367_v63 = vsel %vm4365_vm4, %v3325_v35, %v7673_v38  ;;  %v3323_v46 = vsel %vm3321_vm9, %v7671_v10, %v3322_v9  ;;  %v3416_v16 = vsel %vm3331_vm7, %v3415_v44, %v9999_v31  ;;  %vm4361_vm5 = vcmp.lt.s32.totalorder %v4360_v18, 2 }
 0x2ce   : > { %v4364_v57 = vsel %vm4362_vm8, %v7671_v10, %v3322_v9  ;;  %v3327_v34 = vsel %vm3320_vm10, %v3323_v46, %v3326_v52  ;;  %v3408_v26 = vor.u32 4788187, %v3407_v40  ;;  %v10083_v21 = vmul.f32 %v10072_v59, %v4494_v2 }
 0x2cf   : > { %v4368_v60 = vsel %vm4361_vm5, %v4364_v57, %v4367_v63  ;;  %v3328_v28 = vsel %vm3317_vm0, nan, %v3327_v34  ;;  %v10090_v1 = vmul.f32 %v10075_v51, %v4494_v2  ;;  %v11616_v31 = vand.u32 2147483647, %v9704_v41 }
 0x2d0   : > { %v4369_v54 = vsel %vm3317_vm0, nan, %v4368_v60  ;;  %v3409_v50 = vand.u32 2147483647, %v3408_v26  ;;  %v3411_v14 = vcvt.s32.f32 %v3404_v8  ;;  %3441 = vst [vmem:[%s8172_s12 + $0xe0] sm:$0xff] %v3328_v28  ;;  %v4544_v32 = vand.u32 2147483647, %v10083_v21 }
 0x2d1   : > { %vm10094_vm2 = vcmp.le.f32.partialorder %v11616_v31, 0.7853982  ;;  %4481 = vst [vmem:[%s8172_s12 + $0x130] sm:$0xff] %v4369_v54  ;;  %v4547_v3 = vand.u32 2139095040, %v10083_v21  ;;  %v4648_v25 = vand.u32 2147483647, %v10090_v1  ;;  %v10111_v58 = vmul.f32 %v10072_v59, %v4499_v23 }
 0x2d2   : > { %v3418_v0 = vsel %vm10094_vm2, 0, %v3416_v16  ;;  %v3412_v61 = vmul.f32 %v3411_v14, %v3409_v50  ;;  %v4651_v17 = vand.u32 2139095040, %v10090_v1  ;;  %v4551_v22 = vand.u32 8388607, %v4544_v32 }
 0x2d3   : > { %v3422_v20 = vadd.s32 3, %v3418_v0  ;;  %v4548_v27 = vshrl.u32 %v4547_v3, 23  ;;  %v4655_v48 = vand.u32 8388607, %v4648_v25  ;;  %v10120_v39 = vand.u32 3, %v3418_v0 }
 0x2d4   : > { %v3413_v13 = vxor.u32 2147483648, %v3412_v61  ;;  %v4652_v29 = vshrl.u32 %v4651_v17, 23  ;;  %v4552_v18 = vor.u32 8388608, %v4551_v22  ;;  %v4752_v30 = vand.u32 2147483647, %v10111_v58 }
 0x2d5   : > { %v7324_v62 = vadd.s32 4294967169, %v4548_v27  ;;  %v10118_v49 = vand.u32 3, %v3422_v20  ;;  %v4656_v24 = vor.u32 8388608, %v4655_v48  ;;  %v4755_v7 = vand.u32 2139095040, %v10111_v58 }
 0x2d6   : > { %v3414_v5 = vsel %vm3331_vm7, %v3413_v13, %v3412_v61  ;;  %v7328_v12 = vadd.s32 4294967169, %v4652_v29  ;;  %vm4468_vm15 = vcmp.eq.s32.totalorder %v10120_v39, 2  ;;  %vm4465_vm6 = vcmp.eq.s32.totalorder %v10120_v39, 0 }
 0x2d7   : > { %v3417_v47 = vsel %vm10094_vm2, %v9704_v41, %v3414_v5  ;;  %v4554_v45 = vadd.s32 1, %v7324_v62  ;;  %vm3428_vm14 = vcmp.eq.s32.totalorder %v10118_v49, 2  ;;  %vm3425_vm1 = vcmp.eq.s32.totalorder %v10118_v49, 0 }
 0x2d8   : > { %7674 = vcosq.f32 %v3417_v47  ;;  %v4658_v56 = vadd.s32 1, %v7328_v12  ;;  %v10129_v37 = vmul.f32 %v10075_v51, %v4499_v23  ;;  %vm3424_vm3 = vcmp.lt.s32.totalorder %v10118_v49, 2 }
 0x2d9   : > { %7676 = vsinq.f32 %v3417_v47  ;;  %vm4555_vm12 = vcmp.gt.s32.totalorder %v4554_v45, 0  ;;  %vm4464_vm0 = vcmp.lt.s32.totalorder %v10120_v39, 2  ;;  %v10135_v11 = vshll.u32 %v4552_v18, 8 }
 0x2da   : > { %v4556_v10 = vsel %vm4555_vm12, %v4554_v45, 0  ;;  %vm4659_vm7 = vcmp.gt.s32.totalorder %v4658_v56, 0  ;;  %11619 = vst [vmem:[#allocation7_spill] sm:$0xff] %v10129_v37  ;;  %v10137_v36 = vshll.u32 %v4656_v24, 8  ;;  %v10139_v19 = vshrl.u32 %v4755_v7, 23 }
 0x2db   : > { %v10131_v44 = vshrl.u32 %v4556_v10, 5  ;;  %v4558_v38 = vand.u32 31, %v4556_v10  ;;  %v4660_v35 = vsel %vm4659_vm7, %v4658_v56, 0  ;;  %v10143_v2 = vand.u32 8388607, %v4752_v30 }
 0x2dc   : > { %vm3421_vm13 = vweird.f32 %v9704_v41  ;;  %v10148_v8 = vand.u32 31, %v4660_v35 }
 0x2dd   : > { %v4559_v9 = vsub.s32 32, %v4558_v38  ;;  %v4561_v4 = vshll.u32 %v11536_v55, %v4558_v38  ;;  %v4564_v52 = vshll.u32 %v11540_v15, %v4558_v38  ;;  %v4567_v40 = vshll.u32 %v11529_v33, %v4558_v38 }
 0x2de   : > { %v4570_v63 = vshll.u32 %v11530_v42, %v4558_v38  ;;  %v4573_v46 = vshll.u32 %v11531_v6, %v4558_v38  ;;  %vm4576_vm10 = vcmp.lt.s32.totalorder %v10131_v44, 1  ;;  %vm4577_vm9 = vcmp.lt.s32.totalorder %v10131_v44, 2 }
 0x2df   : > { %v4562_v16 = vshrl.u32 %v11540_v15, %v4559_v9  ;;  %v4565_v57 = vshrl.u32 %v11529_v33, %v4559_v9  ;;  %v4568_v34 = vshrl.u32 %v11530_v42, %v4559_v9  ;;  %v4560_v60 = vshrl.u32 %v11536_v55, %v4559_v9 }
 0x2e0   : > { %v4571_v28 = vshrl.u32 %v11531_v6, %v4559_v9  ;;  %v4574_v54 = vshrl.u32 %v11532_v53, %v4559_v9  ;;  %vm4578_vm11 = vcmp.lt.s32.totalorder %v10131_v44, 3  ;;  %vm4579_vm8 = vcmp.lt.s32.totalorder %v10131_v44, 4 }
 0x2e1   : > { %v4563_v50 = vor.u32 %v4562_v16, %v4561_v4  ;;  %v4566_v14 = vor.u32 %v4565_v57, %v4564_v52  ;;  %v4569_v0 = vor.u32 %v4568_v34, %v4567_v40  ;;  %v4663_v18 = vsub.s32 32, %v10148_v8 }
 0x2e2   : > { %v7675_v26 = vpop.eup %7674  ;;  %v4572_v23 = vor.u32 %v4571_v28, %v4570_v63  ;;  %v4575_v3 = vor.u32 %v4574_v54, %v4573_v46  ;;  %v4661_v38 = vshrl.u32 %v4660_v35, 5  ;;  %v4665_v52 = vshll.u32 %v11536_v55, %v10148_v8 }
 0x2e3   : > { %v7677_v31 = vpop.eup %7676  ;;  %v3429_v43 = vxor.u32 2147483648, %v7675_v26  ;;  %v4580_v17 = vsel %vm4576_vm10, %v4560_v60, %v4563_v50  ;;  %v4581_v27 = vsel %vm4579_vm8, %v4569_v0, 2102212464  ;;  %v4584_v48 = vsel %vm4576_vm10, %v4563_v50, %v4566_v14 }
 0x2e4   : > { %v3426_v61 = vxor.u32 2147483648, %v7677_v31  ;;  %v4582_v29 = vsel %vm4578_vm11, %v4566_v14, %v4581_v27  ;;  %v4585_v12 = vsel %vm4579_vm8, %v4572_v23, 920167782  ;;  %v4588_v49 = vsel %vm4576_vm10, %v4566_v14, %v4569_v0 }
 0x2e5   : > { %v3430_v13 = vsel %vm3428_vm14, %v3429_v43, %v7677_v31  ;;  %v4470_v20 = vsel %vm4468_vm15, %v3429_v43, %v7677_v31  ;;  %v4586_v56 = vsel %vm4578_vm11, %v4569_v0, %v4585_v12  ;;  %v4583_v39 = vsel %vm4577_vm9, %v4580_v17, %v4582_v29 }
 0x2e6   : > { %v3427_v22 = vsel %vm3425_vm1, %v7675_v26, %v3426_v61  ;;  %v4467_v5 = vsel %vm4465_vm6, %v7675_v26, %v3426_v61  ;;  %v4587_v7 = vsel %vm4577_vm9, %v4584_v48, %v4586_v56  ;;  %v4589_v10 = vsel %vm4579_vm8, %v4575_v3, 1326507024 }
 0x2e7   : > { %v3431_v47 = vsel %vm3424_vm3, %v3427_v22, %v3430_v13  ;;  %v4471_v62 = vsel %vm4464_vm0, %v4467_v5, %v4470_v20  ;;  %v4590_v41 = vsel %vm4578_vm11, %v4572_v23, %v4589_v10  ;;  %v4666_v63 = vshrl.u32 %v11540_v15, %v4663_v18 }
 0x2e8   : > { %v3432_v45 = vsel %vm3421_vm13, nan, %v3431_v47  ;;  %v4472_v24 = vsel %vm3421_vm13, nan, %v4471_v62  ;;  %v10205_v9 = vmul.u32.u64.low %v10135_v11, %v4587_v7  ;;  %v10206_v4 = vmul.u32.u64.high %v10135_v11, %v4587_v7, %v10205_v9 }
 0x2e9   : > { %3442 = vst [vmem:[%s8172_s12 + $0xe8] sm:$0xff] %v3432_v45  ;;  %4482 = vst [vmem:[%s8172_s12 + $0x138] sm:$0xff] %v4472_v24  ;;  %v4591_v40 = vsel %vm4577_vm9, %v4588_v49, %v4590_v41  ;;  %v4668_v46 = vshll.u32 %v11540_v15, %v10148_v8  ;;  %v4669_v35 = vshrl.u32 %v11529_v33, %v4663_v18  ;;  %v7332_v3 = vadd.s32 4294967169, %v10139_v19 }
 0x2ea   : > { %v10218_v16 = vmul.u32.u64.low %v10135_v11, %v4591_v40  ;;  %v10219_v57 = vmul.u32.u64.high %v10135_v11, %v4591_v40, %v10218_v16  ;;  %v4671_v34 = vshll.u32 %v11529_v33, %v10148_v8  ;;  %v4672_v26 = vshrl.u32 %v11530_v42, %v4663_v18 }
 0x2eb   : > { %v4667_v60 = vor.u32 %v4666_v63, %v4665_v52  ;;  %v4670_v28 = vor.u32 %v4669_v35, %v4668_v46  ;;  %v4674_v44 = vshll.u32 %v11530_v42, %v10148_v8  ;;  %v4675_v54 = vshrl.u32 %v11531_v6, %v4663_v18  ;;  %v4504_v52 = vpop.permute.xlu0 %4503 }
 0x2ec   : > { %v4602_v31 = vadd.s32 1, %v10206_v4  ;;  %v4673_v43 = vor.u32 %v4672_v26, %v4671_v34  ;;  %v4677_v50 = vshll.u32 %v11531_v6, %v10148_v8  ;;  %v4678_v14 = vshrl.u32 %v11532_v53, %v4663_v18 }
 0x2ed   : > { %v4599_v0 = vmul.u32 %v10135_v11, %v4583_v39  ;;  %v4664_v61 = vshrl.u32 %v11536_v55, %v4663_v18  ;;  %v4676_v23 = vor.u32 %v4675_v54, %v4674_v44  ;;  %vm4601_vm4 = vc.u32 %v10219_v57, %v10205_v9 }
 0x2ee   : > { %v4679_v13 = vor.u32 %v4678_v14, %v4677_v50  ;;  %vm4680_vm5 = vcmp.lt.s32.totalorder %v4661_v38, 1  ;;  %vm4683_vm2 = vcmp.lt.s32.totalorder %v4661_v38, 4  ;;  %v4603_v20 = vsel %vm4601_vm4, %v4602_v31, %v10206_v4 }
 0x2ef   : > { %vm4681_vm12 = vcmp.lt.s32.totalorder %v4661_v38, 2  ;;  %v4685_v17 = vsel %vm4683_vm2, %v4673_v43, 2102212464  ;;  %v4688_v8 = vsel %vm4680_vm5, %v4667_v60, %v4670_v28  ;;  %v4604_v27 = vadd.s32 %v4603_v20, %v4599_v0 }
 0x2f0   : > { %vm4682_vm14 = vcmp.lt.s32.totalorder %v4661_v38, 3  ;;  %v4689_v22 = vsel %vm4683_vm2, %v4676_v23, 920167782  ;;  %v4692_v11 = vsel %vm4680_vm5, %v4670_v28, %v4673_v43  ;;  %v4684_v5 = vsel %vm4680_vm5, %v4664_v61, %v4667_v60 }
 0x2f1   : > { %v4690_v29 = vsel %vm4682_vm14, %v4673_v43, %v4689_v22  ;;  %v4693_v48 = vsel %vm4683_vm2, %v4679_v13, 1326507024  ;;  %v4762_v47 = vadd.s32 1, %v7332_v3  ;;  %v4605_v19 = vadd.s32 536870912, %v4604_v27 }
 0x2f2   : > { %v4686_v62 = vsel %vm4682_vm14, %v4670_v28, %v4685_v17  ;;  %v4691_v12 = vsel %vm4681_vm12, %v4688_v8, %v4690_v29  ;;  %v4694_v18 = vsel %vm4682_vm14, %v4676_v23, %v4693_v48  ;;  %v4760_v46 = vor.u32 8388608, %v10143_v2 }
 0x2f3   : > { %v4695_v45 = vsel %vm4681_vm12, %v4692_v11, %v4694_v18  ;;  %v10240_v24 = vmul.u32.u64.low %v10137_v36, %v4691_v12  ;;  %v10241_v56 = vmul.u32.u64.high %v10137_v36, %v4691_v12, %v10240_v24  ;;  %vm4763_vm15 = vcmp.gt.s32.totalorder %v4762_v47, 0 }
 0x2f4   : > { %v4606_v49 = vshrl.u32 %v4605_v19, 30  ;;  %v10245_v39 = vmul.u32.u64.low %v10137_v36, %v4695_v45  ;;  %v10246_v7 = vmul.u32.u64.high %v10137_v36, %v4695_v45, %v10245_v39  ;;  %v4764_v10 = vsel %vm4763_vm15, %v4762_v47, 0 }
 0x2f5   : > { %v4687_v41 = vsel %vm4681_vm12, %v4684_v5, %v4686_v62  ;;  %v4766_v4 = vand.u32 31, %v4764_v10  ;;  %v4706_v63 = vadd.s32 1, %v10241_v56  ;;  %v4859_v35 = vand.u32 2139095040, %v10129_v37 }
 0x2f6   : > { %v4607_v40 = vshll.u32 %v4606_v49, 30  ;;  %v4703_v34 = vmul.u32 %v10137_v36, %v4687_v41  ;;  %vm4705_vm7 = vc.u32 %v10246_v7, %v10240_v24  ;;  %v10258_v38 = vmul.f32 %v10072_v59, %v4504_v52 }
 0x2f7   : > { %v4767_v26 = vsub.s32 32, %v4766_v4  ;;  %v4707_v60 = vsel %vm4705_vm7, %v4706_v63, %v10241_v56  ;;  %v10262_v28 = vmul.f32 %v10075_v51, %v4504_v52  ;;  %vm4546_vm1 = vcmp.lt.s32.totalorder %v10083_v21, 0 }
 0x2f8   : > { %v10252_v16 = vsub.s32 %v4604_v27, %v4607_v40  ;;  %11620 = vst [vmem:[#allocation10_spill] sm:$0xff] %v10258_v38  ;;  %v4708_v44 = vadd.s32 %v4707_v60, %v4703_v34  ;;  %v4600_v36 = vadd.s32 %v10205_v9, %v10219_v57  ;;  %v10268_v54 = vshll.u32 %v4760_v46, 8 }
 0x2f9   : > { %11621 = vst [vmem:[#allocation9_spill] sm:$0xff] %v10262_v28  ;;  %v4856_v31 = vand.u32 2147483647, %v10129_v37  ;;  %v4860_v43 = vshrl.u32 %v4859_v35, 23  ;;  %v10272_v0 = vshrl.u32 %v4764_v10, 5  ;;  %v4770_v61 = vshrl.u32 %v11540_v15, %v4767_v26 }
 0x2fa   : > { %v4610_v2 = vsub.s32 0, %v10252_v16  ;;  %v4709_v14 = vadd.s32 536870912, %v4708_v44  ;;  %v4773_v23 = vshrl.u32 %v11529_v33, %v4767_v26  ;;  %v4776_v3 = vshrl.u32 %v11530_v42, %v4767_v26 }
 0x2fb   : > { %v4778_v13 = vshll.u32 %v11530_v42, %v4766_v4  ;;  %v4779_v9 = vshrl.u32 %v11531_v6, %v4767_v26  ;;  %v4630_v20 = vsub.s32 4, %v4606_v49  ;;  %v4769_v17 = vshll.u32 %v11536_v55, %v4766_v4 }
 0x2fc   : > { %v7325_v50 = vmin.u32 %v4610_v2, %v10252_v16  ;;  %v4782_v8 = vshrl.u32 %v11532_v53, %v4767_v26  ;;  %v4710_v27 = vshrl.u32 %v4709_v14, 30  ;;  %v4772_v22 = vshll.u32 %v11540_v15, %v4766_v4 }
 0x2fd   : > { %v4775_v11 = vshll.u32 %v11529_v33, %v4766_v4  ;;  %v4780_v5 = vor.u32 %v4779_v9, %v4778_v13  ;;  %vm10285_vm6 = vcmp.le.f32.partialorder %v4544_v32, 0.7853982  ;;  %v4771_v47 = vor.u32 %v4770_v61, %v4769_v17 }
 0x2fe   : > { %v4612_v57 = vclz %v7325_v50  ;;  %v4781_v19 = vshll.u32 %v11531_v6, %v4766_v4  ;;  %v7336_v62 = vadd.s32 4294967169, %v4860_v43  ;;  %v4711_v12 = vshll.u32 %v4710_v27, 30 }
 0x2ff   : > { %v4774_v18 = vor.u32 %v4773_v23, %v4772_v22  ;;  %v4777_v45 = vor.u32 %v4776_v3, %v4775_v11  ;;  %vm4787_vm3 = vcmp.lt.s32.totalorder %v10272_v0, 4  ;;  %v4631_v56 = vsel %vm4546_vm1, %v4630_v20, %v4606_v49 }
 0x300   : > { %v7326_v48 = vadd.s32 4294967294, %v4612_v57  ;;  %v4783_v39 = vor.u32 %v4782_v8, %v4781_v19  ;;  %v4793_v32 = vsel %vm4787_vm3, %v4780_v5, 920167782  ;;  %vm4650_vm13 = vcmp.lt.s32.totalorder %v10090_v1, 0 }
 0x301   : > { %v10296_v41 = vsub.s32 %v4708_v44, %v4711_v12  ;;  %v4768_v4 = vshrl.u32 %v11536_v55, %v4767_v26  ;;  %vm4784_vm10 = vcmp.lt.s32.totalorder %v10272_v0, 1  ;;  %vm4785_vm9 = vcmp.lt.s32.totalorder %v10272_v0, 2 }
 0x302   : > { %vm7327_vm0 = vcmp.lt.s32.totalorder %v7326_v48, 0  ;;  %vm4786_vm11 = vcmp.lt.s32.totalorder %v10272_v0, 3  ;;  %v4792_v63 = vsel %vm4784_vm10, %v4771_v47, %v4774_v18  ;;  %v4796_v35 = vsel %vm4784_vm10, %v4774_v18, %v4777_v45 }
 0x303   : > { %v4615_v10 = vsel %vm7327_vm0, 0, %v7326_v48  ;;  %v4714_v49 = vsub.s32 0, %v10296_v41  ;;  %v4794_v46 = vsel %vm4786_vm11, %v4777_v45, %v4793_v32  ;;  %v4797_v2 = vsel %vm4787_vm3, %v4783_v39, 1326507024 }
 0x304   : > { %v4616_v52 = vsub.s32 32, %v4615_v10  ;;  %v4620_v40 = vsub.s32 4294967266, %v4615_v10  ;;  %v4617_v34 = vshll.u32 %v10252_v16, %v4615_v10  ;;  %v4734_v43 = vsub.s32 4, %v4710_v27 }
 0x305   : > { %v7329_v44 = vmin.u32 %v4714_v49, %v10296_v41  ;;  %v4789_v50 = vsel %vm4787_vm3, %v4777_v45, 2102212464  ;;  %v4798_v14 = vsel %vm4786_vm11, %v4780_v5, %v4797_v2  ;;  %v4795_v3 = vsel %vm4785_vm9, %v4792_v63, %v4794_v46 }
 0x306   : > { %v4618_v26 = vshrl.u32 %v4600_v36, %v4616_v52  ;;  %v4621_v60 = vadd.s32 127, %v4620_v40  ;;  %v4799_v16 = vsel %vm4785_vm9, %v4796_v35, %v4798_v14  ;;  %v10323_v36 = vsel %vm10285_vm6, 0, %v4631_v56 }
 0x307   : > { %vm10327_vm8 = vcmp.le.f32.partialorder %v4648_v25, 0.7853982  ;;  %v4716_v9 = vclz %v7329_v44  ;;  %v4788_v57 = vsel %vm4784_vm10, %v4768_v4, %v4771_v47  ;;  %v4790_v17 = vsel %vm4786_vm11, %v4774_v18, %v4789_v50 }
 0x308   : > { %v4619_v61 = vor.u32 %v4618_v26, %v4617_v34  ;;  %v4622_v23 = vshll.u32 %v4621_v60, 23  ;;  %v10336_v8 = vmul.u32.u64.low %v10268_v54, %v4799_v16  ;;  %v10337_v22 = vmul.u32.u64.high %v10268_v54, %v4799_v16, %v10336_v8 }
 0x309   : > { %v7330_v11 = vadd.s32 4294967294, %v4716_v9  ;;  %v10340_v5 = vmul.u32.u64.low %v10268_v54, %v4795_v3  ;;  %v10341_v48 = vmul.u32.u64.high %v10268_v54, %v4795_v3, %v10340_v5  ;;  %v4866_v25 = vadd.s32 1, %v7336_v62 }
 0x30a   : > { %v4623_v20 = vor.u32 4788187, %v4622_v23  ;;  %v4626_v12 = vcvt.s32.f32 %v4619_v61  ;;  %v4735_v47 = vsel %vm4650_vm13, %v4734_v43, %v4710_v27  ;;  %v4863_v45 = vand.u32 8388607, %v4856_v31 }
 0x30b   : > { %v4704_v18 = vadd.s32 %v10240_v24, %v10246_v7  ;;  %vm7331_vm4 = vcmp.lt.s32.totalorder %v7330_v11, 0  ;;  %v4791_v56 = vsel %vm4785_vm9, %v4788_v57, %v4790_v17  ;;  %vm4867_vm5 = vcmp.gt.s32.totalorder %v4866_v25, 0  ;;  %v10360_v7 = vpop.permute.xlu1 %4508 }
 0x30c   : > { %v4624_v19 = vand.u32 2147483647, %v4623_v20  ;;  %v4637_v32 = vadd.s32 3, %v10323_v36  ;;  %v4719_v62 = vsel %vm7331_vm4, 0, %v7330_v11  ;;  %vm4809_vm2 = vc.u32 %v10337_v22, %v10340_v5 }
 0x30d   : > { %v4720_v10 = vsub.s32 32, %v4719_v62  ;;  %v4724_v27 = vsub.s32 4294967266, %v4719_v62  ;;  %v10357_v4 = vsel %vm10327_vm8, 0, %v4735_v47  ;;  %v4810_v24 = vadd.s32 1, %v10341_v48 }
 0x30e   : > { %v4627_v39 = vmul.f32 %v4626_v12, %v4624_v19  ;;  %v4807_v52 = vmul.u32 %v10268_v54, %v4791_v56  ;;  %v4864_v40 = vor.u32 8388608, %v4863_v45  ;;  %v4868_v49 = vsel %vm4867_vm5, %v4866_v25, 0 }
 0x30f   : > { %v4721_v63 = vshll.u32 %v10296_v41, %v4719_v62  ;;  %v4722_v46 = vshrl.u32 %v4704_v18, %v4720_v10  ;;  %v4725_v35 = vadd.s32 127, %v4724_v27  ;;  %v4811_v34 = vsel %vm4809_vm2, %v4810_v24, %v10341_v48 }
 0x310   : > { %v4628_v0 = vxor.u32 2147483648, %v4627_v39  ;;  %v4812_v60 = vadd.s32 %v4811_v34, %v4807_v52  ;;  %v4870_v2 = vand.u32 31, %v4868_v49  ;;  %v4963_v44 = vand.u32 2139095040, %v10258_v38 }
 0x311   : > { %v10370_v43 = vmul.f32 %v10072_v59, %v10360_v7  ;;  %v4723_v41 = vor.u32 %v4722_v46, %v4721_v63  ;;  %v4726_v50 = vshll.u32 %v4725_v35, 23  ;;  %v10375_v14 = vand.u32 3, %v4637_v32 }
 0x312   : > { %v4629_v26 = vsel %vm4546_vm1, %v4628_v0, %v4627_v39  ;;  %v4813_v61 = vadd.s32 536870912, %v4812_v60  ;;  %v4871_v23 = vsub.s32 32, %v4870_v2  ;;  %v10378_v16 = vadd.s32 3, %v10357_v4 }
 0x313   : > { %11626 = vst [vmem:[#allocation8_spill] sm:$0xff] %v10370_v43  ;;  %v4632_v54 = vsel %vm10285_vm6, %v10083_v21, %v4629_v26  ;;  %v4727_v3 = vor.u32 4788187, %v4726_v50  ;;  %v4960_v9 = vand.u32 2147483647, %v10258_v38  ;;  %v4730_v57 = vcvt.s32.f32 %v4723_v41 }
 0x314   : > { %7678 = vcosq.f32 %v4632_v54  ;;  %v10381_v20 = vshrl.u32 %v4813_v61, 30  ;;  %v10383_v17 = vshll.u32 %v4864_v40, 8  ;;  %v4964_v29 = vshrl.u32 %v4963_v44, 23 }
 0x315   : > { %7680 = vsinq.f32 %v4632_v54  ;;  %v4728_v8 = vand.u32 2147483647, %v4727_v3  ;;  %v4874_v11 = vshrl.u32 %v11540_v15, %v4871_v23  ;;  %v4877_v48 = vshrl.u32 %v11529_v33, %v4871_v23 }
 0x316   : > { %v4880_v25 = vshrl.u32 %v11530_v42, %v4871_v23  ;;  %vm4643_vm12 = vcmp.eq.s32.totalorder %v10375_v14, 2  ;;  %v4815_v19 = vshll.u32 %v10381_v20, 30  ;;  %v10390_v12 = vshrl.u32 %v4868_v49, 5 }
 0x317   : > { %v4873_v47 = vshll.u32 %v11536_v55, %v4870_v2  ;;  %v4879_v45 = vshll.u32 %v11529_v33, %v4870_v2  ;;  %vm4640_vm14 = vcmp.eq.s32.totalorder %v10375_v14, 0  ;;  %v4731_v18 = vmul.f32 %v4730_v57, %v4728_v8 }
 0x318   : > { %v4876_v56 = vshll.u32 %v11540_v15, %v4870_v2  ;;  %v4882_v39 = vshll.u32 %v11530_v42, %v4870_v2  ;;  %v4883_v32 = vshrl.u32 %v11531_v6, %v4871_v23  ;;  %vm4639_vm15 = vcmp.lt.s32.totalorder %v10375_v14, 2 }
 0x319   : > { %v10399_v62 = vsub.s32 %v4812_v60, %v4815_v19  ;;  %v4881_v10 = vor.u32 %v4880_v25, %v4879_v45  ;;  %v4886_v27 = vshrl.u32 %v11532_v53, %v4871_v23  ;;  %v7340_v24 = vadd.s32 4294967169, %v4964_v29 }
 0x31a   : > { %vm4636_vm7 = vweird.f32 %v10083_v21  ;;  %v4732_v0 = vxor.u32 2147483648, %v4731_v18  ;;  %v4875_v52 = vor.u32 %v4874_v11, %v4873_v47  ;;  %v4878_v40 = vor.u32 %v4877_v48, %v4876_v56 }
 0x31b   : > { %v4884_v49 = vor.u32 %v4883_v32, %v4882_v39  ;;  %v4818_v63 = vsub.s32 0, %v10399_v62  ;;  %v4872_v46 = vshrl.u32 %v11536_v55, %v4871_v23  ;;  %v4885_v35 = vshll.u32 %v11531_v6, %v4870_v2 }
 0x31c   : > { %vm4888_vm1 = vcmp.lt.s32.totalorder %v10390_v12, 1  ;;  %v4733_v34 = vsel %vm4650_vm13, %v4732_v0, %v4731_v18  ;;  %vm4754_vm6 = vcmp.lt.s32.totalorder %v10111_v58, 0  ;;  %v4838_v26 = vsub.s32 4, %v10381_v20 }
 0x31d   : > { %vm4889_vm3 = vcmp.lt.s32.totalorder %v10390_v12, 2  ;;  %vm4891_vm0 = vcmp.lt.s32.totalorder %v10390_v12, 4  ;;  %v4736_v44 = vsel %vm10327_vm8, %v10090_v1, %v4733_v34  ;;  %v7333_v2 = vmin.u32 %v4818_v63, %v10399_v62 }
 0x31e   : > { %v10413_v60 = vpop.eup %7678  ;;  %v4887_v54 = vor.u32 %v4886_v27, %v4885_v35  ;;  %v4893_v41 = vsel %vm4891_vm0, %v4881_v10, 2102212464  ;;  %7682 = vcosq.f32 %v4736_v44  ;;  %v4896_v23 = vsel %vm4888_vm1, %v4875_v52, %v4878_v40 }
 0x31f   : > { %v10421_v50 = vpop.eup %7680  ;;  %v11469_v61 = vxor.u32 2147483648, %v10413_v60  ;;  %v4897_v3 = vsel %vm4891_vm0, %v4884_v49, 920167782  ;;  %7684 = vsinq.f32 %v4736_v44  ;;  %v4820_v57 = vclz %v7333_v2 }
 0x320   : > { %v11470_v13 = vxor.u32 2147483648, %v10421_v50  ;;  %vm4890_vm13 = vcmp.lt.s32.totalorder %v10390_v12, 3  ;;  %v4892_v8 = vsel %vm4888_vm1, %v4872_v46, %v4875_v52  ;;  %v4900_v45 = vsel %vm4888_vm1, %v4878_v40, %v4881_v10 }
 0x321   : > { %v4645_v29 = vsel %vm4643_vm12, %v11469_v61, %v10421_v50  ;;  %v4894_v11 = vsel %vm4890_vm13, %v4878_v40, %v4893_v41  ;;  %v4898_v48 = vsel %vm4890_vm13, %v4881_v10, %v4897_v3  ;;  %v7334_v19 = vadd.s32 4294967294, %v4820_v57 }
 0x322   : > { %v4642_v25 = vsel %vm4640_vm14, %v10413_v60, %v11470_v13  ;;  %v4899_v47 = vsel %vm4889_vm3, %v4896_v23, %v4898_v48  ;;  %v4901_v56 = vsel %vm4891_vm0, %v4887_v54, 1326507024  ;;  %v4742_v0 = vand.u32 3, %v10378_v16 }
 0x323   : > { %v4646_v18 = vsel %vm4639_vm15, %v4642_v25, %v4645_v29  ;;  %v10451_v39 = vmul.u32.u64.low %v10383_v17, %v4899_v47  ;;  %v10452_v32 = vmul.u32.u64.high %v10383_v17, %v4899_v47, %v10451_v39  ;;  %vm7335_vm10 = vcmp.lt.s32.totalorder %v7334_v19, 0 }
 0x324   : > { %v4647_v27 = vsel %vm4636_vm7, nan, %v4646_v18  ;;  %v4902_v52 = vsel %vm4890_vm13, %v4884_v49, %v4901_v56  ;;  %v4808_v10 = vadd.s32 %v10340_v5, %v10337_v22  ;;  %v4823_v14 = vsel %vm7335_vm10, 0, %v7334_v19 }
 0x325   : > { %v4903_v40 = vsel %vm4889_vm3, %v4900_v45, %v4902_v52  ;;  %v4970_v63 = vadd.s32 1, %v7340_v24  ;;  %5792 = vst [vmem:[%s8172_s12 + $0x140] sm:$0xff] %v4647_v27  ;;  %vm4740_vm9 = vweird.f32 %v10090_v1  ;;  %v4824_v46 = vsub.s32 32, %v4823_v14 }
 0x326   : > { %v4828_v35 = vsub.s32 4294967266, %v4823_v14  ;;  %v4839_v34 = vsel %vm4754_vm6, %v4838_v26, %v10381_v20  ;;  %v4895_v16 = vsel %vm4889_vm3, %v4892_v8, %v4894_v11  ;;  %v4825_v49 = vshll.u32 %v10399_v62, %v4823_v14 }
 0x327   : > { %v10471_v22 = vmul.u32.u64.low %v10383_v17, %v4903_v40  ;;  %v10472_v5 = vmul.u32.u64.high %v10383_v17, %v4903_v40, %v10471_v22  ;;  %vm4971_vm11 = vcmp.gt.s32.totalorder %v4970_v63, 0  ;;  %v4826_v24 = vshrl.u32 %v4808_v10, %v4824_v46 }
 0x328   : > { %v4829_v44 = vadd.s32 127, %v4828_v35  ;;  %v4914_v2 = vadd.s32 1, %v10452_v32  ;;  %v4972_v54 = vsel %vm4971_vm11, %v4970_v63, 0  ;;  %v10475_v41 = vpop.eup %7682  ;;  %vm4747_vm8 = vcmp.eq.s32.totalorder %v4742_v0, 2 }
 0x329   : > { %vm10479_vm4 = vcmp.le.f32.partialorder %v4752_v30, 0.7853982  ;;  %v10485_v12 = vand.u32 8388607, %v4960_v9  ;;  %v4974_v62 = vand.u32 31, %v4972_v54  ;;  %v10487_v26 = vpop.eup %7684  ;;  %v11467_v23 = vxor.u32 2147483648, %v10475_v41 }
 0x32a   : > { %v4827_v3 = vor.u32 %v4826_v24, %v4825_v49  ;;  %v4830_v57 = vshll.u32 %v4829_v44, 23  ;;  %v10492_v29 = vsel %vm10479_vm4, 0, %v4839_v34  ;;  %v11468_v30 = vxor.u32 2147483648, %v10487_v26 }
 0x32b   : > { %v4911_v8 = vmul.u32 %v10383_v17, %v4895_v16  ;;  %vm4913_vm5 = vc.u32 %v10472_v5, %v10451_v39  ;;  %v4975_v11 = vsub.s32 32, %v4974_v62  ;;  %vm4744_vm2 = vcmp.eq.s32.totalorder %v4742_v0, 0 }
 0x32c   : > { %v4749_v48 = vsel %vm4747_vm8, %v11467_v23, %v10487_v26  ;;  %v4831_v25 = vor.u32 4788187, %v4830_v57  ;;  %v4915_v19 = vsel %vm4913_vm5, %v4914_v2, %v10452_v32  ;;  %vm4743_vm12 = vcmp.lt.s32.totalorder %v4742_v0, 2 }
 0x32d   : > { %v4746_v47 = vsel %vm4744_vm2, %v10475_v41, %v11468_v30  ;;  %v4916_v45 = vadd.s32 %v4915_v19, %v4911_v8  ;;  %v4968_v17 = vor.u32 8388608, %v10485_v12  ;;  %v4834_v27 = vcvt.s32.f32 %v4827_v3 }
 0x32e   : > { %v4750_v18 = vsel %vm4743_vm12, %v4746_v47, %v4749_v48  ;;  %v4832_v56 = vand.u32 2147483647, %v4831_v25  ;;  %v4845_v52 = vadd.s32 3, %v10492_v29  ;;  %v4978_v32 = vshrl.u32 %v11540_v15, %v4975_v11 }
 0x32f   : > { %v4751_v10 = vsel %vm4740_vm9, nan, %v4750_v18  ;;  %v4917_v14 = vadd.s32 536870912, %v4916_v45  ;;  %v4981_v0 = vshrl.u32 %v11529_v33, %v4975_v11  ;;  %v4973_v63 = vshrl.u32 %v4972_v54, 5 }
 0x330   : > { %v4835_v40 = vmul.f32 %v4834_v27, %v4832_v56  ;;  %v4977_v46 = vshll.u32 %v11536_v55, %v4974_v62  ;;  %v4984_v35 = vshrl.u32 %v11530_v42, %v4975_v11  ;;  %5793 = vst [vmem:[%s8172_s12 + $0x148] sm:$0xff] %v4751_v10  ;;  %v4980_v16 = vshll.u32 %v11540_v15, %v4974_v62 }
 0x331   : > { %v4918_v34 = vshrl.u32 %v4917_v14, 30  ;;  %v4983_v49 = vshll.u32 %v11529_v33, %v4974_v62  ;;  %v4987_v22 = vshrl.u32 %v11531_v6, %v4975_v11  ;;  %v4986_v44 = vshll.u32 %v11530_v42, %v4974_v62 }
 0x332   : > { %v4836_v24 = vxor.u32 2147483648, %v4835_v40  ;;  %v4989_v2 = vshll.u32 %v11531_v6, %v4974_v62  ;;  %v4990_v12 = vshrl.u32 %v11532_v53, %v4975_v11  ;;  %v10520_v54 = vand.u32 3, %v4845_v52 }
 0x333   : > { %v4919_v3 = vshll.u32 %v4918_v34, 30  ;;  %v4979_v57 = vor.u32 %v4978_v32, %v4977_v46  ;;  %v4982_v8 = vor.u32 %v4981_v0, %v4980_v16  ;;  %v4985_v25 = vor.u32 %v4984_v35, %v4983_v49 }
 0x334   : > { %v4837_v48 = vsel %vm4754_vm6, %v4836_v24, %v4835_v40  ;;  %v4988_v19 = vor.u32 %v4987_v22, %v4986_v44  ;;  %v4991_v47 = vor.u32 %v4990_v12, %v4989_v2  ;;  %v4976_v62 = vshrl.u32 %v11536_v55, %v4975_v11 }
 0x335   : > { %v4840_v18 = vsel %vm10479_vm4, %v10111_v58, %v4837_v48  ;;  %v10527_v56 = vsub.s32 %v4916_v45, %v4919_v3  ;;  %v5067_v27 = vand.u32 2139095040, %v10262_v28  ;;  %v4942_v52 = vsub.s32 4, %v4918_v34 }
 0x336   : > { %7686 = vcosq.f32 %v4840_v18  ;;  %vm4992_vm14 = vcmp.lt.s32.totalorder %v4973_v63, 1  ;;  %vm4994_vm15 = vcmp.lt.s32.totalorder %v4973_v63, 3  ;;  %vm4995_vm1 = vcmp.lt.s32.totalorder %v4973_v63, 4 }
 0x337   : > { %7688 = vsinq.f32 %v4840_v18  ;;  %v4922_v10 = vsub.s32 0, %v10527_v56  ;;  %v5000_v14 = vsel %vm4992_vm14, %v4979_v57, %v4982_v8  ;;  %v4997_v32 = vsel %vm4995_vm1, %v4985_v25, 2102212464 }
 0x338   : > { %v5001_v0 = vsel %vm4995_vm1, %v4988_v19, 920167782  ;;  %v5004_v20 = vsel %vm4992_vm14, %v4982_v8, %v4985_v25  ;;  %v5005_v45 = vsel %vm4995_vm1, %v4991_v47, 1326507024  ;;  %vm4993_vm6 = vcmp.lt.s32.totalorder %v4973_v63, 2 }
 0x339   : > { %v7337_v40 = vmin.u32 %v4922_v10, %v10527_v56  ;;  %v5002_v11 = vsel %vm4994_vm15, %v4985_v25, %v5001_v0  ;;  %v5006_v46 = vsel %vm4994_vm15, %v4988_v19, %v5005_v45  ;;  %v5008_v49 = vshll.u32 %v4968_v17, 8 }
 0x33a   : > { %v5003_v35 = vsel %vm4993_vm6, %v5000_v14, %v5002_v11  ;;  %v5007_v16 = vsel %vm4993_vm6, %v5004_v20, %v5006_v46  ;;  %v5068_v22 = vshrl.u32 %v5067_v27, 23  ;;  %vm4858_vm3 = vcmp.lt.s32.totalorder %v10129_v37, 0 }
 0x33b   : > { %v4924_v24 = vclz %v7337_v40  ;;  %v4996_v44 = vsel %vm4992_vm14, %v4976_v62, %v4979_v57  ;;  %v4998_v2 = vsel %vm4994_vm15, %v4982_v8, %v4997_v32  ;;  %vm4844_vm0 = vweird.f32 %v10111_v58 }
 0x33c   : > { %v10542_v12 = vmul.u32.u64.low %v5008_v49, %v5007_v16  ;;  %v10543_v3 = vmul.u32.u64.high %v5008_v49, %v5007_v16, %v10542_v12  ;;  %v10545_v48 = vmul.u32.u64.low %v5008_v49, %v5003_v35  ;;  %v10546_v25 = vmul.u32.u64.high %v5008_v49, %v5003_v35, %v10545_v48  ;;  %v4514_v16 = vpop.permute.xlu0 %4513 }
 0x33d   : > { %v7338_v19 = vadd.s32 4294967294, %v4924_v24  ;;  %v4943_v17 = vsel %vm4858_vm3, %v4942_v52, %v4918_v34  ;;  %v7344_v47 = vadd.s32 4294967169, %v5068_v22  ;;  %vm4848_vm13 = vcmp.eq.s32.totalorder %v10520_v54, 0  ;;  %v10591_v24 = vpop.permute.xlu1 %4518 }
 0x33e   : > { %vm4851_vm10 = vcmp.eq.s32.totalorder %v10520_v54, 2  ;;  %vm10556_vm11 = vcmp.le.f32.partialorder %v4856_v31, 0.7853982  ;;  %v4999_v8 = vsel %vm4993_vm6, %v4996_v44, %v4998_v2  ;;  %v4912_v18 = vadd.s32 %v10451_v39, %v10472_v5 }
 0x33f   : > { %vm7339_vm8 = vcmp.lt.s32.totalorder %v7338_v19, 0  ;;  %v11474_v62 = vand.u32 2147483647, %v10262_v28  ;;  %v5074_v34 = vadd.s32 1, %v7344_v47  ;;  %v10568_v10 = vsel %vm10556_vm11, 0, %v4943_v17 }
 0x340   : > { %v10564_v27 = vpop.eup %7686  ;;  %v4927_v52 = vsel %vm7339_vm8, 0, %v7338_v19  ;;  %vm5017_vm4 = vc.u32 %v10543_v3, %v10545_v48  ;;  %v5018_v31 = vadd.s32 1, %v10546_v25  ;;  %v5015_v32 = vmul.u32 %v5008_v49, %v4999_v8 }
 0x341   : > { %v10573_v63 = vpop.eup %7688  ;;  %v11465_v39 = vxor.u32 2147483648, %v10564_v27  ;;  %v4928_v5 = vsub.s32 32, %v4927_v52  ;;  %v4932_v14 = vsub.s32 4294967266, %v4927_v52  ;;  %v4929_v20 = vshll.u32 %v10527_v56, %v4927_v52 }
 0x342   : > { %v11466_v0 = vxor.u32 2147483648, %v10573_v63  ;;  %v5019_v45 = vsel %vm5017_vm4, %v5018_v31, %v10546_v25  ;;  %vm5075_vm5 = vcmp.gt.s32.totalorder %v5074_v34, 0  ;;  %vm4847_vm2 = vcmp.lt.s32.totalorder %v10520_v54, 2 }
 0x343   : > { %v4853_v40 = vsel %vm4851_vm10, %v11465_v39, %v10573_v63  ;;  %v4930_v11 = vshrl.u32 %v4912_v18, %v4928_v5  ;;  %v4933_v46 = vadd.s32 127, %v4932_v14  ;;  %v5020_v35 = vadd.s32 %v5019_v45, %v5015_v32 }
 0x344   : > { %v4850_v56 = vsel %vm4848_vm13, %v10564_v27, %v11466_v0  ;;  %v4949_v49 = vadd.s32 3, %v10568_v10  ;;  %v5076_v22 = vsel %vm5075_vm5, %v5074_v34, 0  ;;  %v10595_v19 = vmul.f32 %v10075_v51, %v10360_v7 }
 0x345   : > { %v4854_v44 = vsel %vm4847_vm2, %v4850_v56, %v4853_v40  ;;  %v4931_v2 = vor.u32 %v4930_v11, %v4929_v20  ;;  %v4934_v12 = vshll.u32 %v4933_v46, 23  ;;  %v5021_v25 = vadd.s32 536870912, %v5020_v35 }
 0x346   : > { %11631 = vst [vmem:[#allocation5_spill] sm:$0xff] %v10595_v19  ;;  %v4855_v17 = vsel %vm4844_vm0, nan, %v4854_v44  ;;  %v5071_v54 = vand.u32 8388607, %v11474_v62  ;;  %v5078_v47 = vand.u32 31, %v5076_v22  ;;  %v10602_v8 = vmul.f32 %v10072_v59, %v4514_v16 }
 0x347   : > { %v10605_v18 = vmul.f32 %v10075_v51, %v4514_v16  ;;  %v4935_v34 = vor.u32 4788187, %v4934_v12  ;;  %v10607_v52 = vshrl.u32 %v5021_v25, 30  ;;  %5794 = vst [vmem:[%s8172_s12 + $0x150] sm:$0xff] %v4855_v17  ;;  %v10612_v7 = vmul.f32 %v10072_v59, %v10591_v24 }
 0x348   : > { %v10614_v31 = vand.u32 3, %v4949_v49  ;;  %v5079_v5 = vsub.s32 32, %v5078_v47  ;;  %v5171_v14 = vand.u32 2139095040, %v10370_v43  ;;  %v4938_v20 = vcvt.s32.f32 %v4931_v2 }
 0x349   : > { %v4936_v32 = vand.u32 2147483647, %v4935_v34  ;;  %v5023_v45 = vshll.u32 %v10607_v52, 30  ;;  %v11473_v40 = vand.u32 2147483647, %v10370_v43  ;;  %v5072_v11 = vor.u32 8388608, %v5071_v54 }
 0x34a   : > { %v5082_v46 = vshrl.u32 %v11540_v15, %v5079_v5  ;;  %v5085_v16 = vshrl.u32 %v11529_v33, %v5079_v5  ;;  %v5088_v56 = vshrl.u32 %v11530_v42, %v5079_v5  ;;  %v5081_v49 = vshll.u32 %v11536_v55, %v5078_v47 }
 0x34b   : > { %v4939_v59 = vmul.f32 %v4938_v20, %v4936_v32  ;;  %v10622_v44 = vsub.s32 %v5020_v35, %v5023_v45  ;;  %v5091_v12 = vshrl.u32 %v11531_v6, %v5079_v5  ;;  %v5077_v25 = vshrl.u32 %v5076_v22, 5 }
 0x34c   : > { %v5084_v2 = vshll.u32 %v11540_v15, %v5078_v47  ;;  %v5087_v17 = vshll.u32 %v11529_v33, %v5078_v47  ;;  %v5172_v34 = vshrl.u32 %v5171_v14, 23  ;;  %v5083_v0 = vor.u32 %v5082_v46, %v5081_v49 }
 0x34d   : > { %v4940_v54 = vxor.u32 2147483648, %v4939_v59  ;;  %v5026_v39 = vsub.s32 0, %v10622_v44  ;;  %v5090_v23 = vshll.u32 %v11530_v42, %v5078_v47  ;;  %v5093_v35 = vshll.u32 %v11531_v6, %v5078_v47 }
 0x34e   : > { %v5086_v30 = vor.u32 %v5085_v16, %v5084_v2  ;;  %v5089_v32 = vor.u32 %v5088_v56, %v5087_v17  ;;  %v5094_v20 = vshrl.u32 %v11532_v53, %v5079_v5  ;;  %vm4962_vm12 = vcmp.lt.s32.totalorder %v10258_v38, 0 }
 0x34f   : > { %v4941_v22 = vsel %vm4858_vm3, %v4940_v54, %v4939_v59  ;;  %v7341_v45 = vmin.u32 %v5026_v39, %v10622_v44  ;;  %v5092_v14 = vor.u32 %v5091_v12, %v5090_v23  ;;  %v10636_v61 = vshll.u32 %v5072_v11, 8 }
 0x350   : > { %v4944_v46 = vsel %vm10556_vm11, %v10129_v37, %v4941_v22  ;;  %v5046_v16 = vsub.s32 4, %v10607_v52  ;;  %v5095_v56 = vor.u32 %v5094_v20, %v5093_v35  ;;  %v7348_v47 = vadd.s32 4294967169, %v5172_v34 }
 0x351   : > { %7690 = vcosq.f32 %v4944_v46  ;;  %v5028_v49 = vclz %v7341_v45  ;;  %vm5096_vm14 = vcmp.lt.s32.totalorder %v5077_v25, 1  ;;  %vm5099_vm15 = vcmp.lt.s32.totalorder %v5077_v25, 4 }
 0x352   : > { %7692 = vsinq.f32 %v4944_v46  ;;  %v5080_v59 = vshrl.u32 %v11536_v55, %v5079_v5  ;;  %v5101_v2 = vsel %vm5099_vm15, %v5089_v32, 2102212464  ;;  %v5104_v39 = vsel %vm5096_vm14, %v5083_v0, %v5086_v30 }
 0x353   : > { %v7342_v23 = vadd.s32 4294967294, %v5028_v49  ;;  %vm5098_vm1 = vcmp.lt.s32.totalorder %v5077_v25, 3  ;;  %v5105_v11 = vsel %vm5099_vm15, %v5092_v14, 920167782  ;;  %v5108_v12 = vsel %vm5096_vm14, %v5086_v30, %v5089_v32 }
 0x354   : > { %vm5097_vm6 = vcmp.lt.s32.totalorder %v5077_v25, 2  ;;  %v5100_v57 = vsel %vm5096_vm14, %v5080_v59, %v5083_v0  ;;  %v5106_v17 = vsel %vm5098_vm1, %v5089_v32, %v5105_v11  ;;  %v5109_v54 = vsel %vm5099_vm15, %v5095_v56, 1326507024 }
 0x355   : > { %vm7343_vm3 = vcmp.lt.s32.totalorder %v7342_v23, 0  ;;  %v5102_v35 = vsel %vm5098_vm1, %v5086_v30, %v5101_v2  ;;  %v5107_v34 = vsel %vm5097_vm6, %v5104_v39, %v5106_v17  ;;  %v5110_v20 = vsel %vm5098_vm1, %v5092_v14, %v5109_v54 }
 0x356   : > { %v5031_v22 = vsel %vm7343_vm3, 0, %v7342_v23  ;;  %v5111_v45 = vsel %vm5097_vm6, %v5108_v12, %v5110_v20  ;;  %v10646_v5 = vmul.u32.u64.low %v10636_v61, %v5107_v34  ;;  %v10647_v46 = vmul.u32.u64.high %v10636_v61, %v5107_v34, %v10646_v5 }
 0x357   : > { %v5016_v49 = vadd.s32 %v10545_v48, %v10543_v3  ;;  %v5032_v13 = vsub.s32 32, %v5031_v22  ;;  %v5036_v0 = vsub.s32 4294967266, %v5031_v22  ;;  %v5178_v32 = vadd.s32 1, %v7348_v47 }
 0x358   : > { %vm4948_vm13 = vweird.f32 %v10129_v37  ;;  %v5047_v30 = vsel %vm4962_vm12, %v5046_v16, %v10607_v52  ;;  %v5103_v14 = vsel %vm5097_vm6, %v5100_v57, %v5102_v35  ;;  %v5033_v2 = vshll.u32 %v10622_v44, %v5031_v22 }
 0x359   : > { %v10658_v56 = vmul.u32.u64.low %v10636_v61, %v5111_v45  ;;  %v10659_v59 = vmul.u32.u64.high %v10636_v61, %v5111_v45, %v10658_v56  ;;  %v5034_v39 = vshrl.u32 %v5016_v49, %v5032_v13  ;;  %v5037_v23 = vadd.s32 127, %v5036_v0 }
 0x35a   : > { %vm5179_vm10 = vcmp.gt.s32.totalorder %v5178_v32, 0  ;;  %vm4951_vm11 = vcmp.lt.s32.totalorder %v10614_v31, 2  ;;  %vm10665_vm8 = vcmp.le.f32.partialorder %v4960_v9, 0.7853982  ;;  %v5122_v48 = vadd.s32 1, %v10647_v46 }
 0x35b   : > { %v5180_v52 = vsel %vm5179_vm10, %v5178_v32, 0  ;;  %v10670_v25 = vpop.eup %7690  ;;  %v5035_v16 = vor.u32 %v5034_v39, %v5033_v2  ;;  %v5038_v47 = vshll.u32 %v5037_v23, 23  ;;  %v5175_v13 = vand.u32 8388607, %v11473_v40 }
 0x35c   : > { %v5182_v44 = vand.u32 31, %v5180_v52  ;;  %v10674_v11 = vpop.eup %7692  ;;  %v11471_v12 = vxor.u32 2147483648, %v10670_v25  ;;  %v10679_v9 = vsel %vm10665_vm8, 0, %v5047_v30  ;;  %v5119_v57 = vmul.u32 %v10636_v61, %v5103_v14 }
 0x35d   : > { %vm5121_vm4 = vc.u32 %v10659_v59, %v10646_v5  ;;  %v11472_v17 = vxor.u32 2147483648, %v10674_v11  ;;  %vm4955_vm5 = vcmp.eq.s32.totalorder %v10614_v31, 2  ;;  %v5039_v54 = vor.u32 4788187, %v5038_v47 }
 0x35e   : > { %v5123_v35 = vsel %vm5121_vm4, %v5122_v48, %v10647_v46  ;;  %vm4952_vm2 = vcmp.eq.s32.totalorder %v10614_v31, 0  ;;  %v4957_v34 = vsel %vm4955_vm5, %v11471_v12, %v10674_v11  ;;  %v5183_v22 = vsub.s32 32, %v5182_v44 }
 0x35f   : > { %v5124_v20 = vadd.s32 %v5123_v35, %v5119_v57  ;;  %v4954_v61 = vsel %vm4952_vm2, %v10670_v25, %v11472_v17  ;;  %v5040_v45 = vand.u32 2147483647, %v5039_v54  ;;  %v5042_v49 = vcvt.s32.f32 %v5035_v16 }
 0x360   : > { %v5053_v0 = vadd.s32 3, %v10679_v9  ;;  %v4958_v46 = vsel %vm4951_vm11, %v4954_v61, %v4957_v34  ;;  %v5176_v30 = vor.u32 8388608, %v5175_v13  ;;  %v5186_v14 = vshrl.u32 %v11540_v15, %v5183_v22 }
 0x361   : > { %v5125_v32 = vadd.s32 536870912, %v5124_v20  ;;  %v4959_v56 = vsel %vm4948_vm13, nan, %v4958_v46  ;;  %v5043_v2 = vmul.f32 %v5042_v49, %v5040_v45  ;;  %v5189_v39 = vshrl.u32 %v11529_v33, %v5183_v22 }
 0x362   : > { %v5275_v23 = vand.u32 2139095040, %v10595_v19  ;;  %v5185_v16 = vshll.u32 %v11536_v55, %v5182_v44  ;;  %v5192_v47 = vshrl.u32 %v11530_v42, %v5183_v22  ;;  %v5195_v31 = vshrl.u32 %v11531_v6, %v5183_v22  ;;  %5795 = vst [vmem:[%s8172_s12 + $0x158] sm:$0xff] %v4959_v56 }
 0x363   : > { %v10702_v48 = vshrl.u32 %v5125_v32, 30  ;;  %v5044_v13 = vxor.u32 2147483648, %v5043_v2  ;;  %v5181_v57 = vshrl.u32 %v5180_v52, 5  ;;  %v5188_v54 = vshll.u32 %v11540_v15, %v5182_v44 }
 0x364   : > { %v5194_v35 = vshll.u32 %v11530_v42, %v5182_v44  ;;  %v5187_v61 = vor.u32 %v5186_v14, %v5185_v16  ;;  %v5191_v45 = vshll.u32 %v11529_v33, %v5182_v44  ;;  %v5198_v49 = vshrl.u32 %v11532_v53, %v5183_v22 }
 0x365   : > { %v5127_v34 = vshll.u32 %v10702_v48, 30  ;;  %v5045_v46 = vsel %vm4962_vm12, %v5044_v13, %v5043_v2  ;;  %v5190_v32 = vor.u32 %v5189_v39, %v5188_v54  ;;  %v5197_v56 = vshll.u32 %v11531_v6, %v5182_v44 }
 0x366   : > { %v5196_v12 = vor.u32 %v5195_v31, %v5194_v35  ;;  %v5048_v52 = vsel %vm10665_vm8, %v10258_v38, %v5045_v46  ;;  %v10719_v17 = vand.u32 3, %v5053_v0  ;;  %v5193_v14 = vor.u32 %v5192_v47, %v5191_v45 }
 0x367   : > { %v10721_v40 = vsub.s32 %v5124_v20, %v5127_v34  ;;  %7694 = vcosq.f32 %v5048_v52  ;;  %v5199_v16 = vor.u32 %v5198_v49, %v5197_v56  ;;  %v5216_v62 = vshll.u32 %v5176_v30, 8 }
 0x368   : > { %v5276_v37 = vshrl.u32 %v5275_v23, 23  ;;  %7696 = vsinq.f32 %v5048_v52  ;;  %vm5200_vm12 = vcmp.lt.s32.totalorder %v5181_v57, 1  ;;  %vm5203_vm14 = vcmp.lt.s32.totalorder %v5181_v57, 4 }
 0x369   : > { %v5130_v2 = vsub.s32 0, %v10721_v40  ;;  %v5184_v44 = vshrl.u32 %v11536_v55, %v5183_v22  ;;  %vm5202_vm15 = vcmp.lt.s32.totalorder %v5181_v57, 3  ;;  %v5208_v3 = vsel %vm5200_vm12, %v5187_v61, %v5190_v32 }
 0x36a   : > { %v5209_v39 = vsel %vm5203_vm14, %v5196_v12, 920167782  ;;  %vm5201_vm1 = vcmp.lt.s32.totalorder %v5181_v57, 2  ;;  %v5205_v20 = vsel %vm5203_vm14, %v5193_v14, 2102212464  ;;  %v5212_v23 = vsel %vm5200_vm12, %v5190_v32, %v5193_v14 }
 0x36b   : > { %v7345_v0 = vmin.u32 %v5130_v2, %v10721_v40  ;;  %v5210_v47 = vsel %vm5202_vm15, %v5193_v14, %v5209_v39  ;;  %v5213_v31 = vsel %vm5203_vm14, %v5199_v16, 1326507024  ;;  %v7352_v13 = vadd.s32 4294967169, %v5276_v37 }
 0x36c   : > { %v5211_v30 = vsel %vm5201_vm1, %v5208_v3, %v5210_v47  ;;  %v10732_v54 = vmul.f32 %v10075_v51, %v10591_v24  ;;  %v5204_v35 = vsel %vm5200_vm12, %v5184_v44, %v5187_v61  ;;  %v11478_v34 = vand.u32 2147483647, %v10595_v19 }
 0x36d   : > { %v5132_v22 = vclz %v7345_v0  ;;  %v5206_v45 = vsel %vm5202_vm15, %v5190_v32, %v5205_v20  ;;  %v5214_v49 = vsel %vm5202_vm15, %v5196_v12, %v5213_v31  ;;  %vm5052_vm6 = vweird.f32 %v10258_v38 }
 0x36e   : > { %v10738_v46 = vmul.u32.u64.low %v5216_v62, %v5211_v30  ;;  %v10739_v56 = vmul.u32.u64.high %v5216_v62, %v5211_v30, %v10738_v46  ;;  %vm5066_vm3 = vcmp.lt.s32.totalorder %v10262_v28, 0  ;;  %v5215_v51 = vsel %vm5201_vm1, %v5212_v23, %v5214_v49 }
 0x36f   : > { %v7346_v37 = vadd.s32 4294967294, %v5132_v22  ;;  %v5282_v24 = vadd.s32 1, %v7352_v13  ;;  %vm5056_vm10 = vcmp.eq.s32.totalorder %v10719_v17, 0  ;;  %vm5059_vm11 = vcmp.eq.s32.totalorder %v10719_v17, 2 }
 0x370   : > { %v10747_v61 = vmul.u32.u64.low %v5216_v62, %v5215_v51  ;;  %v10748_v32 = vmul.u32.u64.high %v5216_v62, %v5215_v51, %v10747_v61  ;;  %v5207_v12 = vsel %vm5201_vm1, %v5204_v35, %v5206_v45  ;;  %v5279_v52 = vand.u32 8388607, %v11478_v34 }
 0x371   : > { %vm7347_vm8 = vcmp.lt.s32.totalorder %v7346_v37, 0  ;;  %vm5283_vm4 = vcmp.gt.s32.totalorder %v5282_v24, 0  ;;  %v10753_v14 = vpop.eup %7694  ;;  %v5120_v16 = vadd.s32 %v10646_v5, %v10659_v59  ;;  %v5150_v44 = vsub.s32 4, %v10702_v48 }
 0x372   : > { %11634 = vst [vmem:[#allocation6_spill] sm:$0xff] %v10753_v14  ;;  %v5135_v2 = vsel %vm7347_vm8, 0, %v7346_v37  ;;  %v5226_v3 = vadd.s32 1, %v10739_v56  ;;  %v10759_v39 = vpop.eup %7696  ;;  %v11476_v0 = vxor.u32 2147483648, %v10753_v14  ;;  %v5284_v47 = vsel %vm5283_vm4, %v5282_v24, 0 }
 0x373   : > { %11635 = vst [vmem:[#allocation11_spill] sm:$0xff] %v10759_v39  ;;  %v5136_v57 = vsub.s32 32, %v5135_v2  ;;  %v5140_v20 = vsub.s32 4294967266, %v5135_v2  ;;  %v11477_v30 = vxor.u32 2147483648, %v10759_v39  ;;  %v5137_v23 = vshll.u32 %v10721_v40, %v5135_v2 }
 0x374   : > { %v5223_v31 = vmul.u32 %v5216_v62, %v5207_v12  ;;  %vm5225_vm5 = vc.u32 %v10748_v32, %v10738_v46  ;;  %v5061_v5 = vsel %vm5059_vm11, %v11476_v0, %v10759_v39  ;;  %vm5055_vm2 = vcmp.lt.s32.totalorder %v10719_v17, 2 }
 0x375   : > { %v5138_v59 = vshrl.u32 %v5120_v16, %v5136_v57  ;;  %v5141_v13 = vadd.s32 127, %v5140_v20  ;;  %v5227_v22 = vsel %vm5225_vm5, %v5226_v3, %v10739_v56  ;;  %v5058_v62 = vsel %vm5056_vm10, %v10753_v14, %v11477_v30 }
 0x376   : > { %v5228_v40 = vadd.s32 %v5227_v22, %v5223_v31  ;;  %v5286_v35 = vand.u32 31, %v5284_v47  ;;  %v5062_v45 = vsel %vm5055_vm2, %v5058_v62, %v5061_v5  ;;  %v11636_v49 = vand.u32 2147483647, %v10262_v28 }
 0x377   : > { %v5139_v51 = vor.u32 %v5138_v59, %v5137_v23  ;;  %v5142_v56 = vshll.u32 %v5141_v13, 23  ;;  %v5063_v24 = vsel %vm5052_vm6, nan, %v5062_v45  ;;  %v5151_v17 = vsel %vm5066_vm3, %v5150_v44, %v10702_v48 }
 0x378   : > { %vm10780_vm12 = vcmp.le.f32.partialorder %v11636_v49, 0.7853982  ;;  %v5229_v61 = vadd.s32 536870912, %v5228_v40  ;;  %v5287_v12 = vsub.s32 32, %v5286_v35  ;;  %v5280_v3 = vor.u32 8388608, %v5279_v52  ;;  %5796 = vst [vmem:[%s8172_s12 + $0x160] sm:$0xff] %v5063_v24 }
 0x379   : > { %v5143_v16 = vor.u32 4788187, %v5142_v56  ;;  %v5146_v2 = vcvt.s32.f32 %v5139_v51  ;;  %v5289_v57 = vshll.u32 %v11536_v55, %v5286_v35  ;;  %v5292_v31 = vshll.u32 %v11540_v15, %v5286_v35 }
 0x37a   : > { %v10791_v20 = vshrl.u32 %v5229_v61, 30  ;;  %v5290_v23 = vshrl.u32 %v11540_v15, %v5287_v12  ;;  %v5293_v5 = vshrl.u32 %v11529_v33, %v5287_v12  ;;  %v5296_v13 = vshrl.u32 %v11530_v42, %v5287_v12 }
 0x37b   : > { %v5144_v59 = vand.u32 2147483647, %v5143_v16  ;;  %v5298_v48 = vshll.u32 %v11530_v42, %v5286_v35  ;;  %v5299_v44 = vshrl.u32 %v11531_v6, %v5287_v12  ;;  %v10801_v52 = vsel %vm10780_vm12, 0, %v5151_v17 }
 0x37c   : > { %v5231_v22 = vshll.u32 %v10791_v20, 30  ;;  %v5285_v62 = vshrl.u32 %v5284_v47, 5  ;;  %v5295_v45 = vshll.u32 %v11529_v33, %v5286_v35  ;;  %v5291_v51 = vor.u32 %v5290_v23, %v5289_v57 }
 0x37d   : > { %v5147_v49 = vmul.f32 %v5146_v2, %v5144_v59  ;;  %v5294_v56 = vor.u32 %v5293_v5, %v5292_v31  ;;  %v5300_v24 = vor.u32 %v5299_v44, %v5298_v48  ;;  %v5301_v0 = vshll.u32 %v11531_v6, %v5286_v35 }
 0x37e   : > { %v10805_v61 = vsub.s32 %v5228_v40, %v5231_v22  ;;  %v5297_v16 = vor.u32 %v5296_v13, %v5295_v45  ;;  %v5302_v30 = vshrl.u32 %v11532_v53, %v5287_v12  ;;  %v5157_v17 = vadd.s32 3, %v10801_v52 }
 0x37f   : > { %v5148_v34 = vxor.u32 2147483648, %v5147_v49  ;;  %v5320_v38 = vshll.u32 %v5280_v3, 8  ;;  %v5379_v14 = vand.u32 2139095040, %v10602_v8  ;;  %vm5304_vm14 = vcmp.lt.s32.totalorder %v5285_v62, 1 }
 0x380   : > { %v5234_v47 = vsub.s32 0, %v10805_v61  ;;  %v5303_v39 = vor.u32 %v5302_v30, %v5301_v0  ;;  %vm5307_vm15 = vcmp.lt.s32.totalorder %v5285_v62, 4  ;;  %v5288_v2 = vshrl.u32 %v11536_v55, %v5287_v12 }
 0x381   : > { %v5149_v40 = vsel %vm5066_vm3, %v5148_v34, %v5147_v49  ;;  %vm5306_vm1 = vcmp.lt.s32.totalorder %v5285_v62, 3  ;;  %v5313_v35 = vsel %vm5307_vm15, %v5300_v24, 920167782  ;;  %v5309_v23 = vsel %vm5307_vm15, %v5297_v16, 2102212464 }
 0x382   : > { %v5152_v57 = vsel %vm10780_vm12, %v10262_v28, %v5149_v40  ;;  %v7349_v3 = vmin.u32 %v5234_v47, %v10805_v61  ;;  %v5312_v31 = vsel %vm5304_vm14, %v5291_v51, %v5294_v56  ;;  %v5314_v0 = vsel %vm5306_vm1, %v5297_v16, %v5313_v35 }
 0x383   : > { %7698 = vcosq.f32 %v5152_v57  ;;  %v5316_v30 = vsel %vm5304_vm14, %v5294_v56, %v5297_v16  ;;  %v5317_v5 = vsel %vm5307_vm15, %v5303_v39, 1326507024  ;;  %v5254_v12 = vsub.s32 4, %v10791_v20 }
 0x384   : > { %7700 = vsinq.f32 %v5152_v57  ;;  %v5236_v34 = vclz %v7349_v3  ;;  %vm5305_vm3 = vcmp.lt.s32.totalorder %v5285_v62, 2  ;;  %v5308_v59 = vsel %vm5304_vm14, %v5288_v2, %v5291_v51 }
 0x385   : > { %v5310_v37 = vsel %vm5306_vm1, %v5294_v56, %v5309_v23  ;;  %v5315_v13 = vsel %vm5305_vm3, %v5312_v31, %v5314_v0  ;;  %v5318_v48 = vsel %vm5306_vm1, %v5300_v24, %v5317_v5  ;;  %v5158_v16 = vand.u32 3, %v5157_v17 }
 0x386   : > { %v7350_v44 = vadd.s32 4294967294, %v5236_v34  ;;  %v5319_v22 = vsel %vm5305_vm3, %v5316_v30, %v5318_v48  ;;  %v10826_v45 = vmul.u32.u64.low %v5320_v38, %v5315_v13  ;;  %v10827_v49 = vmul.u32.u64.high %v5320_v38, %v5315_v13, %v10826_v45 }
 0x387   : > { %v10830_v39 = vmul.u32.u64.low %v5320_v38, %v5319_v22  ;;  %v10831_v47 = vmul.u32.u64.high %v5320_v38, %v5319_v22, %v10830_v39  ;;  %v5380_v40 = vshrl.u32 %v5379_v14, 23  ;;  %v11639_v35 = vand.u32 2147483647, %v10370_v43 }
 0x388   : > { %vm5170_vm11 = vcmp.lt.s32.totalorder %v10370_v43, 0  ;;  %vm7351_vm8 = vcmp.lt.s32.totalorder %v7350_v44, 0  ;;  %v5311_v62 = vsel %vm5305_vm3, %v5308_v59, %v5310_v37  ;;  %v5224_v56 = vadd.s32 %v10738_v46, %v10748_v32 }
 0x389   : > { %vm10835_vm10 = vcmp.le.f32.partialorder %v11639_v35, 0.7853982  ;;  %v5239_v24 = vsel %vm7351_vm8, 0, %v7350_v44  ;;  %v11486_v17 = vand.u32 2147483647, %v10602_v8  ;;  %v7356_v2 = vadd.s32 4294967169, %v5380_v40 }
 0x38a   : > { %v5240_v57 = vsub.s32 32, %v5239_v24  ;;  %v5244_v3 = vsub.s32 4294967266, %v5239_v24  ;;  %v5255_v14 = vsel %vm5170_vm11, %v5254_v12, %v10791_v20  ;;  %v5330_v23 = vadd.s32 1, %v10827_v49 }
 0x38b   : > { %vm5163_vm4 = vcmp.eq.s32.totalorder %v5158_v16, 2  ;;  %v5327_v31 = vmul.u32 %v5320_v38, %v5311_v62  ;;  %vm5329_vm5 = vc.u32 %v10831_v47, %v10826_v45  ;;  %v5386_v0 = vadd.s32 1, %v7356_v2 }
 0x38c   : > { %v5241_v46 = vshll.u32 %v10805_v61, %v5239_v24  ;;  %v5242_v32 = vshrl.u32 %v5224_v56, %v5240_v57  ;;  %v5245_v30 = vadd.s32 127, %v5244_v3  ;;  %v5331_v5 = vsel %vm5329_vm5, %v5330_v23, %v10827_v49 }
 0x38d   : > { %v10851_v34 = vpop.eup %7698  ;;  %v10855_v59 = vsel %vm10835_vm10, 0, %v5255_v14  ;;  %v5332_v20 = vadd.s32 %v5331_v5, %v5327_v31  ;;  %v5383_v38 = vand.u32 8388607, %v11486_v17  ;;  %vm5387_vm2 = vcmp.gt.s32.totalorder %v5386_v0, 0 }
 0x38e   : > { %v10859_v12 = vpop.eup %7700  ;;  %v11484_v37 = vxor.u32 2147483648, %v10851_v34  ;;  %v5243_v61 = vor.u32 %v5242_v32, %v5241_v46  ;;  %v5246_v13 = vshll.u32 %v5245_v30, 23  ;;  %v5388_v48 = vsel %vm5387_vm2, %v5386_v0, 0 }
 0x38f   : > { %v11485_v44 = vxor.u32 2147483648, %v10859_v12  ;;  %v5333_v22 = vadd.s32 536870912, %v5332_v20  ;;  %v5390_v49 = vand.u32 31, %v5388_v48  ;;  %v5483_v39 = vand.u32 2139095040, %v10605_v18 }
 0x390   : > { %vm5156_vm12 = vweird.f32 %v10262_v28  ;;  %vm5160_vm14 = vcmp.eq.s32.totalorder %v5158_v16, 0  ;;  %v5165_v40 = vsel %vm5163_vm4, %v11484_v37, %v10859_v12  ;;  %v5247_v35 = vor.u32 4788187, %v5246_v13 }
 0x391   : > { %vm5159_vm15 = vcmp.lt.s32.totalorder %v5158_v16, 2  ;;  %v5162_v62 = vsel %vm5160_vm14, %v10851_v34, %v11485_v44  ;;  %v5334_v56 = vshrl.u32 %v5333_v22, 30  ;;  %v5391_v24 = vsub.s32 32, %v5390_v49 }
 0x392   : > { %v5166_v2 = vsel %vm5159_vm15, %v5162_v62, %v5165_v40  ;;  %v5248_v57 = vand.u32 2147483647, %v5247_v35  ;;  %v5250_v3 = vcvt.s32.f32 %v5243_v61  ;;  %v5261_v14 = vadd.s32 3, %v10855_v59 }
 0x393   : > { %v5167_v23 = vsel %vm5156_vm12, nan, %v5166_v2  ;;  %vm5274_vm1 = vcmp.lt.s32.totalorder %v10595_v19, 0  ;;  %v5335_v31 = vshll.u32 %v5334_v56, 30  ;;  %v5384_v0 = vor.u32 8388608, %v5383_v38 }
 0x394   : > { %v5484_v16 = vshrl.u32 %v5483_v39, 23  ;;  %v5251_v46 = vmul.f32 %v5250_v3, %v5248_v57  ;;  %v5394_v32 = vshrl.u32 %v11540_v15, %v5391_v24  ;;  %v5397_v30 = vshrl.u32 %v11529_v33, %v5391_v24  ;;  %5797 = vst [vmem:[%s8172_s12 + $0x168] sm:$0xff] %v5167_v23 }
 0x395   : > { %v5400_v5 = vshrl.u32 %v11530_v42, %v5391_v24  ;;  %v10880_v13 = vsub.s32 %v5332_v20, %v5335_v31  ;;  %v5393_v61 = vshll.u32 %v11536_v55, %v5390_v49  ;;  %v5396_v22 = vshll.u32 %v11540_v15, %v5390_v49 }
 0x396   : > { %v5403_v40 = vshrl.u32 %v11531_v6, %v5391_v24  ;;  %v5252_v35 = vxor.u32 2147483648, %v5251_v46  ;;  %v5358_v62 = vsub.s32 4, %v5334_v56  ;;  %v5389_v38 = vshrl.u32 %v5388_v48, 5 }
 0x397   : > { %v5399_v39 = vshll.u32 %v11529_v33, %v5390_v49  ;;  %v5338_v2 = vsub.s32 0, %v10880_v13  ;;  %v5395_v57 = vor.u32 %v5394_v32, %v5393_v61  ;;  %v5398_v3 = vor.u32 %v5397_v30, %v5396_v22 }
 0x398   : > { %v5402_v37 = vshll.u32 %v11530_v42, %v5390_v49  ;;  %v5253_v20 = vsel %vm5170_vm11, %v5252_v35, %v5251_v46  ;;  %v5405_v31 = vshll.u32 %v11531_v6, %v5390_v49  ;;  %v5406_v44 = vshrl.u32 %v11532_v53, %v5391_v24 }
 0x399   : > { %v5401_v23 = vor.u32 %v5400_v5, %v5399_v39  ;;  %v5256_v48 = vsel %vm10835_vm10, %v10370_v43, %v5253_v20  ;;  %v10895_v17 = vand.u32 3, %v5261_v14  ;;  %v11642_v28 = vand.u32 2147483647, %v10595_v19 }
 0x39a   : > { %v7353_v30 = vmin.u32 %v5338_v2, %v10880_v13  ;;  %v5404_v46 = vor.u32 %v5403_v40, %v5402_v37  ;;  %7702 = vcosq.f32 %v5256_v48  ;;  %v5407_v5 = vor.u32 %v5406_v44, %v5405_v31 }
 0x39b   : > { %vm10899_vm3 = vcmp.le.f32.partialorder %v11642_v28, 0.7853982  ;;  %v5424_v49 = vshll.u32 %v5384_v0, 8  ;;  %v7360_v61 = vadd.s32 4294967169, %v5484_v16  ;;  %7704 = vsinq.f32 %v5256_v48 }
 0x39c   : > { %v5340_v22 = vclz %v7353_v30  ;;  %vm5408_vm11 = vcmp.lt.s32.totalorder %v5389_v38, 1  ;;  %vm5411_vm8 = vcmp.lt.s32.totalorder %v5389_v38, 4  ;;  %v5359_v51 = vsel %vm5274_vm1, %v5358_v62, %v5334_v56 }
 0x39d   : > { %v5392_v14 = vshrl.u32 %v11536_v55, %v5391_v24  ;;  %v5413_v28 = vsel %vm5411_vm8, %v5401_v23, 2102212464  ;;  %v5416_v35 = vsel %vm5408_vm11, %v5395_v57, %v5398_v3  ;;  %vm5410_vm10 = vcmp.lt.s32.totalorder %v5389_v38, 3 }
 0x39e   : > { %v7354_v39 = vadd.s32 4294967294, %v5340_v22  ;;  %v5417_v20 = vsel %vm5411_vm8, %v5404_v46, 920167782  ;;  %v5420_v2 = vsel %vm5408_vm11, %v5398_v3, %v5401_v23  ;;  %vm5409_vm4 = vcmp.lt.s32.totalorder %v5389_v38, 2 }
 0x39f   : > { %v5412_v37 = vsel %vm5408_vm11, %v5392_v14, %v5395_v57  ;;  %v5418_v44 = vsel %vm5410_vm10, %v5401_v23, %v5417_v20  ;;  %v5421_v0 = vsel %vm5411_vm8, %v5407_v5, 1326507024  ;;  %v5414_v16 = vsel %vm5410_vm10, %v5398_v3, %v5413_v28 }
 0x3a0   : > { %vm7355_vm5 = vcmp.lt.s32.totalorder %v7354_v39, 0  ;;  %v5419_v40 = vsel %vm5409_vm4, %v5416_v35, %v5418_v44  ;;  %v5422_v31 = vsel %vm5410_vm10, %v5404_v46, %v5421_v0  ;;  %vm11508_vm2 = vweird.f32 %v10370_v43 }
 0x3a1   : > { %v5343_v48 = vsel %vm7355_vm5, 0, %v7354_v39  ;;  %v5423_v56 = vsel %vm5409_vm4, %v5420_v2, %v5422_v31  ;;  %v10909_v62 = vmul.u32.u64.low %v5424_v49, %v5419_v40  ;;  %v10910_v24 = vmul.u32.u64.high %v5424_v49, %v5419_v40, %v10909_v62 }
 0x3a2   : > { %v5328_v30 = vadd.s32 %v10826_v45, %v10831_v47  ;;  %v5344_v57 = vsub.s32 32, %v5343_v48  ;;  %v5348_v23 = vsub.s32 4294967266, %v5343_v48  ;;  %v5490_v5 = vadd.s32 1, %v7360_v61 }
 0x3a3   : > { %v10918_v3 = vsel %vm10899_vm3, 0, %v5359_v51  ;;  %v5415_v46 = vsel %vm5409_vm4, %v5412_v37, %v5414_v16  ;;  %v10921_v22 = vmul.u32.u64.low %v5424_v49, %v5423_v56  ;;  %v10922_v14 = vmul.u32.u64.high %v5424_v49, %v5423_v56, %v10921_v22 }
 0x3a4   : > { %11645 = vst [vmem:[#allocation12_spill] sm:$0xff] %v10918_v3  ;;  %v5345_v28 = vshll.u32 %v10880_v13, %v5343_v48  ;;  %v5346_v35 = vshrl.u32 %v5328_v30, %v5344_v57  ;;  %v5349_v39 = vadd.s32 127, %v5348_v23  ;;  %vm5491_vm14 = vcmp.gt.s32.totalorder %v5490_v5, 0  ;;  %v10925_v20 = vpop.eup %7702 }
 0x3a5   : > { %11646 = vst [vmem:[#allocation13_spill] sm:$0xff] %v10925_v20  ;;  %vm5267_vm15 = vcmp.eq.s32.totalorder %v10895_v17, 2  ;;  %v5434_v45 = vadd.s32 1, %v10910_v24  ;;  %v11490_v47 = vand.u32 2147483647, %v10605_v18  ;;  %v5492_v61 = vsel %vm5491_vm14, %v5490_v5, 0  ;;  %v10930_v51 = vpop.eup %7704 }
 0x3a6   : > { %11647 = vst [vmem:[#allocation14_spill] sm:$0xff] %v10930_v51  ;;  %v11488_v38 = vxor.u32 2147483648, %v10925_v20  ;;  %v5347_v2 = vor.u32 %v5346_v35, %v5345_v28  ;;  %v5350_v37 = vshll.u32 %v5349_v39, 23  ;;  %v5365_v13 = vadd.s32 3, %v10918_v3 }
 0x3a7   : > { %v11489_v44 = vxor.u32 2147483648, %v10930_v51  ;;  %v5431_v0 = vmul.u32 %v5424_v49, %v5415_v46  ;;  %vm5433_vm11 = vc.u32 %v10922_v14, %v10909_v62  ;;  %v5494_v16 = vand.u32 31, %v5492_v61 }
 0x3a8   : > { %vm5264_vm8 = vcmp.eq.s32.totalorder %v10895_v17, 0  ;;  %v5269_v40 = vsel %vm5267_vm15, %v11488_v38, %v10930_v51  ;;  %v5351_v31 = vor.u32 4788187, %v5350_v37  ;;  %v5435_v48 = vsel %vm5433_vm11, %v5434_v45, %v10910_v24 }
 0x3a9   : > { %vm5263_vm10 = vcmp.lt.s32.totalorder %v10895_v17, 2  ;;  %v5266_v49 = vsel %vm5264_vm8, %v10925_v20, %v11489_v44  ;;  %v5436_v56 = vadd.s32 %v5435_v48, %v5431_v0  ;;  %v5495_v30 = vsub.s32 32, %v5494_v16 }
 0x3aa   : > { %v5270_v57 = vsel %vm5263_vm10, %v5266_v49, %v5269_v40  ;;  %v5352_v23 = vand.u32 2147483647, %v5351_v31  ;;  %v5354_v5 = vcvt.s32.f32 %v5347_v2  ;;  %v5487_v46 = vand.u32 8388607, %v11490_v47 }
 0x3ab   : > { %v5271_v22 = vsel %vm11508_vm2, nan, %v5270_v57  ;;  %v10950_v28 = vand.u32 3, %v5365_v13  ;;  %v5437_v24 = vadd.s32 536870912, %v5436_v56  ;;  %v5498_v17 = vshrl.u32 %v11540_v15, %v5495_v30 }
 0x3ac   : > { %v5355_v35 = vmul.f32 %v5354_v5, %v5352_v23  ;;  %v5493_v39 = vshrl.u32 %v5492_v61, 5  ;;  %v5501_v45 = vshrl.u32 %v11529_v33, %v5495_v30  ;;  %v5504_v37 = vshrl.u32 %v11530_v42, %v5495_v30  ;;  %5798 = vst [vmem:[%s8172_s12 + $0x170] sm:$0xff] %v5271_v22 }
 0x3ad   : > { %vm5378_vm4 = vcmp.lt.s32.totalorder %v10602_v8, 0  ;;  %v5438_v2 = vshrl.u32 %v5437_v24, 30  ;;  %v5497_v0 = vshll.u32 %v11536_v55, %v5494_v16  ;;  %v5500_v40 = vshll.u32 %v11540_v15, %v5494_v16 }
 0x3ae   : > { %v5507_v13 = vshrl.u32 %v11531_v6, %v5495_v30  ;;  %v5356_v31 = vxor.u32 2147483648, %v5355_v35  ;;  %v5503_v48 = vshll.u32 %v11529_v33, %v5494_v16  ;;  %v5506_v49 = vshll.u32 %v11530_v42, %v5494_v16 }
 0x3af   : > { %v5510_v61 = vshrl.u32 %v11532_v53, %v5495_v30  ;;  %v5439_v57 = vshll.u32 %v5438_v2, 30  ;;  %v5488_v23 = vor.u32 8388608, %v5487_v46  ;;  %v5499_v5 = vor.u32 %v5498_v17, %v5497_v0 }
 0x3b0   : > { %v5509_v22 = vshll.u32 %v11531_v6, %v5494_v16  ;;  %v5357_v24 = vsel %vm5274_vm1, %v5356_v31, %v5355_v35  ;;  %v5502_v38 = vor.u32 %v5501_v45, %v5500_v40  ;;  %v5505_v44 = vor.u32 %v5504_v37, %v5503_v48 }
 0x3b1   : > { %v5508_v47 = vor.u32 %v5507_v13, %v5506_v49  ;;  %v5360_v43 = vsel %vm10899_vm3, %v10595_v19, %v5357_v24  ;;  %v10969_v20 = vsub.s32 %v5436_v56, %v5439_v57  ;;  %v5587_v3 = vand.u32 2139095040, %v10612_v7 }
 0x3b2   : > { %v5511_v51 = vor.u32 %v5510_v61, %v5509_v22  ;;  %7706 = vcosq.f32 %v5360_v43  ;;  %v5462_v46 = vsub.s32 4, %v5438_v2  ;;  %v5496_v17 = vshrl.u32 %v11536_v55, %v5495_v30 }
 0x3b3   : > { %vm5512_vm5 = vcmp.lt.s32.totalorder %v5493_v39, 1  ;;  %7708 = vsinq.f32 %v5360_v43  ;;  %v5442_v16 = vsub.s32 0, %v10969_v20  ;;  %vm5513_vm1 = vcmp.lt.s32.totalorder %v5493_v39, 2 }
 0x3b4   : > { %vm5515_vm14 = vcmp.lt.s32.totalorder %v5493_v39, 4  ;;  %vm5514_vm15 = vcmp.lt.s32.totalorder %v5493_v39, 3  ;;  %v5520_v32 = vsel %vm5512_vm5, %v5499_v5, %v5502_v38  ;;  %v5524_v0 = vsel %vm5512_vm5, %v5502_v38, %v5505_v44 }
 0x3b5   : > { %v5517_v35 = vsel %vm5515_vm14, %v5505_v44, 2102212464  ;;  %v5521_v45 = vsel %vm5515_vm14, %v5508_v47, 920167782  ;;  %v7357_v56 = vmin.u32 %v5442_v16, %v10969_v20  ;;  %v5525_v40 = vsel %vm5515_vm14, %v5511_v51, 1326507024 }
 0x3b6   : > { %v5522_v37 = vsel %vm5514_vm15, %v5505_v44, %v5521_v45  ;;  %v5463_v30 = vsel %vm5378_vm4, %v5462_v46, %v5438_v2  ;;  %v5526_v13 = vsel %vm5514_vm15, %v5508_v47, %v5525_v40  ;;  %v5528_v31 = vshll.u32 %v5488_v23, 8 }
 0x3b7   : > { %v5523_v43 = vsel %vm5513_vm1, %v5520_v32, %v5522_v37  ;;  %v11648_v48 = vand.u32 2147483647, %v10602_v8  ;;  %v5444_v61 = vclz %v7357_v56  ;;  %v5516_v57 = vsel %vm5512_vm5, %v5496_v17, %v5499_v5 }
 0x3b8   : > { %v5518_v22 = vsel %vm5514_vm15, %v5502_v38, %v5517_v35  ;;  %v5527_v44 = vsel %vm5513_vm1, %v5524_v0, %v5526_v13  ;;  %v10988_v51 = vmul.u32.u64.low %v5528_v31, %v5523_v43  ;;  %v10989_v24 = vmul.u32.u64.high %v5528_v31, %v5523_v43, %v10988_v51 }
 0x3b9   : > { %vm10982_vm3 = vcmp.le.f32.partialorder %v11648_v48, 0.7853982  ;;  %v5588_v2 = vshrl.u32 %v5587_v3, 23  ;;  %v7358_v46 = vadd.s32 4294967294, %v5444_v61  ;;  %vm5367_vm11 = vcmp.lt.s32.totalorder %v10950_v28, 2 }
 0x3ba   : > { %v10994_v47 = vsel %vm10982_vm3, 0, %v5463_v30  ;;  %v10996_v23 = vmul.u32.u64.low %v5528_v31, %v5527_v44  ;;  %v10997_v16 = vmul.u32.u64.high %v5528_v31, %v5527_v44, %v10996_v23  ;;  %vm5368_vm8 = vcmp.eq.s32.totalorder %v10950_v28, 0 }
 0x3bb   : > { %11651 = vst [vmem:[#allocation15_spill] sm:$0xff] %v10994_v47  ;;  %v5519_v38 = vsel %vm5513_vm1, %v5516_v57, %v5518_v22  ;;  %v7364_v5 = vadd.s32 4294967169, %v5588_v2  ;;  %vm5371_vm10 = vcmp.eq.s32.totalorder %v10950_v28, 2  ;;  %v5432_v3 = vadd.s32 %v10909_v62, %v10922_v14 }
 0x3bc   : > { %vm7359_vm5 = vcmp.lt.s32.totalorder %v7358_v46, 0  ;;  %v11499_v17 = vand.u32 2147483647, %v10612_v7  ;;  %v11006_v35 = vpop.eup %7706  ;;  %v5469_v45 = vadd.s32 3, %v10994_v47  ;;  %v5538_v56 = vadd.s32 1, %v10989_v24 }
 0x3bd   : > { %11652 = vst [vmem:[#allocation16_spill] sm:$0xff] %v11006_v35  ;;  %v5447_v32 = vsel %vm7359_vm5, 0, %v7358_v46  ;;  %v5594_v37 = vadd.s32 1, %v7364_v5  ;;  %v11010_v0 = vpop.eup %7708  ;;  %v11497_v39 = vxor.u32 2147483648, %v11006_v35  ;;  %v5535_v43 = vmul.u32 %v5528_v31, %v5519_v38 }
 0x3be   : > { %11653 = vst [vmem:[#allocation17_spill] sm:$0xff] %v11010_v0  ;;  %v5448_v40 = vsub.s32 32, %v5447_v32  ;;  %v5452_v30 = vsub.s32 4294967266, %v5447_v32  ;;  %v11498_v62 = vxor.u32 2147483648, %v11010_v0  ;;  %v5449_v14 = vshll.u32 %v10969_v20, %v5447_v32 }
 0x3bf   : > { %vm5537_vm1 = vc.u32 %v10997_v16, %v10988_v51  ;;  %vm5595_vm14 = vcmp.gt.s32.totalorder %v5594_v37, 0  ;;  %v5373_v13 = vsel %vm5371_vm10, %v11497_v39, %v11010_v0  ;;  %v5591_v22 = vand.u32 8388607, %v11499_v17 }
 0x3c0   : > { %v5450_v48 = vshrl.u32 %v5432_v3, %v5448_v40  ;;  %v5453_v61 = vadd.s32 127, %v5452_v30  ;;  %v5539_v57 = vsel %vm5537_vm1, %v5538_v56, %v10989_v24  ;;  %v5370_v20 = vsel %vm5368_vm8, %v11006_v35, %v11498_v62 }
 0x3c1   : > { %v5540_v31 = vadd.s32 %v5539_v57, %v5535_v43  ;;  %v5596_v44 = vsel %vm5595_vm14, %v5594_v37, 0  ;;  %vm11507_vm15 = vweird.f32 %v10595_v19  ;;  %v5374_v2 = vsel %vm5367_vm11, %v5370_v20, %v5373_v13 }
 0x3c2   : > { %v5451_v46 = vor.u32 %v5450_v48, %v5449_v14  ;;  %v5454_v23 = vshll.u32 %v5453_v61, 23  ;;  %v5375_v24 = vsel %vm11507_vm15, nan, %v5374_v2  ;;  %v5598_v5 = vand.u32 31, %v5596_v44 }
 0x3c3   : > { %v5541_v38 = vadd.s32 536870912, %v5540_v31  ;;  %v11035_v32 = vand.u32 3, %v5469_v45  ;;  %5799 = vst [vmem:[%s8172_s12 + $0x178] sm:$0xff] %v5375_v24  ;;  %v5592_v37 = vor.u32 8388608, %v5591_v22  ;;  %v5691_v43 = vand.u32 2139095040, %v10732_v54 }
 0x3c4   : > { %v5455_v3 = vor.u32 4788187, %v5454_v23  ;;  %v5599_v30 = vsub.s32 32, %v5598_v5  ;;  %v5458_v13 = vcvt.s32.f32 %v5451_v46  ;;  %v11040_v14 = vshrl.u32 %v5596_v44, 5 }
 0x3c5   : > { %v5542_v40 = vshrl.u32 %v5541_v38, 30  ;;  %v5601_v48 = vshll.u32 %v11536_v55, %v5598_v5  ;;  %vm5482_vm11 = vcmp.lt.s32.totalorder %v10605_v18, 0  ;;  %v5604_v57 = vshll.u32 %v11540_v15, %v5598_v5 }
 0x3c6   : > { %v5456_v28 = vand.u32 2147483647, %v5455_v3  ;;  %v5602_v45 = vshrl.u32 %v11540_v15, %v5599_v30  ;;  %v5607_v20 = vshll.u32 %v11529_v33, %v5598_v5  ;;  %v5605_v22 = vshrl.u32 %v11529_v33, %v5599_v30 }
 0x3c7   : > { %v5543_v61 = vshll.u32 %v5542_v40, 30  ;;  %v5608_v23 = vshrl.u32 %v11530_v42, %v5599_v30  ;;  %v5611_v46 = vshrl.u32 %v11531_v6, %v5599_v30  ;;  %v5610_v24 = vshll.u32 %v11530_v42, %v5598_v5 }
 0x3c8   : > { %v5459_v2 = vmul.f32 %v5458_v13, %v5456_v28  ;;  %v5614_v38 = vshrl.u32 %v11532_v53, %v5599_v30  ;;  %v11054_v3 = vshll.u32 %v5592_v37, 8  ;;  %v11654_v62 = vand.u32 2147483647, %v10605_v18 }
 0x3c9   : > { %v11050_v44 = vsub.s32 %v5540_v31, %v5543_v61  ;;  %v5603_v28 = vor.u32 %v5602_v45, %v5601_v48  ;;  %v5606_v13 = vor.u32 %v5605_v22, %v5604_v57  ;;  %v5609_v56 = vor.u32 %v5608_v23, %v5607_v20 }
 0x3ca   : > { %v5460_v39 = vxor.u32 2147483648, %v5459_v2  ;;  %vm11058_vm8 = vcmp.le.f32.partialorder %v11654_v62, 0.7853982  ;;  %v5612_v31 = vor.u32 %v5611_v46, %v5610_v24  ;;  %v5613_v61 = vshll.u32 %v11531_v6, %v5598_v5 }
 0x3cb   : > { %v5546_v19 = vsub.s32 0, %v11050_v44  ;;  %v5692_v35 = vshrl.u32 %v5691_v43, 23  ;;  %v5566_v0 = vsub.s32 4, %v5542_v40  ;;  %v5600_v47 = vshrl.u32 %v11536_v55, %v5599_v30 }
 0x3cc   : > { %v5461_v37 = vsel %vm5378_vm4, %v5460_v39, %v5459_v2  ;;  %vm5616_vm10 = vcmp.lt.s32.totalorder %v11040_v14, 1  ;;  %v5615_v45 = vor.u32 %v5614_v38, %v5613_v61  ;;  %vm5619_vm5 = vcmp.lt.s32.totalorder %v11040_v14, 4 }
 0x3cd   : > { %v5464_v62 = vsel %vm10982_vm3, %v10602_v8, %v5461_v37  ;;  %v7361_v48 = vmin.u32 %v5546_v19, %v11050_v44  ;;  %v5621_v5 = vsel %vm5619_vm5, %v5609_v56, 2102212464  ;;  %v5624_v39 = vsel %vm5616_vm10, %v5603_v28, %v5606_v13 }
 0x3ce   : > { %7710 = vcosq.f32 %v5464_v62  ;;  %v5625_v30 = vsel %vm5619_vm5, %v5612_v31, 920167782  ;;  %vm5617_vm4 = vcmp.lt.s32.totalorder %v11040_v14, 2  ;;  %vm5618_vm3 = vcmp.lt.s32.totalorder %v11040_v14, 3 }
 0x3cf   : > { %7712 = vsinq.f32 %v5464_v62  ;;  %v5548_v43 = vclz %v7361_v48  ;;  %v5567_v19 = vsel %vm5482_vm11, %v5566_v0, %v5542_v40  ;;  %v5620_v49 = vsel %vm5616_vm10, %v5600_v47, %v5603_v28 }
 0x3d0   : > { %v5626_v57 = vsel %vm5618_vm3, %v5609_v56, %v5625_v30  ;;  %v5628_v20 = vsel %vm5616_vm10, %v5606_v13, %v5609_v56  ;;  %v5622_v22 = vsel %vm5618_vm3, %v5606_v13, %v5621_v5  ;;  %v5629_v46 = vsel %vm5619_vm5, %v5615_v45, 1326507024 }
 0x3d1   : > { %v7362_v2 = vadd.s32 4294967294, %v5548_v43  ;;  %v5627_v23 = vsel %vm5617_vm4, %v5624_v39, %v5626_v57  ;;  %v5630_v24 = vsel %vm5618_vm3, %v5612_v31, %v5629_v46  ;;  %v7368_v0 = vadd.s32 4294967169, %v5692_v35 }
 0x3d2   : > { %v11092_v38 = vmul.u32.u64.low %v11054_v3, %v5627_v23  ;;  %v11093_v61 = vmul.u32.u64.high %v11054_v3, %v5627_v23, %v11092_v38  ;;  %vm5472_vm1 = vcmp.eq.s32.totalorder %v11035_v32, 0  ;;  %v11099_v47 = vsel %vm11058_vm8, 0, %v5567_v19 }
 0x3d3   : > { %vm7363_vm14 = vcmp.lt.s32.totalorder %v7362_v2, 0  ;;  %v5631_v56 = vsel %vm5617_vm4, %v5628_v20, %v5630_v24  ;;  %vm5471_vm10 = vcmp.lt.s32.totalorder %v11035_v32, 2  ;;  %v5698_v31 = vadd.s32 1, %v7368_v0 }
 0x3d4   : > { %v5551_v40 = vsel %vm7363_vm14, 0, %v7362_v2  ;;  %v11105_v28 = vmul.u32.u64.low %v11054_v3, %v5631_v56  ;;  %v11106_v13 = vmul.u32.u64.high %v11054_v3, %v5631_v56, %v11105_v28  ;;  %vm11506_vm5 = vweird.f32 %v10602_v8 }
 0x3d5   : > { %v5536_v35 = vadd.s32 %v10988_v51, %v10997_v16  ;;  %v5552_v37 = vsub.s32 32, %v5551_v40  ;;  %v5556_v62 = vsub.s32 4294967266, %v5551_v40  ;;  %v5623_v48 = vsel %vm5617_vm4, %v5620_v49, %v5622_v22 }
 0x3d6   : > { %v5573_v45 = vadd.s32 3, %v11099_v47  ;;  %v5642_v5 = vadd.s32 1, %v11093_v61  ;;  %v11657_v39 = vand.u32 2147483647, %v10732_v54  ;;  %vm5699_vm3 = vcmp.gt.s32.totalorder %v5698_v31, 0 }
 0x3d7   : > { %v5553_v43 = vshll.u32 %v11050_v44, %v5551_v40  ;;  %v5554_v19 = vshrl.u32 %v5536_v35, %v5552_v37  ;;  %v5557_v57 = vadd.s32 127, %v5556_v62  ;;  %v5700_v20 = vsel %vm5699_vm3, %v5698_v31, 0 }
 0x3d8   : > { %v11117_v30 = vand.u32 8388607, %v11657_v39  ;;  %v11120_v51 = vpop.eup %7710  ;;  %vm5475_vm14 = vcmp.eq.s32.totalorder %v11035_v32, 2  ;;  %v5639_v16 = vmul.u32 %v11054_v3, %v5623_v48  ;;  %vm5641_vm4 = vc.u32 %v11106_v13, %v11092_v38 }
 0x3d9   : > { %v5702_v14 = vand.u32 31, %v5700_v20  ;;  %v11126_v49 = vpop.eup %7712  ;;  %v5476_v2 = vxor.u32 2147483648, %v11120_v51  ;;  %v5555_v22 = vor.u32 %v5554_v19, %v5553_v43  ;;  %v5558_v23 = vshll.u32 %v5557_v57, 23 }
 0x3da   : > { %v5643_v44 = vsel %vm5641_vm4, %v5642_v5, %v11093_v61  ;;  %v5473_v46 = vxor.u32 2147483648, %v11126_v49  ;;  %v11131_v24 = vand.u32 3, %v5573_v45  ;;  %v5696_v28 = vor.u32 8388608, %v11117_v30 }
 0x3db   : > { %v5644_v0 = vadd.s32 %v5643_v44, %v5639_v16  ;;  %v5703_v56 = vsub.s32 32, %v5702_v14  ;;  %v5477_v3 = vsel %vm5475_vm14, %v5476_v2, %v11126_v49  ;;  %v5559_v40 = vor.u32 4788187, %v5558_v23 }
 0x3dc   : > { %v11138_v31 = vand.u32 3, %v10323_v36  ;;  %v5474_v61 = vsel %vm5472_vm1, %v11120_v51, %v5473_v46  ;;  %v5705_v37 = vshll.u32 %v11536_v55, %v5702_v14  ;;  %v5562_v5 = vcvt.s32.f32 %v5555_v22 }
 0x3dd   : > { %v5645_v35 = vadd.s32 536870912, %v5644_v0  ;;  %v5706_v62 = vshrl.u32 %v11540_v15, %v5703_v56  ;;  %v5478_v48 = vsel %vm5471_vm10, %v5474_v61, %v5477_v3  ;;  %v5560_v45 = vand.u32 2147483647, %v5559_v40 }
 0x3de   : > { %v5709_v36 = vshrl.u32 %v11529_v33, %v5703_v56  ;;  %v5479_v39 = vsel %vm11506_vm5, nan, %v5478_v48  ;;  %v5711_v43 = vshll.u32 %v11529_v33, %v5702_v14  ;;  %v5712_v19 = vshrl.u32 %v11530_v42, %v5703_v56 }
 0x3df   : > { %v5646_v30 = vshrl.u32 %v5645_v35, 30  ;;  %v5563_v57 = vmul.f32 %v5562_v5, %v5560_v45  ;;  %vm5586_vm1 = vcmp.lt.s32.totalorder %v10612_v7, 0  ;;  %v5701_v16 = vshrl.u32 %v5700_v20, 5  ;;  %5800 = vst [vmem:[%s8172_s12 + $0x180] sm:$0xff] %v5479_v39 }
 0x3e0   : > { %v5714_v23 = vshll.u32 %v11530_v42, %v5702_v14  ;;  %v5715_v32 = vshrl.u32 %v11531_v6, %v5703_v56  ;;  %v5707_v44 = vor.u32 %v5706_v62, %v5705_v37  ;;  %v5708_v3 = vshll.u32 %v11540_v15, %v5702_v14 }
 0x3e1   : > { %v5647_v22 = vshll.u32 %v5646_v30, 30  ;;  %v5713_v40 = vor.u32 %v5712_v19, %v5711_v43  ;;  %v5564_v61 = vxor.u32 2147483648, %v5563_v57  ;;  %v5717_v33 = vshll.u32 %v11531_v6, %v5702_v14 }
 0x3e2   : > { %v5716_v35 = vor.u32 %v5715_v32, %v5714_v23  ;;  %v5718_v48 = vshrl.u32 %v11532_v53, %v5703_v56  ;;  %v5704_v20 = vshrl.u32 %v11536_v55, %v5703_v56  ;;  %v5710_v5 = vor.u32 %v5709_v36, %v5708_v3 }
 0x3e3   : > { %v11161_v45 = vsub.s32 %v5644_v0, %v5647_v22  ;;  %vm5899_vm10 = vcmp.eq.s32.totalorder %v11138_v31, 0  ;;  %v5565_v42 = vsel %vm5482_vm11, %v5564_v61, %v5563_v57  ;;  %v11658_v37 = vand.u32 2147483647, %v10612_v7 }
 0x3e4   : > { %v5670_v62 = vsub.s32 4, %v5646_v30  ;;  %v5719_v6 = vor.u32 %v5718_v48, %v5717_v33  ;;  %vm5720_vm14 = vcmp.lt.s32.totalorder %v5701_v16, 1  ;;  %v5568_v53 = vsel %vm11058_vm8, %v10605_v18, %v5565_v42 }
 0x3e5   : > { %vm11169_vm3 = vcmp.le.f32.partialorder %v11658_v37, 0.7853982  ;;  %v5650_v55 = vsub.s32 0, %v11161_v45  ;;  %vm5722_vm4 = vcmp.lt.s32.totalorder %v5701_v16, 3  ;;  %vm5723_vm5 = vcmp.lt.s32.totalorder %v5701_v16, 4 }
 0x3e6   : > { %vm5898_vm15 = vcmp.lt.s32.totalorder %v11138_v31, 2  ;;  %7714 = vcosq.f32 %v5568_v53  ;;  %v5724_v14 = vsel %vm5720_vm14, %v5704_v20, %v5707_v44  ;;  %v5725_v0 = vsel %vm5723_vm5, %v5713_v40, 2102212464 }
 0x3e7   : > { %v5729_v56 = vsel %vm5723_vm5, %v5716_v35, 920167782  ;;  %7716 = vsinq.f32 %v5568_v53  ;;  %v7365_v36 = vmin.u32 %v5650_v55, %v11161_v45  ;;  %v5726_v39 = vsel %vm5722_vm4, %v5710_v5, %v5725_v0 }
 0x3e8   : > { %v5728_v43 = vsel %vm5720_vm14, %v5707_v44, %v5710_v5  ;;  %v5730_v19 = vsel %vm5722_vm4, %v5713_v40, %v5729_v56  ;;  %v5732_v17 = vsel %vm5720_vm14, %v5710_v5, %v5713_v40  ;;  %v5733_v57 = vsel %vm5723_vm5, %v5719_v6, 1326507024 }
 0x3e9   : > { %v5736_v23 = vshll.u32 %v5696_v28, 8  ;;  %v5640_v32 = vadd.s32 %v11092_v38, %v11106_v13  ;;  %v5652_v22 = vclz %v7365_v36  ;;  %v5671_v3 = vsel %vm5586_vm1, %v5670_v62, %v5646_v30 }
 0x3ea   : > { %vm5721_vm11 = vcmp.lt.s32.totalorder %v5701_v16, 2  ;;  %vm5579_vm8 = vcmp.eq.s32.totalorder %v11131_v24, 2  ;;  %v5734_v48 = vsel %vm5722_vm4, %v5716_v35, %v5733_v57  ;;  %v11661_v44 = vxor.u32 2147483648, %v10421_v50 }
 0x3eb   : > { %v5727_v61 = vsel %vm5721_vm11, %v5724_v14, %v5726_v39  ;;  %v5731_v33 = vsel %vm5721_vm11, %v5728_v43, %v5730_v19  ;;  %vm5576_vm5 = vcmp.eq.s32.totalorder %v11131_v24, 0  ;;  %v7366_v38 = vadd.s32 4294967294, %v5652_v22 }
 0x3ec   : > { %v5901_v28 = vsel %vm5899_vm10, %v10413_v60, %v11661_v44  ;;  %v5735_v13 = vsel %vm5721_vm11, %v5732_v17, %v5734_v48  ;;  %v11193_v40 = vmul.u32.u64.low %v5736_v23, %v5731_v33  ;;  %v11194_v20 = vmul.u32.u64.high %v5736_v23, %v5731_v33, %v11193_v40 }
 0x3ed   : > { %vm5575_vm14 = vcmp.lt.s32.totalorder %v11131_v24, 2  ;;  %v11198_v30 = vmul.u32.u64.low %v5736_v23, %v5735_v13  ;;  %v11199_v5 = vmul.u32.u64.high %v5736_v23, %v5735_v13, %v11198_v30  ;;  %vm5902_vm4 = vcmp.eq.s32.totalorder %v11138_v31, 2 }
 0x3ee   : > { %v6000_v16 = vand.u32 3, %v10357_v4  ;;  %vm5572_vm2 = vweird.f32 %v10605_v18  ;;  %vm7367_vm10 = vcmp.lt.s32.totalorder %v7366_v38, 0  ;;  %v11206_v35 = vsel %vm11169_vm3, 0, %v5671_v3 }
 0x3ef   : > { %v5743_v42 = vmul.u32 %v5736_v23, %v5727_v61  ;;  %v11662_v37 = vxor.u32 2147483648, %v10413_v60  ;;  %v5655_v6 = vsel %vm7367_vm10, 0, %v7366_v38  ;;  %v6103_v55 = vand.u32 3, %v10492_v29 }
 0x3f0   : > { %v6206_v4 = vand.u32 3, %v10568_v10  ;;  %v5656_v14 = vsub.s32 32, %v5655_v6  ;;  %v5660_v0 = vsub.s32 4294967266, %v5655_v6  ;;  %v5746_v56 = vadd.s32 1, %v11194_v20  ;;  %v11216_v36 = vpop.eup %7714 }
 0x3f1   : > { %v5904_v62 = vsel %vm5902_vm4, %v11662_v37, %v10421_v50  ;;  %vm6002_vm11 = vcmp.eq.s32.totalorder %v6000_v16, 0  ;;  %v5657_v39 = vshll.u32 %v11161_v45, %v5655_v6  ;;  %vm5745_vm4 = vc.u32 %v11199_v5, %v11193_v40  ;;  %v11226_v10 = vpop.eup %7716 }
 0x3f2   : > { %v5905_v53 = vsel %vm5898_vm15, %v5901_v28, %v5904_v62  ;;  %v11663_v50 = vxor.u32 2147483648, %v10487_v26  ;;  %v5580_v31 = vxor.u32 2147483648, %v11216_v36  ;;  %v5658_v43 = vshrl.u32 %v5640_v32, %v5656_v14 }
 0x3f3   : > { %v5906_v60 = vsel %vm4636_vm7, nan, %v5905_v53  ;;  %v5661_v19 = vadd.s32 127, %v5660_v0  ;;  %v5747_v17 = vsel %vm5745_vm4, %v5746_v56, %v11194_v20  ;;  %v5577_v45 = vxor.u32 2147483648, %v11226_v10 }
 0x3f4   : > { %v6004_v29 = vsel %vm6002_vm11, %v10475_v41, %v11663_v50  ;;  %7040 = vst [vmem:[%s8172_s12 + $0x1a0] sm:$0xff] %v5906_v60  ;;  %v5748_v57 = vadd.s32 %v5747_v17, %v5743_v42  ;;  %vm6001_vm15 = vcmp.lt.s32.totalorder %v6000_v16, 2  ;;  %vm6005_vm10 = vcmp.eq.s32.totalorder %v6000_v16, 2 }
 0x3f5   : > { %v5581_v21 = vsel %vm5579_vm8, %v5580_v31, %v11226_v10  ;;  %v5659_v23 = vor.u32 %v5658_v43, %v5657_v39  ;;  %v5662_v22 = vshll.u32 %v5661_v19, 23  ;;  %v11664_v32 = vxor.u32 2147483648, %v10475_v41 }
 0x3f6   : > { %v5578_v61 = vsel %vm5576_vm5, %v11216_v36, %v5577_v45  ;;  %v5749_v33 = vadd.s32 536870912, %v5748_v57  ;;  %vm6104_vm7 = vcmp.lt.s32.totalorder %v6103_v55, 2  ;;  %vm6105_vm8 = vcmp.eq.s32.totalorder %v6103_v55, 0 }
 0x3f7   : > { %v6007_v3 = vsel %vm6005_vm10, %v11664_v32, %v10487_v26  ;;  %v5582_v44 = vsel %vm5575_vm14, %v5578_v61, %v5581_v21  ;;  %v5663_v28 = vor.u32 4788187, %v5662_v22  ;;  %v11665_v13 = vxor.u32 2147483648, %v10573_v63 }
 0x3f8   : > { %v6008_v48 = vsel %vm6001_vm15, %v6004_v29, %v6007_v3  ;;  %v5583_v41 = vsel %vm5572_vm2, nan, %v5582_v44  ;;  %v11251_v26 = vshrl.u32 %v5749_v33, 30  ;;  %vm6108_vm5 = vcmp.eq.s32.totalorder %v6103_v55, 2 }
 0x3f9   : > { %v6009_v38 = vsel %vm4740_vm9, nan, %v6008_v48  ;;  %v6107_v20 = vsel %vm6105_vm8, %v10564_v27, %v11665_v13  ;;  %v5664_v30 = vand.u32 2147483647, %v5663_v28  ;;  %v5666_v24 = vcvt.s32.f32 %v5659_v23  ;;  %5801 = vst [vmem:[%s8172_s12 + $0x188] sm:$0xff] %v5583_v41  ;;  %v11677_v13 = vld [vmem:[#allocation12_spill] sm:$0xff] }
 0x3fa   : > { %7041 = vst [vmem:[%s8172_s12 + $0x1a8] sm:$0xff] %v6009_v38  ;;  %v11666_v1 = vxor.u32 2147483648, %v10564_v27  ;;  %vm6208_vm9 = vcmp.eq.s32.totalorder %v6206_v4, 0  ;;  %v5677_v42 = vadd.s32 3, %v11206_v35  ;;  %v5751_v37 = vshll.u32 %v11251_v26, 30 }
 0x3fb   : > { %v11667_v6 = vxor.u32 2147483648, %v10674_v11  ;;  %v5667_v14 = vmul.f32 %v5666_v24, %v5664_v30  ;;  %vm6211_vm14 = vcmp.eq.s32.totalorder %v6206_v4, 2  ;;  %v6309_v27 = vand.u32 3, %v10679_v9 }
 0x3fc   : > { %v6110_v16 = vsel %vm6108_vm5, %v11666_v1, %v10573_v63  ;;  %v11270_v63 = vsub.s32 %v5748_v57, %v5751_v37  ;;  %vm6207_vm11 = vcmp.lt.s32.totalorder %v6206_v4, 2  ;;  %v11668_v56 = vxor.u32 2147483648, %v10670_v25  ;;  %v11670_v4 = vld [vmem:[#allocation11_spill] sm:$0xff] }
 0x3fd   : > { %v6111_v62 = vsel %vm6104_vm7, %v6107_v20, %v6110_v16  ;;  %v6210_v53 = vsel %vm6208_vm9, %v10670_v25, %v11667_v6  ;;  %v5668_v39 = vxor.u32 2147483648, %v5667_v14  ;;  %v6412_v43 = vand.u32 3, %v10801_v52  ;;  %v11672_v25 = vld [vmem:[#allocation6_spill] sm:$0xff]  ;;  %v11679_v1 = vld [vmem:[#allocation15_spill] sm:$0xff] }
 0x3fe   : > { %v6112_v0 = vsel %vm4844_vm0, nan, %v6111_v62  ;;  %v6213_v55 = vsel %vm6211_vm14, %v11668_v56, %v10674_v11  ;;  %v5754_v50 = vsub.s32 0, %v11270_v63  ;;  %vm6311_vm0 = vcmp.eq.s32.totalorder %v6309_v27, 0  ;;  %v11682_v62 = vld [vmem:[#allocation13_spill] sm:$0xff]  ;;  %v11684_v56 = vld [vmem:[#allocation8_spill] sm:$0xff] }
 0x3ff   : > { %7042 = vst [vmem:[%s8172_s12 + $0x1b0] sm:$0xff] %v6112_v0  ;;  %v6214_v60 = vsel %vm6207_vm11, %v6210_v53, %v6213_v55  ;;  %v5669_v9 = vsel %vm5586_vm1, %v5668_v39, %v5667_v14  ;;  %v11282_v19 = vand.u32 3, %v5677_v42  ;;  %v11671_v17 = vxor.u32 2147483648, %v11670_v4 }
 0x400   : > { %v6215_v58 = vsel %vm4948_vm13, nan, %v6214_v60  ;;  %vm6314_vm4 = vcmp.eq.s32.totalorder %v6309_v27, 2  ;;  %v5672_v57 = vsel %vm11169_vm3, %v10612_v7, %v5669_v9  ;;  %v7369_v21 = vmin.u32 %v5754_v50, %v11270_v63  ;;  %v11686_v50 = vld [vmem:[#allocation17_spill] sm:$0xff] }
 0x401   : > { %v6313_v11 = vsel %vm6311_vm0, %v11672_v25, %v11671_v17  ;;  %7043 = vst [vmem:[%s8172_s12 + $0x1b8] sm:$0xff] %v6215_v58  ;;  %vm6310_vm13 = vcmp.lt.s32.totalorder %v6309_v27, 2  ;;  %v11673_v52 = vxor.u32 2147483648, %v11672_v25  ;;  %7718 = vcosq.f32 %v5672_v57  ;;  %v11688_v58 = vld [vmem:[#allocation16_spill] sm:$0xff] }
 0x402   : > { %v5744_v22 = vadd.s32 %v11193_v40, %v11199_v5  ;;  %v5774_v32 = vsub.s32 4, %v11251_v26  ;;  %7720 = vsinq.f32 %v5672_v57  ;;  %v5756_v61 = vclz %v7369_v21 }
 0x403   : > { %v6316_v23 = vsel %vm6314_vm4, %v11673_v52, %v11670_v4  ;;  %vm6414_vm1 = vcmp.eq.s32.totalorder %v6412_v43, 0  ;;  %vm6417_vm15 = vcmp.eq.s32.totalorder %v6412_v43, 2  ;;  %vm6413_vm3 = vcmp.lt.s32.totalorder %v6412_v43, 2  ;;  %v11690_v52 = vld [vmem:[#allocation5_spill] sm:$0xff] }
 0x404   : > { %v6317_v3 = vsel %vm6310_vm13, %v6313_v11, %v6316_v23  ;;  %v11675_v48 = vxor.u32 2147483648, %v10859_v12  ;;  %v11676_v28 = vxor.u32 2147483648, %v10851_v34  ;;  %v7370_v40 = vadd.s32 4294967294, %v5756_v61 }
 0x405   : > { %v6318_v33 = vsel %vm5052_vm6, nan, %v6317_v3  ;;  %v6515_v41 = vand.u32 3, %v10855_v59  ;;  %v6618_v20 = vand.u32 3, %v11677_v13  ;;  %vm5683_vm10 = vcmp.eq.s32.totalorder %v11282_v19, 2 }
 0x406   : > { %v6416_v44 = vsel %vm6414_vm1, %v10851_v34, %v11675_v48  ;;  %v6419_v38 = vsel %vm6417_vm15, %v11676_v28, %v10859_v12  ;;  %7044 = vst [vmem:[%s8172_s12 + $0x1c0] sm:$0xff] %v6318_v33  ;;  %v6721_v16 = vand.u32 3, %v11679_v1  ;;  %v6824_v42 = vand.u32 3, %v11099_v47  ;;  %v11680_v12 = vld [vmem:[#allocation14_spill] sm:$0xff] }
 0x407   : > { %v6420_v5 = vsel %vm6413_vm3, %v6416_v44, %v6419_v38  ;;  %v11315_v34 = vand.u32 3, %v11206_v35  ;;  %vm5680_vm6 = vcmp.eq.s32.totalorder %v11282_v19, 0  ;;  %vm7371_vm7 = vcmp.lt.s32.totalorder %v7370_v40, 0 }
 0x408   : > { %v6421_v24 = vsel %vm5156_vm12, nan, %v6420_v5  ;;  %vm6516_vm8 = vcmp.lt.s32.totalorder %v6515_v41, 2  ;;  %vm6517_vm5 = vcmp.eq.s32.totalorder %v6515_v41, 0  ;;  %vm6520_vm9 = vcmp.eq.s32.totalorder %v6515_v41, 2 }
 0x409   : > { %7045 = vst [vmem:[%s8172_s12 + $0x1c8] sm:$0xff] %v6421_v24  ;;  %vm5679_vm14 = vcmp.lt.s32.totalorder %v11282_v19, 2  ;;  %v5759_v59 = vsel %vm7371_vm7, 0, %v7370_v40  ;;  %v11681_v37 = vxor.u32 2147483648, %v11680_v12  ;;  %v11683_v47 = vxor.u32 2147483648, %v11682_v62 }
 0x40a   : > { %vm6619_vm12 = vcmp.lt.s32.totalorder %v6618_v20, 2  ;;  %vm5676_vm11 = vweird.f32 %v10612_v7  ;;  %v5760_v53 = vsub.s32 32, %v5759_v59  ;;  %v5761_v14 = vshll.u32 %v11270_v63, %v5759_v59 }
 0x40b   : > { %v6519_v6 = vsel %vm6517_vm5, %v11682_v62, %v11681_v37  ;;  %v6522_v35 = vsel %vm6520_vm9, %v11683_v47, %v11680_v12  ;;  %v5764_v0 = vsub.s32 4294967266, %v5759_v59  ;;  %vm11685_vm0 = vweird.f32 %v11684_v56  ;;  %v7719_v63 = vpop.eup %7718 }
 0x40c   : > { %v6523_v27 = vsel %vm6516_vm8, %v6519_v6, %v6522_v35  ;;  %vm6620_vm4 = vcmp.eq.s32.totalorder %v6618_v20, 0  ;;  %vm6623_vm13 = vcmp.eq.s32.totalorder %v6618_v20, 2  ;;  %vm6722_vm1 = vcmp.lt.s32.totalorder %v6721_v16, 2  ;;  %v7721_v25 = vpop.eup %7720 }
 0x40d   : > { %v6524_v55 = vsel %vm11685_vm0, nan, %v6523_v27  ;;  %v5762_v39 = vshrl.u32 %v5744_v22, %v5760_v53  ;;  %v5765_v60 = vadd.s32 127, %v5764_v0  ;;  %v11687_v29 = vxor.u32 2147483648, %v11686_v50 }
 0x40e   : > { %v11689_v9 = vxor.u32 2147483648, %v11688_v58  ;;  %7046 = vst [vmem:[%s8172_s12 + $0x1d0] sm:$0xff] %v6524_v55  ;;  %vm6723_vm15 = vcmp.eq.s32.totalorder %v6721_v16, 0  ;;  %vm6726_vm3 = vcmp.eq.s32.totalorder %v6721_v16, 2  ;;  %vm6825_vm7 = vcmp.lt.s32.totalorder %v6824_v42, 2 }
 0x40f   : > { %v6622_v43 = vsel %vm6620_vm4, %v11688_v58, %v11687_v29  ;;  %v5684_v11 = vxor.u32 2147483648, %v7719_v63  ;;  %v5763_v57 = vor.u32 %v5762_v39, %v5761_v14  ;;  %v5766_v21 = vshll.u32 %v5765_v60, 23 }
 0x410   : > { %v6625_v4 = vsel %vm6623_vm13, %v11689_v9, %v11686_v50  ;;  %vm11691_vm8 = vweird.f32 %v11690_v52  ;;  %v5681_v22 = vxor.u32 2147483648, %v7721_v25  ;;  %v6725_v3 = vsel %vm6723_vm15, %v11120_v51, %v5473_v46 }
 0x411   : > { %v6626_v17 = vsel %vm6619_vm12, %v6622_v43, %v6625_v4  ;;  %v6728_v61 = vsel %vm6726_vm3, %v5476_v2, %v11126_v49  ;;  %vm6826_vm5 = vcmp.eq.s32.totalorder %v6824_v42, 0  ;;  %v5685_v15 = vsel %vm5683_vm10, %v5684_v11, %v7721_v25 }
 0x412   : > { %v6627_v23 = vsel %vm11691_vm8, nan, %v6626_v17  ;;  %v5767_v33 = vor.u32 4788187, %v5766_v21  ;;  %v5770_v48 = vcvt.s32.f32 %v5763_v57  ;;  %v6729_v44 = vsel %vm6722_vm1, %v6725_v3, %v6728_v61 }
 0x413   : > { %7047 = vst [vmem:[%s8172_s12 + $0x1d8] sm:$0xff] %v6627_v23  ;;  %v5682_v28 = vsel %vm5680_vm6, %v7719_v63, %v5681_v22  ;;  %vm11692_vm9 = vweird.f32 %v10602_v8  ;;  %v6828_v51 = vsel %vm6826_vm5, %v11216_v36, %v5577_v45  ;;  %vm6829_vm12 = vcmp.eq.s32.totalorder %v6824_v42, 2 }
 0x414   : > { %v6730_v46 = vsel %vm11692_vm9, nan, %v6729_v44  ;;  %v5686_v49 = vsel %vm5679_vm14, %v5682_v28, %v5685_v15  ;;  %v5768_v2 = vand.u32 2147483647, %v5767_v33  ;;  %v6831_v38 = vsel %vm6829_vm12, %v5580_v31, %v11226_v10 }
 0x415   : > { %vm6928_vm10 = vcmp.lt.s32.totalorder %v11315_v34, 2  ;;  %7048 = vst [vmem:[%s8172_s12 + $0x1e0] sm:$0xff] %v6730_v46  ;;  %v5687_v8 = vsel %vm5676_vm11, nan, %v5686_v49  ;;  %v6832_v40 = vsel %vm6825_vm7, %v6828_v51, %v6831_v38  ;;  %vm6929_vm6 = vcmp.eq.s32.totalorder %v11315_v34, 0 }
 0x416   : > { %vm6932_vm0 = vcmp.eq.s32.totalorder %v11315_v34, 2  ;;  %v5771_v45 = vmul.f32 %v5770_v48, %v5768_v2  ;;  %5802 = vst [vmem:[%s8172_s12 + $0x190] sm:$0xff] %v5687_v8  ;;  %v6833_v19 = vsel %vm5572_vm2, nan, %v6832_v40  ;;  %v6931_v36 = vsel %vm6929_vm6, %v7719_v63, %v5681_v22 }
 0x417   : > { %v6934_v10 = vsel %vm6932_vm0, %v5684_v11, %v7721_v25  ;;  %7049 = vst [vmem:[%s8172_s12 + $0x1e8] sm:$0xff] %v6833_v19  ;;  %vm5690_vm14 = vcmp.lt.s32.totalorder %v10732_v54, 0  ;;  %v11693_v13 = vand.u32 2147483647, %v10732_v54  ;;  %vm5780_vm7 = vweird.f32 %v10732_v54 }
 0x418   : > { %v6935_v31 = vsel %vm6928_vm10, %v6931_v36, %v6934_v10  ;;  %v5772_v5 = vxor.u32 2147483648, %v5771_v45  ;;  %v5775_v18 = vsel %vm5690_vm14, %v5774_v32, %v11251_v26 }
 0x419   : > { %v6936_v41 = vsel %vm5676_vm11, nan, %v6935_v31  ;;  %vm5689_vm4 = vcmp.le.f32.partialorder %v11693_v13, 0.7853982 }
 0x41a   : > { %7050 = vst [vmem:[%s8172_s12 + $0x1f0] sm:$0xff] %v6936_v41  ;;  %v5773_v20 = vsel %vm5690_vm14, %v5772_v5, %v5771_v45  ;;  %v5777_v24 = vsel %vm5689_vm4, 0, %v5775_v18 }
 0x41b   : > { %v5776_v30 = vsel %vm5689_vm4, %v10732_v54, %v5773_v20  ;;  %v5781_v1 = vadd.s32 3, %v5777_v24  ;;  %v7030_v7 = vand.u32 3, %v5777_v24 }
 0x41c   : > { %7722 = vcosq.f32 %v5776_v30 }
 0x41d   : > { %7724 = vsinq.f32 %v5776_v30  ;;  %v5782_v16 = vand.u32 3, %v5781_v1  ;;  %vm7035_vm11 = vcmp.eq.s32.totalorder %v7030_v7, 2  ;;  %vm7032_vm1 = vcmp.eq.s32.totalorder %v7030_v7, 0 }
 0x41e   : > { %vm7031_vm3 = vcmp.lt.s32.totalorder %v7030_v7, 2 }
 0x41f   : > { %vm5787_vm2 = vcmp.eq.s32.totalorder %v5782_v16, 2  ;;  %vm5784_vm13 = vcmp.eq.s32.totalorder %v5782_v16, 0  ;;  %vm5783_vm15 = vcmp.lt.s32.totalorder %v5782_v16, 2 }
 0x426   : > { %v7723_v42 = vpop.eup %7722 }
 0x427   : > { %v7725_v34 = vpop.eup %7724  ;;  %v5788_v59 = vxor.u32 2147483648, %v7723_v42 }
 0x428   : > { %v5785_v12 = vxor.u32 2147483648, %v7725_v34 }
 0x429   : > { %v5789_v37 = vsel %vm5787_vm2, %v5788_v59, %v7725_v34  ;;  %v7037_v26 = vsel %vm7035_vm11, %v5788_v59, %v7725_v34 }
 0x42a   : > { %v5786_v32 = vsel %vm5784_vm13, %v7723_v42, %v5785_v12  ;;  %v7034_v62 = vsel %vm7032_vm1, %v7723_v42, %v5785_v12 }
 0x42b   : > { %v5790_v6 = vsel %vm5783_vm15, %v5786_v32, %v5789_v37  ;;  %v7038_v47 = vsel %vm7031_vm3, %v7034_v62, %v7037_v26 }
 0x42c   : > { %v5791_v35 = vsel %vm5780_vm7, nan, %v5790_v6  ;;  %v7039_v53 = vsel %vm5780_vm7, nan, %v7038_v47 }
 0x42d   : > { %5803 = vst [vmem:[%s8172_s12 + $0x198] sm:$0xff] %v5791_v35  ;;  %7051 = vst [vmem:[%s8172_s12 + $0x1f8] sm:$0xff] %v7039_v53 }
 0x42e PF: > { %s13_s11 = sadd.s32 1, %s7780_s11   ;;  %s11694_s9 = smov %s7776_s10 }
 0x42f   : > { %p10_p4 = scmp.ge.s32.totalorder %s13_s11, 4   ;;  %s11695_s10 = smov %s11697_s13 }
 0x431   :  { %12 = sbr.rel (!%p10_p4) target bundleno = 2 (0x2), region = 65 }
 0x438   :  { %7082 = vsyncpa [#allocation3], 1 }
 0x439   :  { %7084 = vsyncpa [#allocation3 + $0x1], 1 }

</bundles_post_ra>
